<compile_context>
chip_gen: v5e
topology: v5e:2x2
jax: 0.10.0
libtpu: 0.0.40
codegen_flags: <defaults>
</compile_context>

<pallas_src>
import numpy as np
import jax
import jax.numpy as jnp
from jax import lax
from jax.experimental import pallas as pl
from jax.experimental.pallas import tpu as pltpu

_EPS = 1e-5          # nn.InstanceNorm2d default (affine=False, biased variance)
_SUBLANE = 8


def _instance_norm(h, n_img, hw):
    """Per-image InstanceNorm over the lane axis of a (C, n_img*hw) f32 tile."""
    def norm(hi):
        m = jnp.mean(hi, axis=1, keepdims=True)
        v = jnp.mean(hi * hi, axis=1, keepdims=True) - m * m
        v = jnp.maximum(v, 0.0)                       # guard f32 cancellation
        return (hi - m) * lax.rsqrt(v + _EPS)
    if n_img == 1:
        return norm(h)
    # Static 256-lane slices are vreg-aligned; concat is pure placement.
    return jnp.concatenate(
        [norm(h[:, i * hw:(i + 1) * hw]) for i in range(n_img)], axis=1)


def _conv_im2col(h, w_ref, b_ref, mask_ref, k, W, N, mxu_dtype):
    """'Same' KxK conv as a single im2col MXU matmul.

    h        : (Cin, N) f32 activations, N = Bt*HW (images folded along lanes).
    w_ref    : (Cout, k*k*Cin) dense weights, columns ordered tap-major /
               channel-minor (matches the concat order below).
    b_ref    : (Cout, 1) bias.
    mask_ref : (k*k, N) f32 zero-padding validity masks (precomputed on host).
    Correctness of the roll+mask trick requires k//2 < H and k//2 < W: every
    wrapped or cross-image lane is a padding position and therefore masked.
    """
    p = k // 2
    cols = []
    for dy in range(k):
        for dx in range(k):
            t = dy * k + dx
            s = (dy - p) * W + (dx - p)               # flat spatial shift
            piece = pltpu.roll(h, shift=(-s) % N, axis=1) if s else h
            if s:                                     # center tap needs no mask
                piece = piece * mask_ref[pl.ds(t, 1), :]
            cols.append(piece.astype(mxu_dtype))
    cols = jnp.concatenate(cols, axis=0)              # (k*k*Cin, N)
    acc = jnp.dot(w_ref[...], cols, preferred_element_type=jnp.float32)
    return acc + b_ref[...]


def _make_kernel(H, W, n_img, mxu_dtype):
    HW = H * W
    N = n_img * HW

    def kernel(x_ref, m7_ref, m3_ref,
               w1_ref, b1_ref, w2_ref, b2_ref, w3_ref, b3_ref, o_ref):
        h = x_ref[...].astype(jnp.float32)                        # (Cin_pad, N)
        h = _conv_im2col(h, w1_ref, b1_ref, m7_ref, 7, W, N, mxu_dtype)
        h = jnp.maximum(_instance_norm(h, n_img, HW), 0.0)
        h = _conv_im2col(h, w2_ref, b2_ref, m3_ref, 3, W, N, mxu_dtype)
        h = jnp.maximum(_instance_norm(h, n_img, HW), 0.0)
        h = _conv_im2col(h, w3_ref, b3_ref, m3_ref, 3, W, N, mxu_dtype)
        h = _instance_norm(h, n_img, HW)                          # no ReLU here
        o_ref[...] = h.astype(o_ref.dtype)             # (enc_dim, N) lane-dense

    return kernel


def _padding_masks(k, H, W, n_img):
    """Host-side (k*k, n_img*H*W) f32 validity masks for 'same' zero padding."""
    p = k // 2
    r = np.arange(H * W) // W
    c = np.arange(H * W) % W
    rows = []
    for dy in range(k):
        for dx in range(k):
            oy, ox = dy - p, dx - p
            valid = ((r + oy >= 0) & (r + oy < H) &
                     (c + ox >= 0) & (c + ox < W))
            rows.append(valid.astype(np.float32))
    m = np.stack(rows, axis=0)                         # (k*k, HW)
    return jnp.asarray(np.tile(m, (1, n_img)))         # (k*k, n_img*HW)


def _pack_weight(w, cin_pad):
    """(Cout, Cin, k, k) -> dense (Cout, k*k*cin_pad), tap-major columns."""
    c_out, c_in, k, _ = w.shape
    w = jnp.transpose(w, (0, 2, 3, 1))                 # (Cout, k, k, Cin)
    if cin_pad != c_in:
        w = jnp.pad(w, ((0, 0), (0, 0), (0, 0), (0, cin_pad - c_in)))
    return w.reshape(c_out, k * k * cin_pad)


def _pick_block_batch(B, max_bt=8):
    """Largest divisor of B (<= max_bt) that still leaves >= 2 grid steps."""
    for bt in range(min(max_bt, B), 0, -1):
        if B % bt == 0 and B // bt >= 2:
            return bt
    for bt in range(min(max_bt, B), 0, -1):
        if B % bt == 0:
            return bt
    return 1


def three_layer_encoder_pallas(img, params, *, block_batch=None,
                               use_bf16_mxu=False):
    """img: (B, 3, H, W).  params: [(w (Cout,Cin,k,k), b (Cout,)) x 3].

    Returns (B, enc_dim, H, W), matching ThreeLayerEncoder.forward.
    """
    B, c_in, H, W = img.shape
    assert H > 3 and W > 3, "roll+mask padding needs k//2 < H, W"
    HW = H * W
    (w1, b1), (w2, b2), (w3, b3) = params
    enc_dim = w3.shape[0]

    bt = block_batch if block_batch is not None else _pick_block_batch(B)
    assert B % bt == 0, (B, bt)
    g = B // bt
    n = bt * HW

    mxu_dtype = jnp.bfloat16 if use_bf16_mxu else jnp.float32
    cin_pad = -(-c_in // _SUBLANE) * _SUBLANE          # 3 -> 8: aligned im2col

    # (B, C, H, W) -> (g, C, bt*HW): fold bt images along lanes (free if bt=1),
    # pad input channels with zero rows so every im2col tap slab is 8-aligned.
    x = img.reshape(g, bt, c_in, HW).transpose(0, 2, 1, 3).reshape(g, c_in, n)
    x = jnp.pad(x, ((0, 0), (0, cin_pad - c_in), (0, 0)))

    m7 = _padding_masks(7, H, W, bt)
    m3 = _padding_masks(3, H, W, bt)                   # shared by conv2 & conv3

    w1p = _pack_weight(w1, cin_pad).astype(mxu_dtype)
    w2p = _pack_weight(w2, w2.shape[1]).astype(mxu_dtype)
    w3p = _pack_weight(w3, w3.shape[1]).astype(mxu_dtype)
    b1p, b2p, b3p = (b.reshape(-1, 1).astype(jnp.float32) for b in (b1, b2, b3))

    def full_spec(a):
        nd = a.ndim
        return pl.BlockSpec(a.shape, lambda i, _nd=nd: (0,) * _nd)

    out = pl.pallas_call(
        _make_kernel(H, W, bt, mxu_dtype),
        out_shape=jax.ShapeDtypeStruct((g, enc_dim, n), img.dtype),
        grid_spec=pltpu.PrefetchScalarGridSpec(
            num_scalar_prefetch=0,
            grid=(g,),
            in_specs=[
                pl.BlockSpec((None, cin_pad, n), lambda i: (i, 0, 0)),
                full_spec(m7), full_spec(m3),
                full_spec(w1p), full_spec(b1p),
                full_spec(w2p), full_spec(b2p),
                full_spec(w3p), full_spec(b3p),
            ],
            out_specs=pl.BlockSpec((None, enc_dim, n), lambda i: (i, 0, 0)),
        ),
        compiler_params=pltpu.CompilerParams(
            dimension_semantics=("parallel",),   # batch blocks shard across TCs
        ),
    )(x, m7, m3, w1p, b1p, w2p, b2p, w3p, b3p)

    # (g, enc_dim, bt*HW) -> (B, enc_dim, H, W)   (free reshape when bt == 1)
    out = out.reshape(g, enc_dim, bt, HW).transpose(0, 2, 1, 3)
    return out.reshape(B, enc_dim, H, W)


def three_layer_encoder_ref(img, params):
    """Pure-JAX reference mirroring the PyTorch forward."""
    x = img.astype(jnp.float32)
    n = len(params)
    for i, (w, b) in enumerate(params):
        x = lax.conv_general_dilated(
            x, w, window_strides=(1, 1), padding="SAME",
            dimension_numbers=("NCHW", "OIHW", "NCHW"),
            precision=lax.Precision.HIGHEST)
        x = x + b.reshape(1, -1, 1, 1)
        m = jnp.mean(x, axis=(2, 3), keepdims=True)
        v = jnp.mean((x - m) ** 2, axis=(2, 3), keepdims=True)
        x = (x - m) * lax.rsqrt(v + _EPS)
        if i < n - 1:
            x = jnp.maximum(x, 0.0)         # ReLU only after the first two norms
    return x


def init_params(key, enc_dim):
    """Kaiming-normal (fan_out, relu) conv weights, zero biases, PyTorch layout."""
    channels = [3, enc_dim // 4, enc_dim // 2, enc_dim]
    ksizes = [7, 3, 3]
    params = []
    for i, k in enumerate(ksizes):
        c_in, c_out = channels[i], channels[i + 1]
        key, kw = jax.random.split(key)
        std = (2.0 / (c_out * k * k)) ** 0.5
        w = std * jax.random.normal(kw, (c_out, c_in, k, k), jnp.float32)
        b = jnp.zeros((c_out,), jnp.float32)
        params.append((w, b))
    return params


if __name__ == "__main__":
    B, H, W = 4, 16, 16        # small; B=4 exercises the batched (Bt=2) path
    enc_dim = 32

    key = jax.random.PRNGKey(0)
    key, kimg = jax.random.split(key)
    img = jax.random.normal(kimg, (B, 3, H, W), jnp.float32)
    params = init_params(key, enc_dim)

    # NOTE: use_bf16_mxu=True doubles MXU throughput on v6e/v7x; kept off here
    # to preserve the 1e-3 parity check against the f32 reference.
    out = jax.block_until_ready(three_layer_encoder_pallas(img, params))

    ref = three_layer_encoder_ref(img, params)
    assert out.shape == (B, enc_dim, H, W), out.shape
    err = float(jnp.max(jnp.abs(out - ref)))
    assert err < 1e-3, err
    print("KERNEL_OK")
</pallas_src>

<mosaic_0001>
module attributes {stable_mosaic.version = 11 : i64} {
  func.func @kernel(%arg0: i32, %arg1: memref<1x8x512xf32, #tpu.memory_space<vmem>>, %arg2: memref<49x512xf32, #tpu.memory_space<vmem>>, %arg3: memref<9x512xf32, #tpu.memory_space<vmem>>, %arg4: memref<8x392xf32, #tpu.memory_space<vmem>>, %arg5: memref<8x1xf32, #tpu.memory_space<vmem>>, %arg6: memref<16x72xf32, #tpu.memory_space<vmem>>, %arg7: memref<16x1xf32, #tpu.memory_space<vmem>>, %arg8: memref<32x144xf32, #tpu.memory_space<vmem>>, %arg9: memref<32x1xf32, #tpu.memory_space<vmem>>, %arg10: memref<1x32x512xf32, #tpu.memory_space<vmem>>) attributes {dimension_semantics = [#tpu.dimension_semantics<parallel>], iteration_bounds = array<i64: 2>, scalar_prefetch = 0 : i64, scratch_operands = 0 : i64, tpu.core_type = #tpu.core_type<tc>, window_params = [{transform_indices = @transform_0, window_bounds = array<i64: 1, 8, 512>}, {pipeline_mode = #tpu.pipeline_mode<synchronous>, transform_indices = @transform_1, window_bounds = array<i64: 49, 512>}, {pipeline_mode = #tpu.pipeline_mode<synchronous>, transform_indices = @transform_2, window_bounds = array<i64: 9, 512>}, {pipeline_mode = #tpu.pipeline_mode<synchronous>, transform_indices = @transform_3, window_bounds = array<i64: 8, 392>}, {pipeline_mode = #tpu.pipeline_mode<synchronous>, transform_indices = @transform_4, window_bounds = array<i64: 8, 1>}, {pipeline_mode = #tpu.pipeline_mode<synchronous>, transform_indices = @transform_5, window_bounds = array<i64: 16, 72>}, {pipeline_mode = #tpu.pipeline_mode<synchronous>, transform_indices = @transform_6, window_bounds = array<i64: 16, 1>}, {pipeline_mode = #tpu.pipeline_mode<synchronous>, transform_indices = @transform_7, window_bounds = array<i64: 32, 144>}, {pipeline_mode = #tpu.pipeline_mode<synchronous>, transform_indices = @transform_8, window_bounds = array<i64: 32, 1>}, {transform_indices = @transform_9, window_bounds = array<i64: 1, 32, 512>}]} {
    %c0 = arith.constant 0 : index
    %c0_0 = arith.constant 0 : index
    %c0_1 = arith.constant 0 : index
    %0 = vector.load %arg1[%c0, %c0_0, %c0_1] : memref<1x8x512xf32, #tpu.memory_space<vmem>>, vector<1x8x512xf32>
    %1 = vector.shape_cast %0 : vector<1x8x512xf32> to vector<8x512xf32>
    %c51_i32 = arith.constant 51 : i32
    %2 = tpu.dynamic_rotate %1 by %c51_i32 dim 1 : vector<8x512xf32>, i32 -> vector<8x512xf32>
    %c0_2 = arith.constant 0 : index
    %c0_3 = arith.constant 0 : index
    %3 = vector.load %arg2[%c0_2, %c0_3] : memref<49x512xf32, #tpu.memory_space<vmem>>, vector<1x512xf32>
    %4 = vector.broadcast %3 : vector<1x512xf32> to vector<8x512xf32>
    %5 = arith.mulf %2, %4 : vector<8x512xf32>
    %c50_i32 = arith.constant 50 : i32
    %6 = tpu.dynamic_rotate %1 by %c50_i32 dim 1 : vector<8x512xf32>, i32 -> vector<8x512xf32>
    %c1 = arith.constant 1 : index
    %c0_4 = arith.constant 0 : index
    %7 = vector.load %arg2[%c1, %c0_4] : memref<49x512xf32, #tpu.memory_space<vmem>>, vector<1x512xf32>
    %8 = vector.broadcast %7 : vector<1x512xf32> to vector<8x512xf32>
    %9 = arith.mulf %6, %8 : vector<8x512xf32>
    %c49_i32 = arith.constant 49 : i32
    %10 = tpu.dynamic_rotate %1 by %c49_i32 dim 1 : vector<8x512xf32>, i32 -> vector<8x512xf32>
    %c2 = arith.constant 2 : index
    %c0_5 = arith.constant 0 : index
    %11 = vector.load %arg2[%c2, %c0_5] : memref<49x512xf32, #tpu.memory_space<vmem>>, vector<1x512xf32>
    %12 = vector.broadcast %11 : vector<1x512xf32> to vector<8x512xf32>
    %13 = arith.mulf %10, %12 : vector<8x512xf32>
    %c48_i32 = arith.constant 48 : i32
    %14 = tpu.dynamic_rotate %1 by %c48_i32 dim 1 : vector<8x512xf32>, i32 -> vector<8x512xf32>
    %c3 = arith.constant 3 : index
    %c0_6 = arith.constant 0 : index
    %15 = vector.load %arg2[%c3, %c0_6] : memref<49x512xf32, #tpu.memory_space<vmem>>, vector<1x512xf32>
    %16 = vector.broadcast %15 : vector<1x512xf32> to vector<8x512xf32>
    %17 = arith.mulf %14, %16 : vector<8x512xf32>
    %c47_i32 = arith.constant 47 : i32
    %18 = tpu.dynamic_rotate %1 by %c47_i32 dim 1 : vector<8x512xf32>, i32 -> vector<8x512xf32>
    %c4 = arith.constant 4 : index
    %c0_7 = arith.constant 0 : index
    %19 = vector.load %arg2[%c4, %c0_7] : memref<49x512xf32, #tpu.memory_space<vmem>>, vector<1x512xf32>
    %20 = vector.broadcast %19 : vector<1x512xf32> to vector<8x512xf32>
    %21 = arith.mulf %18, %20 : vector<8x512xf32>
    %c46_i32 = arith.constant 46 : i32
    %22 = tpu.dynamic_rotate %1 by %c46_i32 dim 1 : vector<8x512xf32>, i32 -> vector<8x512xf32>
    %c5 = arith.constant 5 : index
    %c0_8 = arith.constant 0 : index
    %23 = vector.load %arg2[%c5, %c0_8] : memref<49x512xf32, #tpu.memory_space<vmem>>, vector<1x512xf32>
    %24 = vector.broadcast %23 : vector<1x512xf32> to vector<8x512xf32>
    %25 = arith.mulf %22, %24 : vector<8x512xf32>
    %c45_i32 = arith.constant 45 : i32
    %26 = tpu.dynamic_rotate %1 by %c45_i32 dim 1 : vector<8x512xf32>, i32 -> vector<8x512xf32>
    %c6 = arith.constant 6 : index
    %c0_9 = arith.constant 0 : index
    %27 = vector.load %arg2[%c6, %c0_9] : memref<49x512xf32, #tpu.memory_space<vmem>>, vector<1x512xf32>
    %28 = vector.broadcast %27 : vector<1x512xf32> to vector<8x512xf32>
    %29 = arith.mulf %26, %28 : vector<8x512xf32>
    %c35_i32 = arith.constant 35 : i32
    %30 = tpu.dynamic_rotate %1 by %c35_i32 dim 1 : vector<8x512xf32>, i32 -> vector<8x512xf32>
    %c7 = arith.constant 7 : index
    %c0_10 = arith.constant 0 : index
    %31 = vector.load %arg2[%c7, %c0_10] : memref<49x512xf32, #tpu.memory_space<vmem>>, vector<1x512xf32>
    %32 = vector.broadcast %31 : vector<1x512xf32> to vector<8x512xf32>
    %33 = arith.mulf %30, %32 : vector<8x512xf32>
    %c34_i32 = arith.constant 34 : i32
    %34 = tpu.dynamic_rotate %1 by %c34_i32 dim 1 : vector<8x512xf32>, i32 -> vector<8x512xf32>
    %c8 = arith.constant 8 : index
    %c0_11 = arith.constant 0 : index
    %35 = vector.load %arg2[%c8, %c0_11] : memref<49x512xf32, #tpu.memory_space<vmem>>, vector<1x512xf32>
    %36 = vector.broadcast %35 : vector<1x512xf32> to vector<8x512xf32>
    %37 = arith.mulf %34, %36 : vector<8x512xf32>
    %c33_i32 = arith.constant 33 : i32
    %38 = tpu.dynamic_rotate %1 by %c33_i32 dim 1 : vector<8x512xf32>, i32 -> vector<8x512xf32>
    %c9 = arith.constant 9 : index
    %c0_12 = arith.constant 0 : index
    %39 = vector.load %arg2[%c9, %c0_12] : memref<49x512xf32, #tpu.memory_space<vmem>>, vector<1x512xf32>
    %40 = vector.broadcast %39 : vector<1x512xf32> to vector<8x512xf32>
    %41 = arith.mulf %38, %40 : vector<8x512xf32>
    %c32_i32 = arith.constant 32 : i32
    %42 = tpu.dynamic_rotate %1 by %c32_i32 dim 1 : vector<8x512xf32>, i32 -> vector<8x512xf32>
    %c10 = arith.constant 10 : index
    %c0_13 = arith.constant 0 : index
    %43 = vector.load %arg2[%c10, %c0_13] : memref<49x512xf32, #tpu.memory_space<vmem>>, vector<1x512xf32>
    %44 = vector.broadcast %43 : vector<1x512xf32> to vector<8x512xf32>
    %45 = arith.mulf %42, %44 : vector<8x512xf32>
    %c31_i32 = arith.constant 31 : i32
    %46 = tpu.dynamic_rotate %1 by %c31_i32 dim 1 : vector<8x512xf32>, i32 -> vector<8x512xf32>
    %c11 = arith.constant 11 : index
    %c0_14 = arith.constant 0 : index
    %47 = vector.load %arg2[%c11, %c0_14] : memref<49x512xf32, #tpu.memory_space<vmem>>, vector<1x512xf32>
    %48 = vector.broadcast %47 : vector<1x512xf32> to vector<8x512xf32>
    %49 = arith.mulf %46, %48 : vector<8x512xf32>
    %c30_i32 = arith.constant 30 : i32
    %50 = tpu.dynamic_rotate %1 by %c30_i32 dim 1 : vector<8x512xf32>, i32 -> vector<8x512xf32>
    %c12 = arith.constant 12 : index
    %c0_15 = arith.constant 0 : index
    %51 = vector.load %arg2[%c12, %c0_15] : memref<49x512xf32, #tpu.memory_space<vmem>>, vector<1x512xf32>
    %52 = vector.broadcast %51 : vector<1x512xf32> to vector<8x512xf32>
    %53 = arith.mulf %50, %52 : vector<8x512xf32>
    %c29_i32 = arith.constant 29 : i32
    %54 = tpu.dynamic_rotate %1 by %c29_i32 dim 1 : vector<8x512xf32>, i32 -> vector<8x512xf32>
    %c13 = arith.constant 13 : index
    %c0_16 = arith.constant 0 : index
    %55 = vector.load %arg2[%c13, %c0_16] : memref<49x512xf32, #tpu.memory_space<vmem>>, vector<1x512xf32>
    %56 = vector.broadcast %55 : vector<1x512xf32> to vector<8x512xf32>
    %57 = arith.mulf %54, %56 : vector<8x512xf32>
    %c19_i32 = arith.constant 19 : i32
    %58 = tpu.dynamic_rotate %1 by %c19_i32 dim 1 : vector<8x512xf32>, i32 -> vector<8x512xf32>
    %c14 = arith.constant 14 : index
    %c0_17 = arith.constant 0 : index
    %59 = vector.load %arg2[%c14, %c0_17] : memref<49x512xf32, #tpu.memory_space<vmem>>, vector<1x512xf32>
    %60 = vector.broadcast %59 : vector<1x512xf32> to vector<8x512xf32>
    %61 = arith.mulf %58, %60 : vector<8x512xf32>
    %c18_i32 = arith.constant 18 : i32
    %62 = tpu.dynamic_rotate %1 by %c18_i32 dim 1 : vector<8x512xf32>, i32 -> vector<8x512xf32>
    %c15 = arith.constant 15 : index
    %c0_18 = arith.constant 0 : index
    %63 = vector.load %arg2[%c15, %c0_18] : memref<49x512xf32, #tpu.memory_space<vmem>>, vector<1x512xf32>
    %64 = vector.broadcast %63 : vector<1x512xf32> to vector<8x512xf32>
    %65 = arith.mulf %62, %64 : vector<8x512xf32>
    %c17_i32 = arith.constant 17 : i32
    %66 = tpu.dynamic_rotate %1 by %c17_i32 dim 1 : vector<8x512xf32>, i32 -> vector<8x512xf32>
    %c16 = arith.constant 16 : index
    %c0_19 = arith.constant 0 : index
    %67 = vector.load %arg2[%c16, %c0_19] : memref<49x512xf32, #tpu.memory_space<vmem>>, vector<1x512xf32>
    %68 = vector.broadcast %67 : vector<1x512xf32> to vector<8x512xf32>
    %69 = arith.mulf %66, %68 : vector<8x512xf32>
    %c16_i32 = arith.constant 16 : i32
    %70 = tpu.dynamic_rotate %1 by %c16_i32 dim 1 : vector<8x512xf32>, i32 -> vector<8x512xf32>
    %c17 = arith.constant 17 : index
    %c0_20 = arith.constant 0 : index
    %71 = vector.load %arg2[%c17, %c0_20] : memref<49x512xf32, #tpu.memory_space<vmem>>, vector<1x512xf32>
    %72 = vector.broadcast %71 : vector<1x512xf32> to vector<8x512xf32>
    %73 = arith.mulf %70, %72 : vector<8x512xf32>
    %c15_i32 = arith.constant 15 : i32
    %74 = tpu.dynamic_rotate %1 by %c15_i32 dim 1 : vector<8x512xf32>, i32 -> vector<8x512xf32>
    %c18 = arith.constant 18 : index
    %c0_21 = arith.constant 0 : index
    %75 = vector.load %arg2[%c18, %c0_21] : memref<49x512xf32, #tpu.memory_space<vmem>>, vector<1x512xf32>
    %76 = vector.broadcast %75 : vector<1x512xf32> to vector<8x512xf32>
    %77 = arith.mulf %74, %76 : vector<8x512xf32>
    %c14_i32 = arith.constant 14 : i32
    %78 = tpu.dynamic_rotate %1 by %c14_i32 dim 1 : vector<8x512xf32>, i32 -> vector<8x512xf32>
    %c19 = arith.constant 19 : index
    %c0_22 = arith.constant 0 : index
    %79 = vector.load %arg2[%c19, %c0_22] : memref<49x512xf32, #tpu.memory_space<vmem>>, vector<1x512xf32>
    %80 = vector.broadcast %79 : vector<1x512xf32> to vector<8x512xf32>
    %81 = arith.mulf %78, %80 : vector<8x512xf32>
    %c13_i32 = arith.constant 13 : i32
    %82 = tpu.dynamic_rotate %1 by %c13_i32 dim 1 : vector<8x512xf32>, i32 -> vector<8x512xf32>
    %c20 = arith.constant 20 : index
    %c0_23 = arith.constant 0 : index
    %83 = vector.load %arg2[%c20, %c0_23] : memref<49x512xf32, #tpu.memory_space<vmem>>, vector<1x512xf32>
    %84 = vector.broadcast %83 : vector<1x512xf32> to vector<8x512xf32>
    %85 = arith.mulf %82, %84 : vector<8x512xf32>
    %c3_i32 = arith.constant 3 : i32
    %86 = tpu.dynamic_rotate %1 by %c3_i32 dim 1 : vector<8x512xf32>, i32 -> vector<8x512xf32>
    %c21 = arith.constant 21 : index
    %c0_24 = arith.constant 0 : index
    %87 = vector.load %arg2[%c21, %c0_24] : memref<49x512xf32, #tpu.memory_space<vmem>>, vector<1x512xf32>
    %88 = vector.broadcast %87 : vector<1x512xf32> to vector<8x512xf32>
    %89 = arith.mulf %86, %88 : vector<8x512xf32>
    %c2_i32 = arith.constant 2 : i32
    %90 = tpu.dynamic_rotate %1 by %c2_i32 dim 1 : vector<8x512xf32>, i32 -> vector<8x512xf32>
    %c22 = arith.constant 22 : index
    %c0_25 = arith.constant 0 : index
    %91 = vector.load %arg2[%c22, %c0_25] : memref<49x512xf32, #tpu.memory_space<vmem>>, vector<1x512xf32>
    %92 = vector.broadcast %91 : vector<1x512xf32> to vector<8x512xf32>
    %93 = arith.mulf %90, %92 : vector<8x512xf32>
    %c1_i32 = arith.constant 1 : i32
    %94 = tpu.dynamic_rotate %1 by %c1_i32 dim 1 : vector<8x512xf32>, i32 -> vector<8x512xf32>
    %c23 = arith.constant 23 : index
    %c0_26 = arith.constant 0 : index
    %95 = vector.load %arg2[%c23, %c0_26] : memref<49x512xf32, #tpu.memory_space<vmem>>, vector<1x512xf32>
    %96 = vector.broadcast %95 : vector<1x512xf32> to vector<8x512xf32>
    %97 = arith.mulf %94, %96 : vector<8x512xf32>
    %c511_i32 = arith.constant 511 : i32
    %98 = tpu.dynamic_rotate %1 by %c511_i32 dim 1 : vector<8x512xf32>, i32 -> vector<8x512xf32>
    %c25 = arith.constant 25 : index
    %c0_27 = arith.constant 0 : index
    %99 = vector.load %arg2[%c25, %c0_27] : memref<49x512xf32, #tpu.memory_space<vmem>>, vector<1x512xf32>
    %100 = vector.broadcast %99 : vector<1x512xf32> to vector<8x512xf32>
    %101 = arith.mulf %98, %100 : vector<8x512xf32>
    %c510_i32 = arith.constant 510 : i32
    %102 = tpu.dynamic_rotate %1 by %c510_i32 dim 1 : vector<8x512xf32>, i32 -> vector<8x512xf32>
    %c26 = arith.constant 26 : index
    %c0_28 = arith.constant 0 : index
    %103 = vector.load %arg2[%c26, %c0_28] : memref<49x512xf32, #tpu.memory_space<vmem>>, vector<1x512xf32>
    %104 = vector.broadcast %103 : vector<1x512xf32> to vector<8x512xf32>
    %105 = arith.mulf %102, %104 : vector<8x512xf32>
    %c509_i32 = arith.constant 509 : i32
    %106 = tpu.dynamic_rotate %1 by %c509_i32 dim 1 : vector<8x512xf32>, i32 -> vector<8x512xf32>
    %c27 = arith.constant 27 : index
    %c0_29 = arith.constant 0 : index
    %107 = vector.load %arg2[%c27, %c0_29] : memref<49x512xf32, #tpu.memory_space<vmem>>, vector<1x512xf32>
    %108 = vector.broadcast %107 : vector<1x512xf32> to vector<8x512xf32>
    %109 = arith.mulf %106, %108 : vector<8x512xf32>
    %c499_i32 = arith.constant 499 : i32
    %110 = tpu.dynamic_rotate %1 by %c499_i32 dim 1 : vector<8x512xf32>, i32 -> vector<8x512xf32>
    %c28 = arith.constant 28 : index
    %c0_30 = arith.constant 0 : index
    %111 = vector.load %arg2[%c28, %c0_30] : memref<49x512xf32, #tpu.memory_space<vmem>>, vector<1x512xf32>
    %112 = vector.broadcast %111 : vector<1x512xf32> to vector<8x512xf32>
    %113 = arith.mulf %110, %112 : vector<8x512xf32>
    %c498_i32 = arith.constant 498 : i32
    %114 = tpu.dynamic_rotate %1 by %c498_i32 dim 1 : vector<8x512xf32>, i32 -> vector<8x512xf32>
    %c29 = arith.constant 29 : index
    %c0_31 = arith.constant 0 : index
    %115 = vector.load %arg2[%c29, %c0_31] : memref<49x512xf32, #tpu.memory_space<vmem>>, vector<1x512xf32>
    %116 = vector.broadcast %115 : vector<1x512xf32> to vector<8x512xf32>
    %117 = arith.mulf %114, %116 : vector<8x512xf32>
    %c497_i32 = arith.constant 497 : i32
    %118 = tpu.dynamic_rotate %1 by %c497_i32 dim 1 : vector<8x512xf32>, i32 -> vector<8x512xf32>
    %c30 = arith.constant 30 : index
    %c0_32 = arith.constant 0 : index
    %119 = vector.load %arg2[%c30, %c0_32] : memref<49x512xf32, #tpu.memory_space<vmem>>, vector<1x512xf32>
    %120 = vector.broadcast %119 : vector<1x512xf32> to vector<8x512xf32>
    %121 = arith.mulf %118, %120 : vector<8x512xf32>
    %c496_i32 = arith.constant 496 : i32
    %122 = tpu.dynamic_rotate %1 by %c496_i32 dim 1 : vector<8x512xf32>, i32 -> vector<8x512xf32>
    %c31 = arith.constant 31 : index
    %c0_33 = arith.constant 0 : index
    %123 = vector.load %arg2[%c31, %c0_33] : memref<49x512xf32, #tpu.memory_space<vmem>>, vector<1x512xf32>
    %124 = vector.broadcast %123 : vector<1x512xf32> to vector<8x512xf32>
    %125 = arith.mulf %122, %124 : vector<8x512xf32>
    %c495_i32 = arith.constant 495 : i32
    %126 = tpu.dynamic_rotate %1 by %c495_i32 dim 1 : vector<8x512xf32>, i32 -> vector<8x512xf32>
    %c32 = arith.constant 32 : index
    %c0_34 = arith.constant 0 : index
    %127 = vector.load %arg2[%c32, %c0_34] : memref<49x512xf32, #tpu.memory_space<vmem>>, vector<1x512xf32>
    %128 = vector.broadcast %127 : vector<1x512xf32> to vector<8x512xf32>
    %129 = arith.mulf %126, %128 : vector<8x512xf32>
    %c494_i32 = arith.constant 494 : i32
    %130 = tpu.dynamic_rotate %1 by %c494_i32 dim 1 : vector<8x512xf32>, i32 -> vector<8x512xf32>
    %c33 = arith.constant 33 : index
    %c0_35 = arith.constant 0 : index
    %131 = vector.load %arg2[%c33, %c0_35] : memref<49x512xf32, #tpu.memory_space<vmem>>, vector<1x512xf32>
    %132 = vector.broadcast %131 : vector<1x512xf32> to vector<8x512xf32>
    %133 = arith.mulf %130, %132 : vector<8x512xf32>
    %c493_i32 = arith.constant 493 : i32
    %134 = tpu.dynamic_rotate %1 by %c493_i32 dim 1 : vector<8x512xf32>, i32 -> vector<8x512xf32>
    %c34 = arith.constant 34 : index
    %c0_36 = arith.constant 0 : index
    %135 = vector.load %arg2[%c34, %c0_36] : memref<49x512xf32, #tpu.memory_space<vmem>>, vector<1x512xf32>
    %136 = vector.broadcast %135 : vector<1x512xf32> to vector<8x512xf32>
    %137 = arith.mulf %134, %136 : vector<8x512xf32>
    %c483_i32 = arith.constant 483 : i32
    %138 = tpu.dynamic_rotate %1 by %c483_i32 dim 1 : vector<8x512xf32>, i32 -> vector<8x512xf32>
    %c35 = arith.constant 35 : index
    %c0_37 = arith.constant 0 : index
    %139 = vector.load %arg2[%c35, %c0_37] : memref<49x512xf32, #tpu.memory_space<vmem>>, vector<1x512xf32>
    %140 = vector.broadcast %139 : vector<1x512xf32> to vector<8x512xf32>
    %141 = arith.mulf %138, %140 : vector<8x512xf32>
    %c482_i32 = arith.constant 482 : i32
    %142 = tpu.dynamic_rotate %1 by %c482_i32 dim 1 : vector<8x512xf32>, i32 -> vector<8x512xf32>
    %c36 = arith.constant 36 : index
    %c0_38 = arith.constant 0 : index
    %143 = vector.load %arg2[%c36, %c0_38] : memref<49x512xf32, #tpu.memory_space<vmem>>, vector<1x512xf32>
    %144 = vector.broadcast %143 : vector<1x512xf32> to vector<8x512xf32>
    %145 = arith.mulf %142, %144 : vector<8x512xf32>
    %c481_i32 = arith.constant 481 : i32
    %146 = tpu.dynamic_rotate %1 by %c481_i32 dim 1 : vector<8x512xf32>, i32 -> vector<8x512xf32>
    %c37 = arith.constant 37 : index
    %c0_39 = arith.constant 0 : index
    %147 = vector.load %arg2[%c37, %c0_39] : memref<49x512xf32, #tpu.memory_space<vmem>>, vector<1x512xf32>
    %148 = vector.broadcast %147 : vector<1x512xf32> to vector<8x512xf32>
    %149 = arith.mulf %146, %148 : vector<8x512xf32>
    %c480_i32 = arith.constant 480 : i32
    %150 = tpu.dynamic_rotate %1 by %c480_i32 dim 1 : vector<8x512xf32>, i32 -> vector<8x512xf32>
    %c38 = arith.constant 38 : index
    %c0_40 = arith.constant 0 : index
    %151 = vector.load %arg2[%c38, %c0_40] : memref<49x512xf32, #tpu.memory_space<vmem>>, vector<1x512xf32>
    %152 = vector.broadcast %151 : vector<1x512xf32> to vector<8x512xf32>
    %153 = arith.mulf %150, %152 : vector<8x512xf32>
    %c479_i32 = arith.constant 479 : i32
    %154 = tpu.dynamic_rotate %1 by %c479_i32 dim 1 : vector<8x512xf32>, i32 -> vector<8x512xf32>
    %c39 = arith.constant 39 : index
    %c0_41 = arith.constant 0 : index
    %155 = vector.load %arg2[%c39, %c0_41] : memref<49x512xf32, #tpu.memory_space<vmem>>, vector<1x512xf32>
    %156 = vector.broadcast %155 : vector<1x512xf32> to vector<8x512xf32>
    %157 = arith.mulf %154, %156 : vector<8x512xf32>
    %c478_i32 = arith.constant 478 : i32
    %158 = tpu.dynamic_rotate %1 by %c478_i32 dim 1 : vector<8x512xf32>, i32 -> vector<8x512xf32>
    %c40 = arith.constant 40 : index
    %c0_42 = arith.constant 0 : index
    %159 = vector.load %arg2[%c40, %c0_42] : memref<49x512xf32, #tpu.memory_space<vmem>>, vector<1x512xf32>
    %160 = vector.broadcast %159 : vector<1x512xf32> to vector<8x512xf32>
    %161 = arith.mulf %158, %160 : vector<8x512xf32>
    %c477_i32 = arith.constant 477 : i32
    %162 = tpu.dynamic_rotate %1 by %c477_i32 dim 1 : vector<8x512xf32>, i32 -> vector<8x512xf32>
    %c41 = arith.constant 41 : index
    %c0_43 = arith.constant 0 : index
    %163 = vector.load %arg2[%c41, %c0_43] : memref<49x512xf32, #tpu.memory_space<vmem>>, vector<1x512xf32>
    %164 = vector.broadcast %163 : vector<1x512xf32> to vector<8x512xf32>
    %165 = arith.mulf %162, %164 : vector<8x512xf32>
    %c467_i32 = arith.constant 467 : i32
    %166 = tpu.dynamic_rotate %1 by %c467_i32 dim 1 : vector<8x512xf32>, i32 -> vector<8x512xf32>
    %c42 = arith.constant 42 : index
    %c0_44 = arith.constant 0 : index
    %167 = vector.load %arg2[%c42, %c0_44] : memref<49x512xf32, #tpu.memory_space<vmem>>, vector<1x512xf32>
    %168 = vector.broadcast %167 : vector<1x512xf32> to vector<8x512xf32>
    %169 = arith.mulf %166, %168 : vector<8x512xf32>
    %c466_i32 = arith.constant 466 : i32
    %170 = tpu.dynamic_rotate %1 by %c466_i32 dim 1 : vector<8x512xf32>, i32 -> vector<8x512xf32>
    %c43 = arith.constant 43 : index
    %c0_45 = arith.constant 0 : index
    %171 = vector.load %arg2[%c43, %c0_45] : memref<49x512xf32, #tpu.memory_space<vmem>>, vector<1x512xf32>
    %172 = vector.broadcast %171 : vector<1x512xf32> to vector<8x512xf32>
    %173 = arith.mulf %170, %172 : vector<8x512xf32>
    %c465_i32 = arith.constant 465 : i32
    %174 = tpu.dynamic_rotate %1 by %c465_i32 dim 1 : vector<8x512xf32>, i32 -> vector<8x512xf32>
    %c44 = arith.constant 44 : index
    %c0_46 = arith.constant 0 : index
    %175 = vector.load %arg2[%c44, %c0_46] : memref<49x512xf32, #tpu.memory_space<vmem>>, vector<1x512xf32>
    %176 = vector.broadcast %175 : vector<1x512xf32> to vector<8x512xf32>
    %177 = arith.mulf %174, %176 : vector<8x512xf32>
    %c464_i32 = arith.constant 464 : i32
    %178 = tpu.dynamic_rotate %1 by %c464_i32 dim 1 : vector<8x512xf32>, i32 -> vector<8x512xf32>
    %c45 = arith.constant 45 : index
    %c0_47 = arith.constant 0 : index
    %179 = vector.load %arg2[%c45, %c0_47] : memref<49x512xf32, #tpu.memory_space<vmem>>, vector<1x512xf32>
    %180 = vector.broadcast %179 : vector<1x512xf32> to vector<8x512xf32>
    %181 = arith.mulf %178, %180 : vector<8x512xf32>
    %c463_i32 = arith.constant 463 : i32
    %182 = tpu.dynamic_rotate %1 by %c463_i32 dim 1 : vector<8x512xf32>, i32 -> vector<8x512xf32>
    %c46 = arith.constant 46 : index
    %c0_48 = arith.constant 0 : index
    %183 = vector.load %arg2[%c46, %c0_48] : memref<49x512xf32, #tpu.memory_space<vmem>>, vector<1x512xf32>
    %184 = vector.broadcast %183 : vector<1x512xf32> to vector<8x512xf32>
    %185 = arith.mulf %182, %184 : vector<8x512xf32>
    %c462_i32 = arith.constant 462 : i32
    %186 = tpu.dynamic_rotate %1 by %c462_i32 dim 1 : vector<8x512xf32>, i32 -> vector<8x512xf32>
    %c47 = arith.constant 47 : index
    %c0_49 = arith.constant 0 : index
    %187 = vector.load %arg2[%c47, %c0_49] : memref<49x512xf32, #tpu.memory_space<vmem>>, vector<1x512xf32>
    %188 = vector.broadcast %187 : vector<1x512xf32> to vector<8x512xf32>
    %189 = arith.mulf %186, %188 : vector<8x512xf32>
    %c461_i32 = arith.constant 461 : i32
    %190 = tpu.dynamic_rotate %1 by %c461_i32 dim 1 : vector<8x512xf32>, i32 -> vector<8x512xf32>
    %c48 = arith.constant 48 : index
    %c0_50 = arith.constant 0 : index
    %191 = vector.load %arg2[%c48, %c0_50] : memref<49x512xf32, #tpu.memory_space<vmem>>, vector<1x512xf32>
    %192 = vector.broadcast %191 : vector<1x512xf32> to vector<8x512xf32>
    %193 = arith.mulf %190, %192 : vector<8x512xf32>
    %194 = tpu.concatenate %5, %9, %13, %17, %21, %25, %29, %33, %37, %41, %45, %49, %53, %57, %61, %65 in 0 : vector<8x512xf32>, vector<8x512xf32>, vector<8x512xf32>, vector<8x512xf32>, vector<8x512xf32>, vector<8x512xf32>, vector<8x512xf32>, vector<8x512xf32>, vector<8x512xf32>, vector<8x512xf32>, vector<8x512xf32>, vector<8x512xf32>, vector<8x512xf32>, vector<8x512xf32>, vector<8x512xf32>, vector<8x512xf32> -> vector<128x512xf32>
    %195 = tpu.concatenate %69, %73, %77, %81, %85, %89, %93, %97, %1, %101, %105, %109, %113, %117, %121, %125 in 0 : vector<8x512xf32>, vector<8x512xf32>, vector<8x512xf32>, vector<8x512xf32>, vector<8x512xf32>, vector<8x512xf32>, vector<8x512xf32>, vector<8x512xf32>, vector<8x512xf32>, vector<8x512xf32>, vector<8x512xf32>, vector<8x512xf32>, vector<8x512xf32>, vector<8x512xf32>, vector<8x512xf32>, vector<8x512xf32> -> vector<128x512xf32>
    %196 = tpu.concatenate %129, %133, %137, %141, %145, %149, %153, %157, %161, %165, %169, %173, %177, %181, %185, %189 in 0 : vector<8x512xf32>, vector<8x512xf32>, vector<8x512xf32>, vector<8x512xf32>, vector<8x512xf32>, vector<8x512xf32>, vector<8x512xf32>, vector<8x512xf32>, vector<8x512xf32>, vector<8x512xf32>, vector<8x512xf32>, vector<8x512xf32>, vector<8x512xf32>, vector<8x512xf32>, vector<8x512xf32>, vector<8x512xf32> -> vector<128x512xf32>
    %197 = tpu.concatenate %194, %195, %196, %193 in 0 : vector<128x512xf32>, vector<128x512xf32>, vector<128x512xf32>, vector<8x512xf32> -> vector<392x512xf32>
    %c0_51 = arith.constant 0 : index
    %c0_52 = arith.constant 0 : index
    %198 = vector.load %arg4[%c0_51, %c0_52] : memref<8x392xf32, #tpu.memory_space<vmem>>, vector<8x392xf32>
    %cst = arith.constant dense<0.000000e+00> : vector<8x512xf32>
    %199 = tpu.matmul %198, %197, %cst {dimension_numbers = #tpu.dot_dimension_numbers<[1], [0], [0], [1], [0, 0, 1, 1], [], []>} : vector<8x392xf32>, vector<392x512xf32>, vector<8x512xf32> -> vector<8x512xf32>
    %c0_53 = arith.constant 0 : index
    %c0_54 = arith.constant 0 : index
    %200 = vector.load %arg5[%c0_53, %c0_54] : memref<8x1xf32, #tpu.memory_space<vmem>>, vector<8x1xf32>
    %201 = vector.broadcast %200 : vector<8x1xf32> to vector<8x512xf32>
    %202 = arith.addf %199, %201 : vector<8x512xf32>
    %203 = vector.extract_strided_slice %202 {offsets = [0, 0], sizes = [8, 256], strides = [1, 1]} : vector<8x512xf32> to vector<8x256xf32>
    %cst_55 = arith.constant dense<0.000000e+00> : vector<8xf32>
    %204 = vector.multi_reduction <add>, %203, %cst_55 [1] : vector<8x256xf32> to vector<8xf32>
    %205 = vector.shape_cast %204 : vector<8xf32> to vector<8x1xf32>
    %cst_56 = arith.constant 2.560000e+02 : f32
    %206 = vector.broadcast %cst_56 : f32 to vector<8x1xf32>
    %207 = arith.divf %205, %206 : vector<8x1xf32>
    %208 = arith.mulf %203, %203 : vector<8x256xf32>
    %cst_57 = arith.constant dense<0.000000e+00> : vector<8xf32>
    %209 = vector.multi_reduction <add>, %208, %cst_57 [1] : vector<8x256xf32> to vector<8xf32>
    %210 = vector.shape_cast %209 : vector<8xf32> to vector<8x1xf32>
    %cst_58 = arith.constant 2.560000e+02 : f32
    %211 = vector.broadcast %cst_58 : f32 to vector<8x1xf32>
    %212 = arith.divf %210, %211 : vector<8x1xf32>
    %213 = arith.mulf %207, %207 : vector<8x1xf32>
    %214 = arith.subf %212, %213 : vector<8x1xf32>
    %cst_59 = arith.constant 0.000000e+00 : f32
    %215 = vector.broadcast %cst_59 : f32 to vector<8x1xf32>
    %216 = arith.maximumf %214, %215 : vector<8x1xf32>
    %217 = vector.broadcast %207 : vector<8x1xf32> to vector<8x256xf32>
    %218 = arith.subf %203, %217 : vector<8x256xf32>
    %cst_60 = arith.constant 9.99999974E-6 : f32
    %219 = vector.broadcast %cst_60 : f32 to vector<8x1xf32>
    %220 = arith.addf %216, %219 : vector<8x1xf32>
    %221 = math.rsqrt %220 : vector<8x1xf32>
    %222 = vector.broadcast %221 : vector<8x1xf32> to vector<8x256xf32>
    %223 = arith.mulf %218, %222 : vector<8x256xf32>
    %224 = vector.extract_strided_slice %202 {offsets = [0, 256], sizes = [8, 256], strides = [1, 1]} : vector<8x512xf32> to vector<8x256xf32>
    %cst_61 = arith.constant dense<0.000000e+00> : vector<8xf32>
    %225 = vector.multi_reduction <add>, %224, %cst_61 [1] : vector<8x256xf32> to vector<8xf32>
    %226 = vector.shape_cast %225 : vector<8xf32> to vector<8x1xf32>
    %cst_62 = arith.constant 2.560000e+02 : f32
    %227 = vector.broadcast %cst_62 : f32 to vector<8x1xf32>
    %228 = arith.divf %226, %227 : vector<8x1xf32>
    %229 = arith.mulf %224, %224 : vector<8x256xf32>
    %cst_63 = arith.constant dense<0.000000e+00> : vector<8xf32>
    %230 = vector.multi_reduction <add>, %229, %cst_63 [1] : vector<8x256xf32> to vector<8xf32>
    %231 = vector.shape_cast %230 : vector<8xf32> to vector<8x1xf32>
    %cst_64 = arith.constant 2.560000e+02 : f32
    %232 = vector.broadcast %cst_64 : f32 to vector<8x1xf32>
    %233 = arith.divf %231, %232 : vector<8x1xf32>
    %234 = arith.mulf %228, %228 : vector<8x1xf32>
    %235 = arith.subf %233, %234 : vector<8x1xf32>
    %cst_65 = arith.constant 0.000000e+00 : f32
    %236 = vector.broadcast %cst_65 : f32 to vector<8x1xf32>
    %237 = arith.maximumf %235, %236 : vector<8x1xf32>
    %238 = vector.broadcast %228 : vector<8x1xf32> to vector<8x256xf32>
    %239 = arith.subf %224, %238 : vector<8x256xf32>
    %cst_66 = arith.constant 9.99999974E-6 : f32
    %240 = vector.broadcast %cst_66 : f32 to vector<8x1xf32>
    %241 = arith.addf %237, %240 : vector<8x1xf32>
    %242 = math.rsqrt %241 : vector<8x1xf32>
    %243 = vector.broadcast %242 : vector<8x1xf32> to vector<8x256xf32>
    %244 = arith.mulf %239, %243 : vector<8x256xf32>
    %245 = tpu.concatenate %223, %244 in 1 : vector<8x256xf32>, vector<8x256xf32> -> vector<8x512xf32>
    %cst_67 = arith.constant 0.000000e+00 : f32
    %246 = vector.broadcast %cst_67 : f32 to vector<8x512xf32>
    %247 = arith.maximumf %245, %246 : vector<8x512xf32>
    %c17_i32_68 = arith.constant 17 : i32
    %248 = tpu.dynamic_rotate %247 by %c17_i32_68 dim 1 : vector<8x512xf32>, i32 -> vector<8x512xf32>
    %c0_69 = arith.constant 0 : index
    %c0_70 = arith.constant 0 : index
    %249 = vector.load %arg3[%c0_69, %c0_70] : memref<9x512xf32, #tpu.memory_space<vmem>>, vector<1x512xf32>
    %250 = vector.broadcast %249 : vector<1x512xf32> to vector<8x512xf32>
    %251 = arith.mulf %248, %250 : vector<8x512xf32>
    %c16_i32_71 = arith.constant 16 : i32
    %252 = tpu.dynamic_rotate %247 by %c16_i32_71 dim 1 : vector<8x512xf32>, i32 -> vector<8x512xf32>
    %c1_72 = arith.constant 1 : index
    %c0_73 = arith.constant 0 : index
    %253 = vector.load %arg3[%c1_72, %c0_73] : memref<9x512xf32, #tpu.memory_space<vmem>>, vector<1x512xf32>
    %254 = vector.broadcast %253 : vector<1x512xf32> to vector<8x512xf32>
    %255 = arith.mulf %252, %254 : vector<8x512xf32>
    %c15_i32_74 = arith.constant 15 : i32
    %256 = tpu.dynamic_rotate %247 by %c15_i32_74 dim 1 : vector<8x512xf32>, i32 -> vector<8x512xf32>
    %c2_75 = arith.constant 2 : index
    %c0_76 = arith.constant 0 : index
    %257 = vector.load %arg3[%c2_75, %c0_76] : memref<9x512xf32, #tpu.memory_space<vmem>>, vector<1x512xf32>
    %258 = vector.broadcast %257 : vector<1x512xf32> to vector<8x512xf32>
    %259 = arith.mulf %256, %258 : vector<8x512xf32>
    %c1_i32_77 = arith.constant 1 : i32
    %260 = tpu.dynamic_rotate %247 by %c1_i32_77 dim 1 : vector<8x512xf32>, i32 -> vector<8x512xf32>
    %c3_78 = arith.constant 3 : index
    %c0_79 = arith.constant 0 : index
    %261 = vector.load %arg3[%c3_78, %c0_79] : memref<9x512xf32, #tpu.memory_space<vmem>>, vector<1x512xf32>
    %262 = vector.broadcast %261 : vector<1x512xf32> to vector<8x512xf32>
    %263 = arith.mulf %260, %262 : vector<8x512xf32>
    %c511_i32_80 = arith.constant 511 : i32
    %264 = tpu.dynamic_rotate %247 by %c511_i32_80 dim 1 : vector<8x512xf32>, i32 -> vector<8x512xf32>
    %c5_81 = arith.constant 5 : index
    %c0_82 = arith.constant 0 : index
    %265 = vector.load %arg3[%c5_81, %c0_82] : memref<9x512xf32, #tpu.memory_space<vmem>>, vector<1x512xf32>
    %266 = vector.broadcast %265 : vector<1x512xf32> to vector<8x512xf32>
    %267 = arith.mulf %264, %266 : vector<8x512xf32>
    %c497_i32_83 = arith.constant 497 : i32
    %268 = tpu.dynamic_rotate %247 by %c497_i32_83 dim 1 : vector<8x512xf32>, i32 -> vector<8x512xf32>
    %c6_84 = arith.constant 6 : index
    %c0_85 = arith.constant 0 : index
    %269 = vector.load %arg3[%c6_84, %c0_85] : memref<9x512xf32, #tpu.memory_space<vmem>>, vector<1x512xf32>
    %270 = vector.broadcast %269 : vector<1x512xf32> to vector<8x512xf32>
    %271 = arith.mulf %268, %270 : vector<8x512xf32>
    %c496_i32_86 = arith.constant 496 : i32
    %272 = tpu.dynamic_rotate %247 by %c496_i32_86 dim 1 : vector<8x512xf32>, i32 -> vector<8x512xf32>
    %c7_87 = arith.constant 7 : index
    %c0_88 = arith.constant 0 : index
    %273 = vector.load %arg3[%c7_87, %c0_88] : memref<9x512xf32, #tpu.memory_space<vmem>>, vector<1x512xf32>
    %274 = vector.broadcast %273 : vector<1x512xf32> to vector<8x512xf32>
    %275 = arith.mulf %272, %274 : vector<8x512xf32>
    %c495_i32_89 = arith.constant 495 : i32
    %276 = tpu.dynamic_rotate %247 by %c495_i32_89 dim 1 : vector<8x512xf32>, i32 -> vector<8x512xf32>
    %c8_90 = arith.constant 8 : index
    %c0_91 = arith.constant 0 : index
    %277 = vector.load %arg3[%c8_90, %c0_91] : memref<9x512xf32, #tpu.memory_space<vmem>>, vector<1x512xf32>
    %278 = vector.broadcast %277 : vector<1x512xf32> to vector<8x512xf32>
    %279 = arith.mulf %276, %278 : vector<8x512xf32>
    %280 = tpu.concatenate %251, %255, %259, %263, %247, %267, %271, %275, %279 in 0 : vector<8x512xf32>, vector<8x512xf32>, vector<8x512xf32>, vector<8x512xf32>, vector<8x512xf32>, vector<8x512xf32>, vector<8x512xf32>, vector<8x512xf32>, vector<8x512xf32> -> vector<72x512xf32>
    %c0_92 = arith.constant 0 : index
    %c0_93 = arith.constant 0 : index
    %281 = vector.load %arg6[%c0_92, %c0_93] : memref<16x72xf32, #tpu.memory_space<vmem>>, vector<16x72xf32>
    %cst_94 = arith.constant dense<0.000000e+00> : vector<16x512xf32>
    %282 = tpu.matmul %281, %280, %cst_94 {dimension_numbers = #tpu.dot_dimension_numbers<[1], [0], [0], [1], [0, 0, 1, 1], [], []>} : vector<16x72xf32>, vector<72x512xf32>, vector<16x512xf32> -> vector<16x512xf32>
    %c0_95 = arith.constant 0 : index
    %c0_96 = arith.constant 0 : index
    %283 = vector.load %arg7[%c0_95, %c0_96] : memref<16x1xf32, #tpu.memory_space<vmem>>, vector<16x1xf32>
    %284 = vector.broadcast %283 : vector<16x1xf32> to vector<16x512xf32>
    %285 = arith.addf %282, %284 : vector<16x512xf32>
    %286 = vector.extract_strided_slice %285 {offsets = [0, 0], sizes = [16, 256], strides = [1, 1]} : vector<16x512xf32> to vector<16x256xf32>
    %cst_97 = arith.constant dense<0.000000e+00> : vector<16xf32>
    %287 = vector.multi_reduction <add>, %286, %cst_97 [1] : vector<16x256xf32> to vector<16xf32>
    %288 = vector.shape_cast %287 : vector<16xf32> to vector<16x1xf32>
    %cst_98 = arith.constant 2.560000e+02 : f32
    %289 = vector.broadcast %cst_98 : f32 to vector<16x1xf32>
    %290 = arith.divf %288, %289 : vector<16x1xf32>
    %291 = arith.mulf %286, %286 : vector<16x256xf32>
    %cst_99 = arith.constant dense<0.000000e+00> : vector<16xf32>
    %292 = vector.multi_reduction <add>, %291, %cst_99 [1] : vector<16x256xf32> to vector<16xf32>
    %293 = vector.shape_cast %292 : vector<16xf32> to vector<16x1xf32>
    %cst_100 = arith.constant 2.560000e+02 : f32
    %294 = vector.broadcast %cst_100 : f32 to vector<16x1xf32>
    %295 = arith.divf %293, %294 : vector<16x1xf32>
    %296 = arith.mulf %290, %290 : vector<16x1xf32>
    %297 = arith.subf %295, %296 : vector<16x1xf32>
    %cst_101 = arith.constant 0.000000e+00 : f32
    %298 = vector.broadcast %cst_101 : f32 to vector<16x1xf32>
    %299 = arith.maximumf %297, %298 : vector<16x1xf32>
    %300 = vector.broadcast %290 : vector<16x1xf32> to vector<16x256xf32>
    %301 = arith.subf %286, %300 : vector<16x256xf32>
    %cst_102 = arith.constant 9.99999974E-6 : f32
    %302 = vector.broadcast %cst_102 : f32 to vector<16x1xf32>
    %303 = arith.addf %299, %302 : vector<16x1xf32>
    %304 = math.rsqrt %303 : vector<16x1xf32>
    %305 = vector.broadcast %304 : vector<16x1xf32> to vector<16x256xf32>
    %306 = arith.mulf %301, %305 : vector<16x256xf32>
    %307 = vector.extract_strided_slice %285 {offsets = [0, 256], sizes = [16, 256], strides = [1, 1]} : vector<16x512xf32> to vector<16x256xf32>
    %cst_103 = arith.constant dense<0.000000e+00> : vector<16xf32>
    %308 = vector.multi_reduction <add>, %307, %cst_103 [1] : vector<16x256xf32> to vector<16xf32>
    %309 = vector.shape_cast %308 : vector<16xf32> to vector<16x1xf32>
    %cst_104 = arith.constant 2.560000e+02 : f32
    %310 = vector.broadcast %cst_104 : f32 to vector<16x1xf32>
    %311 = arith.divf %309, %310 : vector<16x1xf32>
    %312 = arith.mulf %307, %307 : vector<16x256xf32>
    %cst_105 = arith.constant dense<0.000000e+00> : vector<16xf32>
    %313 = vector.multi_reduction <add>, %312, %cst_105 [1] : vector<16x256xf32> to vector<16xf32>
    %314 = vector.shape_cast %313 : vector<16xf32> to vector<16x1xf32>
    %cst_106 = arith.constant 2.560000e+02 : f32
    %315 = vector.broadcast %cst_106 : f32 to vector<16x1xf32>
    %316 = arith.divf %314, %315 : vector<16x1xf32>
    %317 = arith.mulf %311, %311 : vector<16x1xf32>
    %318 = arith.subf %316, %317 : vector<16x1xf32>
    %cst_107 = arith.constant 0.000000e+00 : f32
    %319 = vector.broadcast %cst_107 : f32 to vector<16x1xf32>
    %320 = arith.maximumf %318, %319 : vector<16x1xf32>
    %321 = vector.broadcast %311 : vector<16x1xf32> to vector<16x256xf32>
    %322 = arith.subf %307, %321 : vector<16x256xf32>
    %cst_108 = arith.constant 9.99999974E-6 : f32
    %323 = vector.broadcast %cst_108 : f32 to vector<16x1xf32>
    %324 = arith.addf %320, %323 : vector<16x1xf32>
    %325 = math.rsqrt %324 : vector<16x1xf32>
    %326 = vector.broadcast %325 : vector<16x1xf32> to vector<16x256xf32>
    %327 = arith.mulf %322, %326 : vector<16x256xf32>
    %328 = tpu.concatenate %306, %327 in 1 : vector<16x256xf32>, vector<16x256xf32> -> vector<16x512xf32>
    %cst_109 = arith.constant 0.000000e+00 : f32
    %329 = vector.broadcast %cst_109 : f32 to vector<16x512xf32>
    %330 = arith.maximumf %328, %329 : vector<16x512xf32>
    %c17_i32_110 = arith.constant 17 : i32
    %331 = tpu.dynamic_rotate %330 by %c17_i32_110 dim 1 : vector<16x512xf32>, i32 -> vector<16x512xf32>
    %c0_111 = arith.constant 0 : index
    %c0_112 = arith.constant 0 : index
    %332 = vector.load %arg3[%c0_111, %c0_112] : memref<9x512xf32, #tpu.memory_space<vmem>>, vector<1x512xf32>
    %333 = vector.broadcast %332 : vector<1x512xf32> to vector<16x512xf32>
    %334 = arith.mulf %331, %333 : vector<16x512xf32>
    %c16_i32_113 = arith.constant 16 : i32
    %335 = tpu.dynamic_rotate %330 by %c16_i32_113 dim 1 : vector<16x512xf32>, i32 -> vector<16x512xf32>
    %c1_114 = arith.constant 1 : index
    %c0_115 = arith.constant 0 : index
    %336 = vector.load %arg3[%c1_114, %c0_115] : memref<9x512xf32, #tpu.memory_space<vmem>>, vector<1x512xf32>
    %337 = vector.broadcast %336 : vector<1x512xf32> to vector<16x512xf32>
    %338 = arith.mulf %335, %337 : vector<16x512xf32>
    %c15_i32_116 = arith.constant 15 : i32
    %339 = tpu.dynamic_rotate %330 by %c15_i32_116 dim 1 : vector<16x512xf32>, i32 -> vector<16x512xf32>
    %c2_117 = arith.constant 2 : index
    %c0_118 = arith.constant 0 : index
    %340 = vector.load %arg3[%c2_117, %c0_118] : memref<9x512xf32, #tpu.memory_space<vmem>>, vector<1x512xf32>
    %341 = vector.broadcast %340 : vector<1x512xf32> to vector<16x512xf32>
    %342 = arith.mulf %339, %341 : vector<16x512xf32>
    %c1_i32_119 = arith.constant 1 : i32
    %343 = tpu.dynamic_rotate %330 by %c1_i32_119 dim 1 : vector<16x512xf32>, i32 -> vector<16x512xf32>
    %c3_120 = arith.constant 3 : index
    %c0_121 = arith.constant 0 : index
    %344 = vector.load %arg3[%c3_120, %c0_121] : memref<9x512xf32, #tpu.memory_space<vmem>>, vector<1x512xf32>
    %345 = vector.broadcast %344 : vector<1x512xf32> to vector<16x512xf32>
    %346 = arith.mulf %343, %345 : vector<16x512xf32>
    %c511_i32_122 = arith.constant 511 : i32
    %347 = tpu.dynamic_rotate %330 by %c511_i32_122 dim 1 : vector<16x512xf32>, i32 -> vector<16x512xf32>
    %c5_123 = arith.constant 5 : index
    %c0_124 = arith.constant 0 : index
    %348 = vector.load %arg3[%c5_123, %c0_124] : memref<9x512xf32, #tpu.memory_space<vmem>>, vector<1x512xf32>
    %349 = vector.broadcast %348 : vector<1x512xf32> to vector<16x512xf32>
    %350 = arith.mulf %347, %349 : vector<16x512xf32>
    %c497_i32_125 = arith.constant 497 : i32
    %351 = tpu.dynamic_rotate %330 by %c497_i32_125 dim 1 : vector<16x512xf32>, i32 -> vector<16x512xf32>
    %c6_126 = arith.constant 6 : index
    %c0_127 = arith.constant 0 : index
    %352 = vector.load %arg3[%c6_126, %c0_127] : memref<9x512xf32, #tpu.memory_space<vmem>>, vector<1x512xf32>
    %353 = vector.broadcast %352 : vector<1x512xf32> to vector<16x512xf32>
    %354 = arith.mulf %351, %353 : vector<16x512xf32>
    %c496_i32_128 = arith.constant 496 : i32
    %355 = tpu.dynamic_rotate %330 by %c496_i32_128 dim 1 : vector<16x512xf32>, i32 -> vector<16x512xf32>
    %c7_129 = arith.constant 7 : index
    %c0_130 = arith.constant 0 : index
    %356 = vector.load %arg3[%c7_129, %c0_130] : memref<9x512xf32, #tpu.memory_space<vmem>>, vector<1x512xf32>
    %357 = vector.broadcast %356 : vector<1x512xf32> to vector<16x512xf32>
    %358 = arith.mulf %355, %357 : vector<16x512xf32>
    %c495_i32_131 = arith.constant 495 : i32
    %359 = tpu.dynamic_rotate %330 by %c495_i32_131 dim 1 : vector<16x512xf32>, i32 -> vector<16x512xf32>
    %c8_132 = arith.constant 8 : index
    %c0_133 = arith.constant 0 : index
    %360 = vector.load %arg3[%c8_132, %c0_133] : memref<9x512xf32, #tpu.memory_space<vmem>>, vector<1x512xf32>
    %361 = vector.broadcast %360 : vector<1x512xf32> to vector<16x512xf32>
    %362 = arith.mulf %359, %361 : vector<16x512xf32>
    %363 = tpu.concatenate %334, %338, %342, %346, %330, %350, %354, %358, %362 in 0 : vector<16x512xf32>, vector<16x512xf32>, vector<16x512xf32>, vector<16x512xf32>, vector<16x512xf32>, vector<16x512xf32>, vector<16x512xf32>, vector<16x512xf32>, vector<16x512xf32> -> vector<144x512xf32>
    %c0_134 = arith.constant 0 : index
    %c0_135 = arith.constant 0 : index
    %364 = vector.load %arg8[%c0_134, %c0_135] : memref<32x144xf32, #tpu.memory_space<vmem>>, vector<32x144xf32>
    %cst_136 = arith.constant dense<0.000000e+00> : vector<32x512xf32>
    %365 = tpu.matmul %364, %363, %cst_136 {dimension_numbers = #tpu.dot_dimension_numbers<[1], [0], [0], [1], [0, 0, 1, 1], [], []>} : vector<32x144xf32>, vector<144x512xf32>, vector<32x512xf32> -> vector<32x512xf32>
    %c0_137 = arith.constant 0 : index
    %c0_138 = arith.constant 0 : index
    %366 = vector.load %arg9[%c0_137, %c0_138] : memref<32x1xf32, #tpu.memory_space<vmem>>, vector<32x1xf32>
    %367 = vector.broadcast %366 : vector<32x1xf32> to vector<32x512xf32>
    %368 = arith.addf %365, %367 : vector<32x512xf32>
    %369 = vector.extract_strided_slice %368 {offsets = [0, 0], sizes = [32, 256], strides = [1, 1]} : vector<32x512xf32> to vector<32x256xf32>
    %cst_139 = arith.constant dense<0.000000e+00> : vector<32xf32>
    %370 = vector.multi_reduction <add>, %369, %cst_139 [1] : vector<32x256xf32> to vector<32xf32>
    %371 = vector.shape_cast %370 : vector<32xf32> to vector<32x1xf32>
    %cst_140 = arith.constant 2.560000e+02 : f32
    %372 = vector.broadcast %cst_140 : f32 to vector<32x1xf32>
    %373 = arith.divf %371, %372 : vector<32x1xf32>
    %374 = arith.mulf %369, %369 : vector<32x256xf32>
    %cst_141 = arith.constant dense<0.000000e+00> : vector<32xf32>
    %375 = vector.multi_reduction <add>, %374, %cst_141 [1] : vector<32x256xf32> to vector<32xf32>
    %376 = vector.shape_cast %375 : vector<32xf32> to vector<32x1xf32>
    %cst_142 = arith.constant 2.560000e+02 : f32
    %377 = vector.broadcast %cst_142 : f32 to vector<32x1xf32>
    %378 = arith.divf %376, %377 : vector<32x1xf32>
    %379 = arith.mulf %373, %373 : vector<32x1xf32>
    %380 = arith.subf %378, %379 : vector<32x1xf32>
    %cst_143 = arith.constant 0.000000e+00 : f32
    %381 = vector.broadcast %cst_143 : f32 to vector<32x1xf32>
    %382 = arith.maximumf %380, %381 : vector<32x1xf32>
    %383 = vector.broadcast %373 : vector<32x1xf32> to vector<32x256xf32>
    %384 = arith.subf %369, %383 : vector<32x256xf32>
    %cst_144 = arith.constant 9.99999974E-6 : f32
    %385 = vector.broadcast %cst_144 : f32 to vector<32x1xf32>
    %386 = arith.addf %382, %385 : vector<32x1xf32>
    %387 = math.rsqrt %386 : vector<32x1xf32>
    %388 = vector.broadcast %387 : vector<32x1xf32> to vector<32x256xf32>
    %389 = arith.mulf %384, %388 : vector<32x256xf32>
    %390 = vector.extract_strided_slice %368 {offsets = [0, 256], sizes = [32, 256], strides = [1, 1]} : vector<32x512xf32> to vector<32x256xf32>
    %cst_145 = arith.constant dense<0.000000e+00> : vector<32xf32>
    %391 = vector.multi_reduction <add>, %390, %cst_145 [1] : vector<32x256xf32> to vector<32xf32>
    %392 = vector.shape_cast %391 : vector<32xf32> to vector<32x1xf32>
    %cst_146 = arith.constant 2.560000e+02 : f32
    %393 = vector.broadcast %cst_146 : f32 to vector<32x1xf32>
    %394 = arith.divf %392, %393 : vector<32x1xf32>
    %395 = arith.mulf %390, %390 : vector<32x256xf32>
    %cst_147 = arith.constant dense<0.000000e+00> : vector<32xf32>
    %396 = vector.multi_reduction <add>, %395, %cst_147 [1] : vector<32x256xf32> to vector<32xf32>
    %397 = vector.shape_cast %396 : vector<32xf32> to vector<32x1xf32>
    %cst_148 = arith.constant 2.560000e+02 : f32
    %398 = vector.broadcast %cst_148 : f32 to vector<32x1xf32>
    %399 = arith.divf %397, %398 : vector<32x1xf32>
    %400 = arith.mulf %394, %394 : vector<32x1xf32>
    %401 = arith.subf %399, %400 : vector<32x1xf32>
    %cst_149 = arith.constant 0.000000e+00 : f32
    %402 = vector.broadcast %cst_149 : f32 to vector<32x1xf32>
    %403 = arith.maximumf %401, %402 : vector<32x1xf32>
    %404 = vector.broadcast %394 : vector<32x1xf32> to vector<32x256xf32>
    %405 = arith.subf %390, %404 : vector<32x256xf32>
    %cst_150 = arith.constant 9.99999974E-6 : f32
    %406 = vector.broadcast %cst_150 : f32 to vector<32x1xf32>
    %407 = arith.addf %403, %406 : vector<32x1xf32>
    %408 = math.rsqrt %407 : vector<32x1xf32>
    %409 = vector.broadcast %408 : vector<32x1xf32> to vector<32x256xf32>
    %410 = arith.mulf %405, %409 : vector<32x256xf32>
    %411 = tpu.concatenate %389, %410 in 1 : vector<32x256xf32>, vector<32x256xf32> -> vector<32x512xf32>
    %c0_151 = arith.constant 0 : index
    %c0_152 = arith.constant 0 : index
    %c0_153 = arith.constant 0 : index
    %412 = vector.load %arg10[%c0_151, %c0_152, %c0_153] : memref<1x32x512xf32, #tpu.memory_space<vmem>>, vector<1x32x512xf32>
    %413 = vector.shape_cast %412 : vector<1x32x512xf32> to vector<32x512xf32>
    %414 = vector.shape_cast %411 : vector<32x512xf32> to vector<1x32x512xf32>
    tpu.vector_store %arg10[%c0_151, %c0_152, %c0_153], %414 {strides = array<i32>} : memref<1x32x512xf32, #tpu.memory_space<vmem>>, vector<1x32x512xf32>,
    return
  }
  func.func @transform_0(%arg0: i32) -> (i32, i32, i32) {
    %c0_i32 = arith.constant 0 : i32
    %c0_i32_0 = arith.constant 0 : i32
    %c0_i32_1 = arith.constant 0 : i32
    return %arg0, %c0_i32, %c0_i32_0 : i32, i32, i32
  }
  func.func @transform_1(%arg0: i32) -> (i32, i32) {
    %c0_i32 = arith.constant 0 : i32
    %c0_i32_0 = arith.constant 0 : i32
    %c0_i32_1 = arith.constant 0 : i32
    return %c0_i32, %c0_i32_0 : i32, i32
  }
  func.func @transform_2(%arg0: i32) -> (i32, i32) {
    %c0_i32 = arith.constant 0 : i32
    %c0_i32_0 = arith.constant 0 : i32
    %c0_i32_1 = arith.constant 0 : i32
    return %c0_i32, %c0_i32_0 : i32, i32
  }
  func.func @transform_3(%arg0: i32) -> (i32, i32) {
    %c0_i32 = arith.constant 0 : i32
    %c0_i32_0 = arith.constant 0 : i32
    %c0_i32_1 = arith.constant 0 : i32
    return %c0_i32, %c0_i32_0 : i32, i32
  }
  func.func @transform_4(%arg0: i32) -> (i32, i32) {
    %c0_i32 = arith.constant 0 : i32
    %c0_i32_0 = arith.constant 0 : i32
    %c0_i32_1 = arith.constant 0 : i32
    return %c0_i32, %c0_i32_0 : i32, i32
  }
  func.func @transform_5(%arg0: i32) -> (i32, i32) {
    %c0_i32 = arith.constant 0 : i32
    %c0_i32_0 = arith.constant 0 : i32
    %c0_i32_1 = arith.constant 0 : i32
    return %c0_i32, %c0_i32_0 : i32, i32
  }
  func.func @transform_6(%arg0: i32) -> (i32, i32) {
    %c0_i32 = arith.constant 0 : i32
    %c0_i32_0 = arith.constant 0 : i32
    %c0_i32_1 = arith.constant 0 : i32
    return %c0_i32, %c0_i32_0 : i32, i32
  }
  func.func @transform_7(%arg0: i32) -> (i32, i32) {
    %c0_i32 = arith.constant 0 : i32
    %c0_i32_0 = arith.constant 0 : i32
    %c0_i32_1 = arith.constant 0 : i32
    return %c0_i32, %c0_i32_0 : i32, i32
  }
  func.func @transform_8(%arg0: i32) -> (i32, i32) {
    %c0_i32 = arith.constant 0 : i32
    %c0_i32_0 = arith.constant 0 : i32
    %c0_i32_1 = arith.constant 0 : i32
    return %c0_i32, %c0_i32_0 : i32, i32
  }
  func.func @transform_9(%arg0: i32) -> (i32, i32, i32) {
    %c0_i32 = arith.constant 0 : i32
    %c0_i32_0 = arith.constant 0 : i32
    %c0_i32_1 = arith.constant 0 : i32
    return %arg0, %c0_i32, %c0_i32_0 : i32, i32, i32
  }
}

</mosaic_0001>

<bundles_post_ra>
// kernel: tpu_custom_call.1
= control target key start
LH: loop header
LB: loop body
LE: loop exit
PB: predicated region body
PF: predicated region fallthrough
CT: control target
= control target key end

     0   :  { %s7226_s0 = inlined_call_operand.hbm [shape: f32[2,8,512], index: 0, kind: input, shape index: {}]   ;;  %s7227_s1 = inlined_call_operand.hbm [shape: f32[49,512], index: 1, kind: input, shape index: {}]   ;;  %s7228_s2 = inlined_call_operand.hbm [shape: f32[9,512], index: 2, kind: input, shape index: {}]   ;;  %s7229_s3 = inlined_call_operand.vmem [shape: f32[8,392], index: 3, kind: input, shape index: {}]   ;;  %s7230_s4 = inlined_call_operand.vmem [shape: f32[8,1], index: 4, kind: input, shape index: {}]   ;;  %s7231_s5 = inlined_call_operand.vmem [shape: f32[16,72], index: 5, kind: input, shape index: {}]   ;;  %s7232_s6 = inlined_call_operand.vmem [shape: f32[16,1], index: 6, kind: input, shape index: {}]   ;;  %s7233_s7 = inlined_call_operand.hbm [shape: f32[32,144], index: 7, kind: input, shape index: {}]   ;;  %s7234_s8 = inlined_call_operand.vmem [shape: f32[32,1], index: 8, kind: input, shape index: {}]   ;;  %s7235_s9 = inlined_call_operand.hbm [shape: f32[2,32,512], index: 9, kind: output, shape index: {}]  }
   0x1   :  { %7414 = sst [smem:[#allocation94_spill]] %s7227_s1 }
   0x2   :  { %7415 = sst [smem:[#allocation95_spill]] %s7228_s2 }
   0x3   :  { %7416 = sst [smem:[#allocation96_spill]] %s7233_s7 }
   0x4   :  { %14 = vsyncpa [#allocation3], 0 }
   0x5   :  { %16 = vsyncpa [#allocation3 + $0x1], 0 }
   0x6   :  { %17 = vsyncpa [#allocation6], 0 }
   0x7   :  { %18 = vsyncpa [#allocation9], 0 }
   0x8   :  { %19 = vsyncpa [#allocation4], 0 }
   0x9   :  { %21 = vsyncpa [#allocation4 + $0x1], 0  ;;  %s4053_s30 = smov 0   ;;  %s4055_s10 = smov 0  }
   0xa   :  { %s4057_s11 = smov 0   ;;  %s4059_s12 = smov 0  }
   0xb LB: > { %s7417_s1 = sld [smem:[#allocation94_spill]]  ;;  %s4077_s16 = sadd.s32 4294967295, %s3943_s12   ;;  %s3943_s12 = sphi %s4059_s12, %s7768_s12   ;;  %s3939_s11 = sphi %s4057_s11, %s7767_s11   ;;  %s3935_s10 = sphi %s4055_s10, %s7766_s10   ;;  %s3931_s30 = sphi %s4053_s30, %s7765_s30  }
   0xc   : > { %p3491_p0 = scmp.ge.s32.totalorder %s3943_s12, 1  ;;  %p48_p1 = scmp.eq.s32.totalorder %s4077_s16, 0 }
   0xd   : > { %p252_p2 = scmp.lt.s32.totalorder %s3943_s12, 3  ;;  %s3945_s18 = smov [#allocation5]  }
   0xe   : > { %s265_s19 = sshll.u32 %s3945_s18, 4  ;;  %s7419_s2 = sld [smem:[#allocation95_spill]]  ;;  %s266_s19 = int_to_ptr.vmem [resolvable:$true] %s265_s19 }
   0xf   : > { %p4082_p3 = pnand %p3491_p0, %p252_p2  ;;  %s7421_s7 = sld [smem:[#allocation96_spill]] }
  0x10   : > { %s3946_s27 = smov [#allocation7]   ;;  %s3947_s29 = smov 512  }
  0x11   : > { %s263_s15 = sshll.u32 %s7417_s1, 4  ;;  %p3556_p4 = pneg %p4082_p3  ;;  %s264_s15 = int_to_ptr.hbm [resolvable:$true] %s263_s15 }
  0x12   : > { %s279_s28 = sshll.u32 %s3946_s27, 4  ;;  %s3948_s13 = smov 32   ;;  %s280_s28 = int_to_ptr.vmem [resolvable:$true] %s279_s28 }
  0x13   : > { %p4094_p6 = pnand %p3556_p4, %p48_p1  ;;  %s3949_s14 = smov [#allocation8]  }
  0x14   : > { %s277_s22 = sshll.u32 %s7419_s2, 4  ;;  %s305_s18 = sshll.u32 %s3949_s14, 4  ;;  %s278_s22 = int_to_ptr.hbm [resolvable:$true] %s277_s22  ;;  %s306_s18 = int_to_ptr.vmem [resolvable:$true] %s305_s18 }
  0x15   : > { %s303_s26 = sshll.u32 %s7421_s7, 4  ;;  %s3950_s20 = smov 256   ;;  %s304_s26 = int_to_ptr.hbm [resolvable:$true] %s303_s26 }
  0x16   : > { %3559 = dma.hbm_to_vmem [thread:$0]  (!%p4094_p6), %s264_s15, 3584, %s266_s19, [#allocation6], %s3947_s29, %s3947_s29, %s3948_s13  }
  0x17   : > { %3562 = dma.hbm_to_vmem [thread:$0]  (!%p4094_p6), %s278_s22, 1024, %s280_s28, [#allocation6], %s3947_s29, %s3947_s29, %s3948_s13  }
  0x18   : > { %s3951_s21 = smov 16   ;;  %s3490_s24 = sadd.s32 4294967294, %s3943_s12  }
  0x19   : > { %3565 = dma.hbm_to_vmem [thread:$0]  (!%p4094_p6), %s304_s26, 1024, %s306_s18, [#allocation9], %s3950_s20, %s3950_s20, %s3951_s21  }
  0x1a   : > { %s4109_s15 = sadd.s32 1, %s3943_s12   ;;  %s34_s19 = sadd.s32 1, %s3939_s11 }
  0x1b   : > { %s31_s25 = ssub.s32 %s3943_s12, %s4109_s15  ;;  %p41_p7 = scmp.ne.s32.totalorder %s3939_s11, %s3935_s10 }
  0x1c   : > { %p32_p8 = scmp.eq.s32.totalorder %s31_s25, 0  ;;  %p42_p9 = scmp.eq.s32.totalorder %s3943_s12, 0 }
  0x1d   : > { %p47_p10 = scmp.ne.s32.totalorder %s3935_s10, %s3931_s30  ;;  %p239_p11 = scmp.eq.s32.totalorder %s4077_s16, 1 }
  0x1e   : > { %s4121_s22 = scalar_select %p32_p8, %s3939_s11, %s34_s19  }
  0x1f   : > { %p4125_p12 = por %p48_p1, %p47_p10  ;;  %p4129_p13 = por %p239_p11, %p41_p7 }
  0x20   : > { %p245_p0 = scmp.eq.s32.totalorder %s3490_s24, 1  ;;  %p43_p2 = por %p42_p9, %p41_p7 }
  0x21   : > { %s322_s27 = sand.u32 1, %s3939_s11   ;;  %p3577_p6 = scmp.lt.s32.totalorder %s3943_s12, 2 }
  0x22   : > { %p4134_p4 = por %p245_p0, %p47_p10  ;;  %s3496_s29 = sshll.u32 %s322_s27, 5 }
  0x23   : > { %s3538_s13 = sshll.u32 %s3943_s12, 5  ;;  %s326_s19 = scalar_lea.vmem [#allocation2], %s3496_s29 }
  0x24   : > { %s331_s20 = scalar_lea.hbm %s7226_s0, %s3538_s13  ;;  %s335_s25 = sshll.u32 %s326_s19, 4  ;;  %s336_s25 = int_to_ptr.vmem [resolvable:$true] %s335_s25 }
  0x25   : > { %s333_s21 = sshll.u32 %s331_s20, 4  ;;  %p4143_p8 = pnand %p3577_p6, %p43_p2  ;;  %s334_s21 = int_to_ptr.hbm [resolvable:$true] %s333_s21 }
  0x26   : > { %s323_s1 = scalar_lea.sflag [#allocation3], %s322_s27  ;;  %s3839_s2 = sshra.s32 %s334_s21, 4  ;;  %s3840_s2 = int_to_ptr.hbm [resolvable:$true] %s3839_s2 }
  0x27   : > { %s3841_s7 = scalar_lea.hbm %s3840_s2, 32  ;;  %p3843_p9 = pneg %p4143_p8 }
  0x28   : > { %p3842_p7 = scmp.ne.s32.totalorder %s3840_s2, %s3841_s7  ;;  %s3846_s29 = scalar_lea.hbm %s7226_s0, 64 }
  0x29   : > { %p3847_p0 = scmp.lt.s32.totalorder %s3840_s2, %s7226_s0  ;;  %p3848_p2 = scmp.lt.s32.totalorder %s3846_s29, %s3841_s7 }
  0x2a   : > { %p3844_p10 = pnand %p3843_p9, %p3842_p7 }
  0x2b   : > { %p3849_p6 = por %p3848_p2, %p3847_p0 }
  0x2c   : > { %p3845_p11 = pneg %p3844_p10 }
  0x2e   : > { %p3850_p5 = pnand %p3849_p6, %p3845_p11 }
  0x30   : > { %3853 = shalt.err (!%p3850_p5)
}
  0x31   : > { %3569 = dma.hbm_to_vmem [thread:$0]  (!%p4143_p8), %s334_s21, 512, %s336_s25, %s323_s1  }
  0x32   : > { %344 = sbr.rel (%p4082_p3) target bundleno = 2063 (0x80f), region = 56 }
  0x37   : > { %s4160_s27 = sand.u32 1, %s3935_s10  }
  0x38   : > { %s3500_s19 = sshll.u32 %s4160_s27, 5  ;;  %s347_s13 = scalar_lea.sflag [#allocation3], %s4160_s27 }
  0x39   : > { %s4164_s14 = scalar_lea.vmem [#allocation2], %s3500_s19 }
  0x3a   : > { %3914 = dma.done.wait (%p4125_p12), %s347_s13, 512  }
  0x3b   : > { %3916 = vsyncadd (%p4125_p12), %s347_s13, 4294966784 }
  0x3c   : > { %3918 = dma.done.wait (%p48_p1), [#allocation6], 4608  }
  0x3d   : > { %3920 = vsyncadd (%p48_p1), [#allocation6], 4294962688 }
  0x3e   : > { %3922 = dma.done.wait (%p48_p1), [#allocation9], 1024  }
  0x3f   : > { %3924 = vsyncadd (%p48_p1), [#allocation9], 4294966272  ;;  %v4179_v0 = vld [vmem:[%s4164_s14 + $0x10] sm:$0xff]  ;;  %v4182_v1 = vld [vmem:[%s4164_s14] sm:$0xff]  ;;  %s3952_s1 = smov 51   ;;  %s3953_s2 = smov 50   ;;  %v413_v10 = vlaneseq }
  0x40   : > { %409 = vrot.lane.b32.xlu1 %v4179_v0, %s3952_s1  ;;  %434 = vrot.lane.b32.xlu2 %v4182_v1, %s3953_s2  ;;  %v4188_v2 = vld [vmem:[%s4164_s14 + $0x18] sm:$0xff]  ;;  %v4191_v3 = vld [vmem:[%s4164_s14 + $0x8] sm:$0xff]  ;;  %s3954_s7 = smov 49   ;;  %s3955_s17 = smov 48  }
  0x41   : > { %405 = vrot.lane.b32.xlu0 %v4182_v1, %s3952_s1  ;;  %s3956_s23 = smov 47   ;;  %s3957_s21 = smov 46   ;;  %v4258_v11 = vld [vmem:[#allocation5] ss:$8 sm:$0xf]  ;;  %v4260_v12 = vand.u32 127, %v413_v10 }
  0x42   : > { %s3958_s25 = smov 45   ;;  %s3959_s24 = smov 35   ;;  %v425_v13 = vperm.slane %v4258_v11, 3  ;;  %v424_v14 = vperm.slane %v4258_v11, 2 }
  0x43   : > { %s3960_s29 = smov 78   ;;  %s7287_s18 = smov 79   ;;  %vm415_vm0 = vcmp.lt.s32.totalorder %v4260_v12, 51  ;;  %v4289_v22 = vld [vmem:[#allocation5 + $0x1] ss:$8 sm:$0xf] }
  0x44   : > { %s7256_s20 = smov 80   ;;  %s7250_s19 = smov 81   ;;  %v452_v23 = vperm.slane %v4289_v22, 2  ;;  %v453_v24 = vperm.slane %v4289_v22, 3  ;;  %vm442_vm1 = vcmp.lt.s32.totalorder %v4260_v12, 50  ;;  %vm470_vm2 = vcmp.lt.s32.totalorder %v4260_v12, 49 }
  0x45   : > { %s3964_s13 = smov 18   ;;  %v4310_v32 = vld [vmem:[#allocation5 + $0x2] ss:$8 sm:$0xf]  ;;  %vm498_vm3 = vcmp.lt.s32.totalorder %v4260_v12, 48  ;;  %vm526_vm4 = vcmp.lt.s32.totalorder %v4260_v12, 47 }
  0x46   : > { %v481_v33 = vperm.slane %v4310_v32, 3  ;;  %v480_v34 = vperm.slane %v4310_v32, 2  ;;  %v4335_v42 = vld [vmem:[#allocation5 + $0x3] ss:$8 sm:$0xf]  ;;  %vm554_vm5 = vcmp.lt.s32.totalorder %v4260_v12, 46 }
  0x47   : > { %v508_v43 = vperm.slane %v4335_v42, 2  ;;  %v509_v49 = vperm.slane %v4335_v42, 3  ;;  %v4376_v55 = vld [vmem:[#allocation5 + $0x4] ss:$8 sm:$0xf]  ;;  %vm582_vm6 = vcmp.lt.s32.totalorder %v4260_v12, 45 }
  0x48   : > { %411 = vrot.lane.b32.xlu1 %v4188_v2, %s3952_s1  ;;  %436 = vrot.lane.b32.xlu2 %v4191_v3, %s3953_s2  ;;  %v536_v56 = vperm.slane %v4376_v55, 2  ;;  %v537_v57 = vperm.slane %v4376_v55, 3  ;;  %v4397_v10 = vld [vmem:[#allocation5 + $0x5] ss:$8 sm:$0xf]  ;;  %vm610_vm7 = vcmp.lt.s32.totalorder %v4260_v12, 35 }
  0x49   : > { %407 = vrot.lane.b32.xlu0 %v4191_v3, %s3952_s1  ;;  %s7244_s1 = smov 82   ;;  %vm7292_vm8 = vcmp.lt.s32.totalorder %v4260_v12, 79  ;;  %vm7302_vm9 = vcmp.lt.s32.totalorder %v4260_v12, 78  ;;  %vm7290_vm10 = vcmp.lt.s32.totalorder %v4260_v12, 80  ;;  %vm834_vm11 = vcmp.lt.s32.totalorder %v4260_v12, 18 }
  0x4a   : > { %vm7281_vm12 = vcmp.lt.s32.totalorder %v4260_v12, 81  ;;  %vm7273_vm13 = vcmp.lt.s32.totalorder %v4260_v12, 82  ;;  %vm7270_vm14 = vcmp.lt.s32.totalorder %v4260_v12, 83  ;;  %vm806_vm15 = vcmp.lt.s32.totalorder %v4260_v12, 19 }
  0x50   : > { %440 = vrot.lane.b32.xlu1 %v4188_v2, %s3953_s2  ;;  %462 = vrot.lane.b32.xlu2 %v4182_v1, %s3954_s7 }
  0x51   : > { %438 = vrot.lane.b32.xlu0 %v4179_v0, %s3953_s2  ;;  %s3966_s2 = smov 19  }
  0x58   : > { %466 = vrot.lane.b32.xlu1 %v4179_v0, %s3954_s7  ;;  %468 = vrot.lane.b32.xlu2 %v4188_v2, %s3954_s7 }
  0x59   : > { %464 = vrot.lane.b32.xlu0 %v4191_v3, %s3954_s7  ;;  %s7242_s7 = smov 83  }
  0x60   : > { %492 = vrot.lane.b32.xlu1 %v4191_v3, %s3955_s17  ;;  %494 = vrot.lane.b32.xlu2 %v4179_v0, %s3955_s17 }
  0x61   : > { %490 = vrot.lane.b32.xlu0 %v4182_v1, %s3955_s17 }
  0x68   : > { %518 = vrot.lane.b32.xlu1 %v4182_v1, %s3956_s23  ;;  %520 = vrot.lane.b32.xlu2 %v4191_v3, %s3956_s23 }
  0x69   : > { %496 = vrot.lane.b32.xlu0 %v4188_v2, %s3955_s17  ;;  %s3968_s17 = smov 29  }
  0x70   : > { %524 = vrot.lane.b32.xlu1 %v4188_v2, %s3956_s23  ;;  %546 = vrot.lane.b32.xlu2 %v4182_v1, %s3957_s21 }
  0x71   : > { %522 = vrot.lane.b32.xlu0 %v4179_v0, %s3956_s23  ;;  %s7236_s23 = smov 93  }
  0x78   : > { %550 = vrot.lane.b32.xlu1 %v4179_v0, %s3957_s21  ;;  %552 = vrot.lane.b32.xlu2 %v4188_v2, %s3957_s21 }
  0x79   : > { %548 = vrot.lane.b32.xlu0 %v4191_v3, %s3957_s21  ;;  %s3970_s21 = smov 30  }
  0x80   : > { %576 = vrot.lane.b32.xlu1 %v4191_v3, %s3958_s25  ;;  %578 = vrot.lane.b32.xlu2 %v4179_v0, %s3958_s25 }
  0x81   : > { %574 = vrot.lane.b32.xlu0 %v4182_v1, %s3958_s25 }
  0x88   : > { %602 = vrot.lane.b32.xlu1 %v4182_v1, %s3959_s24  ;;  %604 = vrot.lane.b32.xlu2 %v4191_v3, %s3959_s24 }
  0x89   : > { %580 = vrot.lane.b32.xlu0 %v4188_v2, %s3958_s25  ;;  %s7240_s25 = smov 94  }
  0x90   : > { %608 = vrot.lane.b32.xlu1 %v4188_v2, %s3959_s24  ;;  %1694 = vrot.lane.b32.xlu2 %v4182_v1, %s3960_s29 }
  0x91   : > { %606 = vrot.lane.b32.xlu0 %v4179_v0, %s3959_s24  ;;  %s7272_s24 = smov 31  }
  0x98   : > { %1666 = vrot.lane.b32.xlu1 %v4182_v1, %s7287_s18  ;;  %1668 = vrot.lane.b32.xlu2 %v4191_v3, %s7287_s18  ;;  %s3990_s18 = smov 127  }
  0x99   : > { %1696 = vrot.lane.b32.xlu0 %v4191_v3, %s3960_s29 }
  0x9a   : > { %v4230_v4 = vpop.permute.xlu2 %434 }
  0xa0   : > { %1640 = vrot.lane.b32.xlu1 %v4191_v3, %s7256_s20  ;;  %1610 = vrot.lane.b32.xlu2 %v4182_v1, %s7250_s19 }
  0xa1   : > { %1638 = vrot.lane.b32.xlu0 %v4182_v1, %s7256_s20  ;;  %s3982_s20 = smov 114  }
  0xa2   : > { %v4238_v5 = vpop.permute.xlu2 %436 }
  0xa8   : > { %826 = vrot.lane.b32.xlu1 %v4182_v1, %s3964_s13  ;;  %832 = vrot.lane.b32.xlu2 %v4188_v2, %s3964_s13 }
  0xa9   : > { %1612 = vrot.lane.b32.xlu0 %v4191_v3, %s7250_s19  ;;  %s7330_s19 = smov 113  }
  0xaa   : > { %v4246_v6 = vpop.permute.xlu2 %462 }
  0xb0   : > { %1584 = vrot.lane.b32.xlu1 %v4191_v3, %s7244_s1  ;;  %798 = vrot.lane.b32.xlu2 %v4182_v1, %s3966_s2 }
  0xb1   : > { %1582 = vrot.lane.b32.xlu0 %v4182_v1, %s7244_s1  ;;  %s7332_s1 = smov 112  }
  0xb2   : > { %v410_v7 = vpop.permute.xlu1 %409  ;;  %v4254_v8 = vpop.permute.xlu2 %468 }
  0xb3   : > { %v4256_v9 = vpop.permute.xlu0 %405 }
  0xb8   : > { %1554 = vrot.lane.b32.xlu1 %v4182_v1, %s7242_s7  ;;  %1556 = vrot.lane.b32.xlu2 %v4191_v3, %s7242_s7  ;;  %s7269_s7 = smov 33  }
  0xb9   : > { %804 = vrot.lane.b32.xlu0 %v4188_v2, %s3966_s2 }
  0xba   : > { %v4271_v15 = vpop.permute.xlu1 %411  ;;  %v495_v16 = vpop.permute.xlu2 %494 }
  0xbb   : > { %v416_v17 = vsel %vm415_vm0, %v410_v7, %v4271_v15  ;;  %v4276_v18 = vpop.permute.xlu0 %407 }
  0xbc   : > { %v417_v19 = vsel %vm415_vm0, %v4276_v18, %v410_v7  ;;  %v4281_v20 = vmul.f32 %v425_v13, %v416_v17  ;;  %v565_v13 = vperm.slane %v4397_v10, 3 }
  0xbd   : > { %v4283_v21 = vmul.f32 %v424_v14, %v417_v19  ;;  %v564_v14 = vperm.slane %v4397_v10, 2 }
  0xbe   : > { %7426 = vst [vmem:[#allocation15_spill] sm:$0xff] %v4281_v20 }
  0xbf   : > { %7427 = vst [vmem:[#allocation16_spill] sm:$0xff] %v4283_v21  ;;  %v4630_v21 = vld [vmem:[#allocation5 + $0x24] ss:$8 sm:$0xf] }
  0xc0   : > { %776 = vrot.lane.b32.xlu1 %v4188_v2, %s3968_s17  ;;  %828 = vrot.lane.b32.xlu2 %v4191_v3, %s3964_s13  ;;  %7462 = vst [vmem:[#allocation51_spill] sm:$0xff] %v4630_v21 }
  0xc1   : > { %770 = vrot.lane.b32.xlu0 %v4182_v1, %s3968_s17 }
  0xc2   : > { %v4295_v25 = vpop.permute.xlu1 %440  ;;  %v4297_v26 = vpop.permute.xlu2 %520 }
  0xc3   : > { %v439_v27 = vpop.permute.xlu0 %438 }
  0xc4   : > { %v443_v28 = vsel %vm442_vm1, %v439_v27, %v4295_v25  ;;  %v444_v29 = vsel %vm442_vm1, %v4238_v5, %v439_v27 }
  0xc5   : > { %v4306_v30 = vmul.f32 %v452_v23, %v444_v29  ;;  %v4308_v31 = vmul.f32 %v453_v24, %v443_v28  ;;  %v4422_v29 = vld [vmem:[#allocation5 + $0x6] ss:$8 sm:$0xf] }
  0xc7   : > { %7428 = vst [vmem:[#allocation17_spill] sm:$0xff] %v4306_v30 }
  0xc8   : > { %7429 = vst [vmem:[#allocation18_spill] sm:$0xff] %v4308_v31  ;;  %1528 = vrot.lane.b32.xlu1 %v4191_v3, %s7236_s23  ;;  %742 = vrot.lane.b32.xlu2 %v4182_v1, %s3970_s21 }
  0xc9   : > { %1526 = vrot.lane.b32.xlu0 %v4182_v1, %s7236_s23  ;;  %s7238_s23 = smov 95  }
  0xca   : > { %v467_v35 = vpop.permute.xlu1 %466  ;;  %v4321_v36 = vpop.permute.xlu2 %546 }
  0xcb   : > { %v471_v37 = vsel %vm470_vm2, %v467_v35, %v4254_v8  ;;  %v4326_v38 = vpop.permute.xlu0 %464 }
  0xcc   : > { %v472_v39 = vsel %vm470_vm2, %v4326_v38, %v467_v35  ;;  %v4331_v40 = vmul.f32 %v481_v33, %v471_v37  ;;  %v592_v33 = vperm.slane %v4422_v29, 2 }
  0xcd   : > { %v4333_v41 = vmul.f32 %v480_v34, %v472_v39 }
  0xce   : > { %7430 = vst [vmem:[#allocation19_spill] sm:$0xff] %v4331_v40 }
  0xcf   : > { %7431 = vst [vmem:[#allocation20_spill] sm:$0xff] %v4333_v41  ;;  %v4655_v41 = vld [vmem:[#allocation5 + $0x23] ss:$8 sm:$0xf] }
  0xd0   : > { %800 = vrot.lane.b32.xlu1 %v4191_v3, %s3966_s2  ;;  %1498 = vrot.lane.b32.xlu2 %v4182_v1, %s7240_s25  ;;  %7465 = vst [vmem:[#allocation54_spill] sm:$0xff] %v4655_v41 }
  0xd1   : > { %748 = vrot.lane.b32.xlu0 %v4188_v2, %s3970_s21 }
  0xd2   : > { %v4344_v44 = vpop.permute.xlu1 %492  ;;  %v4346_v45 = vpop.permute.xlu2 %552 }
  0xd3   : > { %v4349_v46 = vpop.permute.xlu0 %490  ;;  %v500_v47 = vsel %vm498_vm3, %v4344_v44, %v495_v16 }
  0xd4   : > { %v4354_v48 = vmul.f32 %v508_v43, %v500_v47  ;;  %v593_v47 = vperm.slane %v4422_v29, 3 }
  0xd6   : > { %7432 = vst [vmem:[#allocation21_spill] sm:$0xff] %v4354_v48 }
  0xd8   : > { %714 = vrot.lane.b32.xlu1 %v4182_v1, %s7272_s24  ;;  %720 = vrot.lane.b32.xlu2 %v4188_v2, %s7272_s24 }
  0xd9   : > { %1500 = vrot.lane.b32.xlu0 %v4191_v3, %s7240_s25  ;;  %s7246_s25 = smov 96  }
  0xda   : > { %v4363_v50 = vpop.permute.xlu1 %518  ;;  %v579_v51 = vpop.permute.xlu2 %578 }
  0xdb   : > { %v4365_v52 = vpop.permute.xlu0 %496 }
  0xdc   : > { %v499_v53 = vsel %vm498_vm3, %v495_v16, %v4365_v52 }
  0xdd   : > { %v4370_v54 = vmul.f32 %v509_v49, %v499_v53 }
  0xdf   : > { %7433 = vst [vmem:[#allocation22_spill] sm:$0xff] %v4370_v54 }
  0xe0   : > { %1470 = vrot.lane.b32.xlu1 %v4182_v1, %s7238_s23  ;;  %1472 = vrot.lane.b32.xlu2 %v4191_v3, %s7238_s23  ;;  %s7252_s23 = smov 32  }
  0xe1   : > { %772 = vrot.lane.b32.xlu0 %v4191_v3, %s3968_s17 }
  0xe2   : > { %v4382_v58 = vpop.permute.xlu1 %524  ;;  %v4384_v59 = vpop.permute.xlu2 %604 }
  0xe3   : > { %v523_v60 = vpop.permute.xlu0 %522 }
  0xe4   : > { %v527_v61 = vsel %vm526_vm4, %v523_v60, %v4382_v58  ;;  %v528_v62 = vsel %vm526_vm4, %v4297_v26, %v523_v60 }
  0xe5   : > { %v4393_v63 = vmul.f32 %v536_v56, %v528_v62  ;;  %v4395_v7 = vmul.f32 %v537_v57, %v527_v61  ;;  %v4465_v61 = vld [vmem:[#allocation5 + $0x7] ss:$8 sm:$0xf] }
  0xe6   : > { %v620_v62 = vperm.slane %v4465_v61, 2 }
  0xe7   : > { %7434 = vst [vmem:[#allocation23_spill] sm:$0xff] %v4393_v63  ;;  %v1484_v63 = vld [vmem:[#allocation5 + $0x87] ss:$8 sm:$0xf] }
  0xe8   : > { %7435 = vst [vmem:[#allocation24_spill] sm:$0xff] %v4395_v7  ;;  %692 = vrot.lane.b32.xlu1 %v4188_v2, %s7252_s23  ;;  %744 = vrot.lane.b32.xlu2 %v4191_v3, %s3970_s21 }
  0xe9   : > { %686 = vrot.lane.b32.xlu0 %v4182_v1, %s7252_s23 }
  0xea   : > { %v551_v16 = vpop.permute.xlu1 %550  ;;  %v4408_v17 = vpop.permute.xlu2 %1694 }
  0xeb   : > { %7436 = vst [vmem:[#allocation25_spill] sm:$0xff] %v4408_v17  ;;  %v555_v19 = vsel %vm554_vm5, %v551_v16, %v4346_v45  ;;  %v4413_v23 = vpop.permute.xlu0 %548 }
  0xec   : > { %v556_v24 = vsel %vm554_vm5, %v4413_v23, %v551_v16  ;;  %v4418_v27 = vmul.f32 %v565_v13, %v555_v19  ;;  %v621_v13 = vperm.slane %v4465_v61, 3 }
  0xed   : > { %v4420_v28 = vmul.f32 %v564_v14, %v556_v24 }
  0xee   : > { %7437 = vst [vmem:[#allocation26_spill] sm:$0xff] %v4418_v27 }
  0xef   : > { %7438 = vst [vmem:[#allocation27_spill] sm:$0xff] %v4420_v28  ;;  %v4707_v28 = vld [vmem:[#allocation5 + $0x22] ss:$8 sm:$0xf] }
  0xf0   : > { %1444 = vrot.lane.b32.xlu1 %v4191_v3, %s7246_s25  ;;  %658 = vrot.lane.b32.xlu2 %v4182_v1, %s7269_s7  ;;  %7469 = vst [vmem:[#allocation58_spill] sm:$0xff] %v4707_v28 }
  0xf1   : > { %1442 = vrot.lane.b32.xlu0 %v4182_v1, %s7246_s25  ;;  %s7248_s25 = smov 97  }
  0xf2   : > { %v4431_v34 = vpop.permute.xlu1 %576  ;;  %v4433_v35 = vpop.permute.xlu2 %1668 }
  0xf3   : > { %7439 = vst [vmem:[#allocation28_spill] sm:$0xff] %v4433_v35  ;;  %v4436_v37 = vpop.permute.xlu0 %574  ;;  %v584_v39 = vsel %vm582_vm6, %v4431_v34, %v579_v51 }
  0xf4   : > { %v4441_v43 = vmul.f32 %v592_v33, %v584_v39 }
  0xf6   : > { %7440 = vst [vmem:[#allocation29_spill] sm:$0xff] %v4441_v43 }
  0xf8   : > { %716 = vrot.lane.b32.xlu1 %v4191_v3, %s7272_s24  ;;  %1246 = vrot.lane.b32.xlu2 %v4182_v1, %s7332_s1  ;;  %s7277_s24 = smov 110  }
  0xf9   : > { %664 = vrot.lane.b32.xlu0 %v4188_v2, %s7269_s7 }
  0xfa   : > { %v4450_v49 = vpop.permute.xlu1 %602  ;;  %v4452_v53 = vpop.permute.xlu2 %1610 }
  0xfb   : > { %7441 = vst [vmem:[#allocation30_spill] sm:$0xff] %v4452_v53  ;;  %v4454_v56 = vpop.permute.xlu0 %580 }
  0xfc   : > { %v583_v57 = vsel %vm582_vm6, %v579_v51, %v4454_v56 }
  0xfd   : > { %v4459_v60 = vmul.f32 %v593_v47, %v583_v57  ;;  %v1708_v47 = vld [vmem:[#allocation5 + $0xa7] ss:$8 sm:$0xf]  ;;  %v1680_v57 = vld [vmem:[#allocation5 + $0xa6] ss:$8 sm:$0xf] }
  0xff   : > { %7442 = vst [vmem:[#allocation31_spill] sm:$0xff] %v4459_v60 }
 0x100   : > { %1414 = vrot.lane.b32.xlu1 %v4182_v1, %s7248_s25  ;;  %1416 = vrot.lane.b32.xlu2 %v4191_v3, %s7248_s25  ;;  %s7268_s25 = smov 34  }
 0x101   : > { %1248 = vrot.lane.b32.xlu0 %v4191_v3, %s7332_s1 }
 0x102   : > { %v4471_v14 = vpop.permute.xlu1 %608  ;;  %v4473_v51 = vpop.permute.xlu2 %832 }
 0x103   : > { %7443 = vst [vmem:[#allocation32_spill] sm:$0xff] %v4473_v51  ;;  %v607_v16 = vpop.permute.xlu0 %606 }
 0x104   : > { %v611_v19 = vsel %vm610_vm7, %v607_v16, %v4471_v14  ;;  %v612_v24 = vsel %vm610_vm7, %v4384_v59, %v607_v16  ;;  %v1682_v16 = vperm.slane %v1680_v57, 0 }
 0x105   : > { %v4482_v33 = vmul.f32 %v620_v62, %v612_v24  ;;  %v4484_v39 = vmul.f32 %v621_v13, %v611_v19  ;;  %v1710_v62 = vperm.slane %v1708_v47, 0  ;;  %v1652_v47 = vld [vmem:[#allocation5 + $0xa5] ss:$8 sm:$0xf] }
 0x106   : > { %v1654_v57 = vperm.slane %v1652_v47, 0 }
 0x107   : > { %7444 = vst [vmem:[#allocation33_spill] sm:$0xff] %v4482_v33 }
 0x108   : > { %7445 = vst [vmem:[#allocation34_spill] sm:$0xff] %v4484_v39  ;;  %636 = vrot.lane.b32.xlu1 %v4188_v2, %s7268_s25  ;;  %688 = vrot.lane.b32.xlu2 %v4191_v3, %s7252_s23  ;;  %s7261_s23 = smov 98  }
 0x109   : > { %630 = vrot.lane.b32.xlu0 %v4182_v1, %s7268_s25 }
 0x10a   : > { %v4494_v13 = vpop.permute.xlu1 %1666  ;;  %v4496_v19 = vpop.permute.xlu2 %798 }
 0x10b   : > { %7446 = vst [vmem:[#allocation35_spill] sm:$0xff] %v4494_v13  ;;  %v4498_v24 = vpop.permute.xlu0 %1696  ;;  %v1677_v20 = vsel %vm7292_vm8, %v4494_v13, %v4433_v35  ;;  %v1596_v35 = vld [vmem:[#allocation5 + $0xa3] ss:$8 sm:$0xf]  ;;  %vm7296_vm8 = vcmp.lt.s32.totalorder %v4260_v12, 95 }
 0x10c   : > { %7447 = vst [vmem:[#allocation36_spill] sm:$0xff] %v4498_v24  ;;  %v1705_v31 = vsel %vm7302_vm9, %v4408_v17, %v4498_v24  ;;  %v1690_v54 = vmul.f32 %v1682_v16, %v1677_v20  ;;  %v4525_v16 = vld [vmem:[#allocation5 + $0x27] ss:$8 sm:$0xf]  ;;  %vm7325_vm9 = vcmp.lt.s32.totalorder %v4260_v12, 33 }
 0x10d   : > { %v1718_v40 = vmul.f32 %v1710_v62, %v1705_v31  ;;  %v1624_v17 = vld [vmem:[#allocation5 + $0xa4] ss:$8 sm:$0xf]  ;;  %v843_v47 = vperm.slane %v4525_v16, 1 }
 0x10f   : > { %1804 = vmatpush.msra.mxu2 %v1718_v40 }
 0x110   : > { %1220 = vrot.lane.b32.xlu1 %v4191_v3, %s7330_s19  ;;  %1386 = vrot.lane.b32.xlu2 %v4182_v1, %s7261_s23 }
 0x111   : > { %1218 = vrot.lane.b32.xlu0 %v4182_v1, %s7330_s19  ;;  %1805 = vmatpush.msra.mxu2 %v1690_v54  ;;  %v842_v54 = vperm.slane %v4525_v16, 0 }
 0x112   : > { %v4515_v13 = vpop.permute.xlu1 %1640  ;;  %v4517_v20 = vpop.permute.xlu2 %1556 }
 0x113   : > { %7448 = vst [vmem:[#allocation37_spill] sm:$0xff] %v4515_v13  ;;  %v4519_v31 = vpop.permute.xlu0 %1638 }
 0x114   : > { %7449 = vst [vmem:[#allocation38_spill] sm:$0xff] %v4517_v20  ;;  %v1649_v40 = vsel %vm7290_vm10, %v4519_v31, %v4515_v13  ;;  %vm7299_vm10 = vcmp.lt.s32.totalorder %v4260_v12, 94 }
 0x115   : > { %7450 = vst [vmem:[#allocation39_spill] sm:$0xff] %v4519_v31  ;;  %v1662_v62 = vmul.f32 %v1654_v57, %v1649_v40  ;;  %v1626_v57 = vperm.slane %v1624_v17, 0 }
 0x117   : > { %1806 = vmatpush.msra.mxu2 %v1662_v62 }
 0x118   : > { %660 = vrot.lane.b32.xlu1 %v4191_v3, %s7269_s7  ;;  %1190 = vrot.lane.b32.xlu2 %v4182_v1, %s3982_s20  ;;  %s3986_s7 = smov 125  }
 0x119   : > { %1388 = vrot.lane.b32.xlu0 %v4191_v3, %s7261_s23  ;;  %s7263_s23 = smov 99  }
 0x11a   : > { %v827_v40 = vpop.permute.xlu1 %826  ;;  %v4537_v62 = vpop.permute.xlu2 %828 }
 0x11b   : > { %v4539_v31 = vpop.permute.xlu0 %1612  ;;  %v838_v7 = vsel %vm834_vm11, %v4473_v51, %v827_v40  ;;  %v837_v27 = vsel %vm834_vm11, %v827_v40, %v4537_v62  ;;  %v1598_v40 = vperm.slane %v1596_v35, 0  ;;  %v1512_v51 = vld [vmem:[#allocation5 + $0xa0] ss:$8 sm:$0xf] }
 0x11c   : > { %7451 = vst [vmem:[#allocation40_spill] sm:$0xff] %v4539_v31  ;;  %v1621_v60 = vsel %vm7281_vm12, %v4452_v53, %v4539_v31  ;;  %v850_v39 = vmul.f32 %v842_v54, %v838_v7  ;;  %v851_v17 = vmul.f32 %v843_v47, %v837_v27  ;;  %v1568_v54 = vld [vmem:[#allocation5 + $0xa2] ss:$8 sm:$0xf]  ;;  %vm7323_vm12 = vcmp.lt.s32.totalorder %v4260_v12, 30 }
 0x11d   : > { %v1634_v13 = vmul.f32 %v1626_v57, %v1621_v60  ;;  %v4568_v47 = vld [vmem:[#allocation5 + $0x26] ss:$8 sm:$0xf]  ;;  %v1570_v35 = vperm.slane %v1568_v54, 0 }
 0x11e   : > { %1764 = vmatpush.msra.mxu0 %v850_v39  ;;  %1844 = vmatpush.msra.mxu3 %v851_v17  ;;  %v814_v57 = vperm.slane %v4568_v47, 0 }
 0x11f   : > { %1807 = vmatpush.msra.mxu2 %v1634_v13 }
 0x120   : > { %1358 = vrot.lane.b32.xlu1 %v4182_v1, %s7263_s23  ;;  %1360 = vrot.lane.b32.xlu2 %v4191_v3, %s7263_s23  ;;  %s3984_s23 = smov 115  }
 0x121   : > { %1192 = vrot.lane.b32.xlu0 %v4191_v3, %s3982_s20 }
 0x122   : > { %v4558_v7 = vpop.permute.xlu1 %1584  ;;  %v4560_v27 = vpop.permute.xlu2 %742 }
 0x123   : > { %7452 = vst [vmem:[#allocation41_spill] sm:$0xff] %v4558_v7  ;;  %v4562_v60 = vpop.permute.xlu0 %1582 }
 0x124   : > { %7453 = vst [vmem:[#allocation42_spill] sm:$0xff] %v4562_v60  ;;  %v1593_v39 = vsel %vm7273_vm13, %v4562_v60, %v4558_v7  ;;  %v4593_v7 = vld [vmem:[#allocation5 + $0x25] ss:$8 sm:$0xf]  ;;  %vm7289_vm13 = vcmp.lt.s32.totalorder %v4260_v12, 93 }
 0x125   : > { %v1606_v13 = vmul.f32 %v1598_v40, %v1593_v39 }
 0x127   : > { %1808 = vmatpush.msra.mxu2 %v1606_v13 }
 0x128   : > { %1162 = vrot.lane.b32.xlu1 %v4182_v1, %s3984_s23  ;;  %1164 = vrot.lane.b32.xlu2 %v4191_v3, %s3984_s23 }
 0x129   : > { %632 = vrot.lane.b32.xlu0 %v4191_v3, %s7268_s25  ;;  %s7279_s25 = smov 109  }
 0x12a   : > { %v4579_v17 = vpop.permute.xlu1 %1554  ;;  %v4581_v40 = vpop.permute.xlu2 %1498 }
 0x12b   : > { %7454 = vst [vmem:[#allocation43_spill] sm:$0xff] %v4579_v17  ;;  %v4583_v39 = vpop.permute.xlu0 %804  ;;  %v1565_v13 = vsel %vm7270_vm14, %v4579_v17, %v4517_v20  ;;  %vm778_vm14 = vcmp.lt.s32.totalorder %v4260_v12, 29  ;;  %v1540_v17 = vld [vmem:[#allocation5 + $0xa1] ss:$8 sm:$0xf] }
 0x12c   : > { %7455 = vst [vmem:[#allocation44_spill] sm:$0xff] %v4581_v40  ;;  %v810_v54 = vsel %vm806_vm15, %v4583_v39, %v4496_v19  ;;  %v1578_v60 = vmul.f32 %v1570_v35, %v1565_v13  ;;  %v786_v35 = vperm.slane %v4593_v7, 0  ;;  %v1542_v20 = vperm.slane %v1540_v17, 0 }
 0x12d   : > { %7456 = vst [vmem:[#allocation45_spill] sm:$0xff] %v4583_v39  ;;  %v822_v53 = vmul.f32 %v814_v57, %v810_v54  ;;  %v815_v17 = vperm.slane %v4568_v47, 1 }
 0x12e   : > { %1809 = vmatpush.msra.mxu2 %v1578_v60 }
 0x12f   : > { %1765 = vmatpush.msra.mxu0 %v822_v53 }
 0x130   : > { %1332 = vrot.lane.b32.xlu1 %v4191_v3, %s7279_s25  ;;  %1134 = vrot.lane.b32.xlu2 %v4182_v1, %s3986_s7 }
 0x131   : > { %1330 = vrot.lane.b32.xlu0 %v4182_v1, %s7279_s25  ;;  %s7297_s25 = smov 111  }
 0x132   : > { %v4603_v57 = vpop.permute.xlu1 %776  ;;  %v4605_v60 = vpop.permute.xlu2 %720 }
 0x133   : > { %7457 = vst [vmem:[#allocation46_spill] sm:$0xff] %v4603_v57  ;;  %v4607_v53 = vpop.permute.xlu0 %770 }
 0x134   : > { %7458 = vst [vmem:[#allocation47_spill] sm:$0xff] %v4605_v60  ;;  %v782_v13 = vsel %vm778_vm14, %v4603_v57, %v4607_v53 }
 0x135   : > { %v794_v54 = vmul.f32 %v786_v35, %v782_v13 }
 0x137   : > { %1766 = vmatpush.msra.mxu0 %v794_v54 }
 0x138   : > { %1302 = vrot.lane.b32.xlu1 %v4182_v1, %s7277_s24  ;;  %1304 = vrot.lane.b32.xlu2 %v4191_v3, %s7277_s24  ;;  %s3988_s24 = smov 126  }
 0x139   : > { %1136 = vrot.lane.b32.xlu0 %v4191_v3, %s3986_s7 }
 0x13a   : > { %v4620_v31 = vpop.permute.xlu1 %1528  ;;  %v4622_v24 = vpop.permute.xlu2 %1472 }
 0x13b   : > { %7459 = vst [vmem:[#allocation48_spill] sm:$0xff] %v4620_v31  ;;  %v4624_v35 = vpop.permute.xlu0 %1526 }
 0x13c   : > { %7460 = vst [vmem:[#allocation49_spill] sm:$0xff] %v4622_v24  ;;  %v1537_v13 = vsel %vm7289_vm13, %v4624_v35, %v4620_v31  ;;  %vm7319_vm13 = vcmp.lt.s32.totalorder %v4260_v12, 31 }
 0x13d   : > { %7461 = vst [vmem:[#allocation50_spill] sm:$0xff] %v4624_v35  ;;  %v1550_v54 = vmul.f32 %v1542_v20, %v1537_v13  ;;  %v758_v20 = vperm.slane %v4630_v21, 0 }
 0x13f   : > { %1810 = vmatpush.msra.mxu2 %v1550_v54 }
 0x140   : > { %1108 = vrot.lane.b32.xlu1 %v4191_v3, %s3988_s24  ;;  %1274 = vrot.lane.b32.xlu2 %v4182_v1, %s7297_s25 }
 0x141   : > { %1106 = vrot.lane.b32.xlu0 %v4182_v1, %s3988_s24 }
 0x142   : > { %v4641_v13 = vpop.permute.xlu1 %800  ;;  %v4643_v54 = vpop.permute.xlu2 %744 }
 0x143   : > { %7463 = vst [vmem:[#allocation52_spill] sm:$0xff] %v4643_v54  ;;  %v4645_v35 = vpop.permute.xlu0 %748  ;;  %v809_v31 = vsel %vm806_vm15, %v4496_v19, %v4641_v13  ;;  %v730_v19 = vperm.slane %v4655_v41, 0 }
 0x144   : > { %7464 = vst [vmem:[#allocation53_spill] sm:$0xff] %v4645_v35  ;;  %v754_v57 = vsel %vm7323_vm12, %v4645_v35, %v4560_v27  ;;  %v823_v30 = vmul.f32 %v815_v17, %v809_v31  ;;  %v1514_v31 = vperm.slane %v1512_v51, 0  ;;  %v1486_v51 = vperm.slane %v1484_v63, 0 }
 0x145   : > { %v766_v39 = vmul.f32 %v758_v20, %v754_v57 }
 0x146   : > { %1845 = vmatpush.msra.mxu3 %v823_v30 }
 0x147   : > { %1767 = vmatpush.msra.mxu0 %v766_v39 }
 0x148   : > { %1078 = vrot.lane.b32.xlu1 %v4182_v1, %s3990_s18  ;;  %1080 = vrot.lane.b32.xlu2 %v4191_v3, %s3990_s18 }
 0x149   : > { %1276 = vrot.lane.b32.xlu0 %v4191_v3, %s7297_s25  ;;  %s7300_s25 = smov 2  }
 0x14a   : > { %v4666_v30 = vpop.permute.xlu1 %714  ;;  %v4668_v39 = vpop.permute.xlu2 %658 }
 0x14b   : > { %v4670_v57 = vpop.permute.xlu0 %1500  ;;  %v726_v17 = vsel %vm7319_vm13, %v4605_v60, %v4666_v30  ;;  %v787_v60 = vperm.slane %v4593_v7, 1 }
 0x14c   : > { %7466 = vst [vmem:[#allocation55_spill] sm:$0xff] %v4670_v57  ;;  %v1509_v20 = vsel %vm7299_vm10, %v4581_v40, %v4670_v57  ;;  %v738_v35 = vmul.f32 %v730_v19, %v726_v17  ;;  %v753_v17 = vsel %vm7323_vm12, %v4560_v27, %v4643_v54  ;;  %v702_v27 = vperm.slane %v4707_v28, 0  ;;  %v1428_v54 = vld [vmem:[#allocation5 + $0x85] ss:$8 sm:$0xf] }
 0x14d   : > { %v1522_v48 = vmul.f32 %v1514_v31, %v1509_v20  ;;  %vm7311_vm10 = vcmp.lt.s32.totalorder %v4260_v12, 96  ;;  %vm7324_vm12 = vcmp.lt.s32.totalorder %v4260_v12, 98 }
 0x14e   : > { %1768 = vmatpush.msra.mxu0 %v738_v35 }
 0x14f   : > { %1811 = vmatpush.msra.mxu2 %v1522_v48  ;;  %v759_v48 = vperm.slane %v4630_v21, 1 }
 0x150   : > { %1222 = vrot.lane.b32.xlu1 %v4179_v0, %s7330_s19  ;;  %830 = vrot.lane.b32.xlu2 %v4179_v0, %s3964_s13  ;;  %s7344_s13 = smov 1  }
 0x151   : > { %1250 = vrot.lane.b32.xlu0 %v4179_v0, %s7332_s1  ;;  %v767_v43 = vmul.f32 %v759_v48, %v753_v17 }
 0x152   : > { %v4688_v40 = vpop.permute.xlu1 %1470  ;;  %v4690_v19 = vpop.permute.xlu2 %1246 }
 0x153   : > { %7467 = vst [vmem:[#allocation56_spill] sm:$0xff] %v4688_v40  ;;  %v4692_v35 = vpop.permute.xlu0 %772  ;;  %v1481_v31 = vsel %vm7296_vm8, %v4688_v40, %v4622_v24  ;;  %vm7312_vm8 = vcmp.lt.s32.totalorder %v4260_v12, 32  ;;  %v703_v40 = vperm.slane %v4707_v28, 1 }
 0x154   : > { %7468 = vst [vmem:[#allocation57_spill] sm:$0xff] %v4690_v19  ;;  %v781_v63 = vsel %vm778_vm14, %v4607_v53, %v4692_v35  ;;  %v1494_v20 = vmul.f32 %v1486_v51, %v1481_v31  ;;  %v1456_v31 = vld [vmem:[#allocation5 + $0x86] ss:$8 sm:$0xf] }
 0x155   : > { %v795_v57 = vmul.f32 %v787_v60, %v781_v63 }
 0x156   : > { %1812 = vmatpush.msra.mxu2 %v1494_v20 }
 0x157   : > { %1846 = vmatpush.msra.mxu3 %v795_v57 }
 0x158   : > { %1056 = vrot.lane.b32.xlu1 %v4188_v2, %s7344_s13  ;;  %1194 = vrot.lane.b32.xlu2 %v4179_v0, %s3982_s20 }
 0x159   : > { %1050 = vrot.lane.b32.xlu0 %v4182_v1, %s7344_s13  ;;  %1847 = vmatpush.msra.mxu3 %v767_v43  ;;  %v1458_v43 = vperm.slane %v1456_v31, 0  ;;  %v731_v31 = vperm.slane %v4655_v41, 1  ;;  %v4770_v41 = vld [vmem:[#allocation5 + $0x67] ss:$8 sm:$0xf] }
 0x15a   : > { %v4717_v60 = vpop.permute.xlu1 %692  ;;  %v4719_v53 = vpop.permute.xlu2 %1416 }
 0x15b   : > { %7470 = vst [vmem:[#allocation59_spill] sm:$0xff] %v4717_v60  ;;  %v687_v57 = vpop.permute.xlu0 %686 }
 0x15c   : > { %7471 = vst [vmem:[#allocation60_spill] sm:$0xff] %v4719_v53  ;;  %v698_v51 = vsel %vm7312_vm8, %v4717_v60, %v687_v57 }
 0x15d   : > { %v710_v48 = vmul.f32 %v702_v27, %v698_v51 }
 0x15f   : > { %1769 = vmatpush.msra.mxu0 %v710_v48  ;;  %v4741_v48 = vld [vmem:[#allocation5 + $0x21] ss:$8 sm:$0xf] }
 0x160   : > { %1022 = vrot.lane.b32.xlu1 %v4182_v1, %s7300_s25  ;;  %1028 = vrot.lane.b32.xlu2 %v4188_v2, %s7300_s25  ;;  %s3993_s25 = smov 77  }
 0x161   : > { %802 = vrot.lane.b32.xlu0 %v4179_v0, %s3966_s2  ;;  %s3994_s2 = smov 3  }
 0x162   : > { %v4731_v63 = vpop.permute.xlu1 %1444  ;;  %v4733_v17 = vpop.permute.xlu2 %688 }
 0x163   : > { %7472 = vst [vmem:[#allocation61_spill] sm:$0xff] %v4731_v63  ;;  %v4735_v20 = vpop.permute.xlu0 %1442  ;;  %v697_v60 = vsel %vm7312_vm8, %v687_v57, %v4733_v17  ;;  %vm1254_vm8 = vcmp.lt.s32.totalorder %v4260_v12, 112 }
 0x164   : > { %7473 = vst [vmem:[#allocation62_spill] sm:$0xff] %v4733_v17  ;;  %v1453_v27 = vsel %vm7311_vm10, %v4735_v20, %v4731_v63  ;;  %v711_v21 = vmul.f32 %v703_v40, %v697_v60  ;;  %vm7313_vm10 = vcmp.lt.s32.totalorder %v4260_v12, 97  ;;  %v562_v17 = vperm.slane %v4397_v10, 0 }
 0x165   : > { %7474 = vst [vmem:[#allocation63_spill] sm:$0xff] %v4735_v20  ;;  %v1466_v51 = vmul.f32 %v1458_v43, %v1453_v27  ;;  %v674_v20 = vperm.slane %v4741_v48, 0 }
 0x167   : > { %1813 = vmatpush.msra.mxu2 %v1466_v51 }
 0x168   : > { %1722 = vrot.lane.b32.xlu1 %v4182_v1, %s3993_s25  ;;  %1724 = vrot.lane.b32.xlu2 %v4191_v3, %s3993_s25 }
 0x169   : > { %1166 = vrot.lane.b32.xlu0 %v4179_v0, %s3984_s23 }
 0x16a   : > { %v4752_v43 = vpop.permute.xlu1 %716  ;;  %v4754_v27 = vpop.permute.xlu2 %1386 }
 0x16b   : > { %7475 = vst [vmem:[#allocation64_spill] sm:$0xff] %v4754_v27  ;;  %v4756_v51 = vpop.permute.xlu0 %664  ;;  %v725_v3 = vsel %vm7319_vm13, %v4666_v30, %v4752_v43  ;;  %v1430_v30 = vperm.slane %v1428_v54, 0  ;;  %vm1226_vm13 = vcmp.lt.s32.totalorder %v4260_v12, 113 }
 0x16c   : > { %7476 = vst [vmem:[#allocation65_spill] sm:$0xff] %v4756_v51  ;;  %v670_v63 = vsel %vm7325_vm9, %v4756_v51, %v4668_v39  ;;  %v739_v24 = vmul.f32 %v731_v31, %v725_v3 }
 0x16d   : > { %v682_v33 = vmul.f32 %v674_v20, %v670_v63  ;;  %v4795_v20 = vld [vmem:[#allocation5 + $0x20] ss:$8 sm:$0xf] }
 0x16e   : > { %1848 = vmatpush.msra.mxu3 %v739_v24  ;;  %v1262_v24 = vperm.slane %v4770_v41, 0  ;;  %v646_v31 = vperm.slane %v4795_v20, 0 }
 0x16f   : > { %1770 = vmatpush.msra.mxu0 %v682_v33 }
 0x170   : > { %994 = vrot.lane.b32.xlu1 %v4182_v1, %s3994_s2  ;;  %1000 = vrot.lane.b32.xlu2 %v4188_v2, %s3994_s2 }
 0x171   : > { %774 = vrot.lane.b32.xlu0 %v4179_v0, %s3968_s17  ;;  %1849 = vmatpush.msra.mxu3 %v711_v21  ;;  %s3995_s17 = smov 13  }
 0x172   : > { %v4781_v33 = vpop.permute.xlu1 %1414  ;;  %v4783_v40 = vpop.permute.xlu2 %1190 }
 0x173   : > { %7477 = vst [vmem:[#allocation66_spill] sm:$0xff] %v4781_v33  ;;  %v4785_v60 = vpop.permute.xlu0 %1248  ;;  %v1425_v57 = vsel %vm7313_vm10, %v4781_v33, %v4719_v53  ;;  %vm638_vm10 = vcmp.lt.s32.totalorder %v4260_v12, 34  ;;  %v586_v33 = vsel %vm582_vm6, %v4454_v56, %v4436_v37  ;;  %v4825_v53 = vld [vmem:[#allocation5 + $0x66] ss:$8 sm:$0xf] }
 0x174   : > { %7478 = vst [vmem:[#allocation67_spill] sm:$0xff] %v4783_v40  ;;  %v1257_v21 = vsel %vm1254_vm8, %v4690_v19, %v4785_v60  ;;  %v1438_v54 = vmul.f32 %v1430_v30, %v1425_v57  ;;  %v618_v57 = vperm.slane %v4465_v61, 0  ;;  %v590_v19 = vperm.slane %v4422_v29, 0 }
 0x175   : > { %v1270_v63 = vmul.f32 %v1262_v24, %v1257_v21 }
 0x176   : > { %1814 = vmatpush.msra.mxu2 %v1438_v54  ;;  %v614_v54 = vsel %vm610_vm7, %v4471_v14, %v4450_v49  ;;  %v558_v14 = vsel %vm554_vm5, %v4346_v45, %v4321_v36  ;;  %v598_v56 = vmul.f32 %v590_v19, %v586_v33  ;;  %v506_v19 = vperm.slane %v4335_v42, 0 }
 0x177   : > { %1784 = vmatpush.msra.mxu1 %v1270_v63  ;;  %v626_v51 = vmul.f32 %v618_v57, %v614_v54  ;;  %v1234_v57 = vperm.slane %v4825_v53, 0 }
 0x178   : > { %1252 = vrot.lane.b32.xlu1 %v4188_v2, %s7332_s1  ;;  %1698 = vrot.lane.b32.xlu2 %v4179_v0, %s3960_s29  ;;  %s7506_s1 = smov 83  }
 0x179   : > { %1138 = vrot.lane.b32.xlu0 %v4179_v0, %s3986_s7 }
 0x17a   : > { %v4805_v3 = vpop.permute.xlu1 %636  ;;  %v4807_v30 = vpop.permute.xlu2 %1360 }
 0x17b   : > { %7479 = vst [vmem:[#allocation68_spill] sm:$0xff] %v4805_v3  ;;  %v4809_v24 = vpop.permute.xlu0 %630 }
 0x17c   : > { %7480 = vst [vmem:[#allocation69_spill] sm:$0xff] %v4807_v30  ;;  %v642_v21 = vsel %vm638_vm10, %v4805_v3, %v4809_v24 }
 0x17d   : > { %v654_v63 = vmul.f32 %v646_v31, %v642_v21  ;;  %v534_v31 = vperm.slane %v4376_v55, 0 }
 0x17f   : > { %1771 = vmatpush.msra.mxu0 %v654_v63  ;;  %v502_v63 = vsel %vm498_vm3, %v4365_v52, %v4349_v46  ;;  %v446_v52 = vsel %vm442_vm1, %v4295_v25, %v4230_v4  ;;  %v419_v25 = vsel %vm415_vm0, %v4271_v15, %v4256_v9  ;;  %v1372_v15 = vld [vmem:[#allocation5 + $0x83] ss:$8 sm:$0xf] }
 0x180   : > { %746 = vrot.lane.b32.xlu1 %v4179_v0, %s3970_s21  ;;  %966 = vrot.lane.b32.xlu2 %v4182_v1, %s3995_s17  ;;  %v530_v1 = vsel %vm526_vm4, %v4382_v58, %v4363_v50  ;;  %v478_v58 = vperm.slane %v4310_v32, 0  ;;  %s7485_s21 = smov 31  }
 0x181   : > { %1700 = vrot.lane.b32.xlu0 %v4188_v2, %s3960_s29  ;;  %1772 = vmatpush.msra.mxu0 %v626_v51  ;;  %v570_v51 = vmul.f32 %v562_v17, %v558_v14  ;;  %v542_v3 = vmul.f32 %v534_v31, %v530_v1  ;;  %v474_v17 = vsel %vm470_vm2, %v4254_v8, %v4246_v6  ;;  %v1400_v14 = vld [vmem:[#allocation5 + $0x84] ss:$8 sm:$0xf]  ;;  %v675_v31 = vperm.slane %v4741_v48, 1  ;;  %s7484_s29 = smov 79  }
 0x182   : > { %v4841_v21 = vpop.permute.xlu1 %1220  ;;  %v4843_v54 = vpop.permute.xlu2 %1164  ;;  %v486_v8 = vmul.f32 %v478_v58, %v474_v17  ;;  %v4897_v58 = vld [vmem:[#allocation5 + $0x65] ss:$8 sm:$0xf]  ;;  %v1374_v17 = vperm.slane %v1372_v15, 0 }
 0x183   : > { %1773 = vmatpush.msra.mxu0 %v598_v56  ;;  %v4849_v45 = vpop.permute.xlu0 %1218  ;;  %v514_v56 = vmul.f32 %v506_v19, %v502_v63 }
 0x184   : > { %7481 = vst [vmem:[#allocation70_spill] sm:$0xff] %v4849_v45  ;;  %v1229_v33 = vsel %vm1226_vm13, %v4849_v45, %v4841_v21  ;;  %v450_v45 = vperm.slane %v4289_v22, 0 }
 0x185   : > { %1774 = vmatpush.msra.mxu0 %v570_v51  ;;  %v1242_v28 = vmul.f32 %v1234_v57, %v1229_v33 }
 0x186   : > { %v458_v1 = vmul.f32 %v450_v45, %v446_v52  ;;  %v4900_v45 = vld [vmem:[%s4164_s14 + $0x18] sm:$0xff] }
 0x187   : > { %1775 = vmatpush.msra.mxu0 %v542_v3  ;;  %1785 = vmatpush.msra.mxu1 %v1242_v28  ;;  %v422_v28 = vperm.slane %v4258_v11, 0 }
 0x188   : > { %1110 = vrot.lane.b32.xlu1 %v4179_v0, %s3988_s24  ;;  %1224 = vrot.lane.b32.xlu2 %v4188_v2, %s7330_s19  ;;  %v1402_v0 = vperm.slane %v1400_v14, 0  ;;  %v1206_v14 = vperm.slane %v4897_v58, 0  ;;  %s7495_s19 = smov 81  }
 0x189   : > { %972 = vrot.lane.b32.xlu0 %v4188_v2, %s3995_s17  ;;  %1776 = vmatpush.msra.mxu0 %v514_v56  ;;  %v430_v33 = vmul.f32 %v422_v28, %v419_v25 }
 0x18a   : > { %v4879_v3 = vpop.permute.xlu1 %660  ;;  %v4881_v57 = vpop.permute.xlu2 %1134 }
 0x18b   : > { %7482 = vst [vmem:[#allocation71_spill] sm:$0xff] %v4881_v57  ;;  %1777 = vmatpush.msra.mxu0 %v486_v8  ;;  %v4887_v2 = vpop.permute.xlu0 %1388  ;;  %v669_v11 = vsel %vm7325_vm9, %v4668_v39, %v4879_v3  ;;  %v4905_v39 = vld [vmem:[%s4164_s14 + $0x10] sm:$0xff]  ;;  %vm1198_vm9 = vcmp.lt.s32.totalorder %v4260_v12, 114 }
 0x18c   : > { %7483 = vst [vmem:[#allocation72_spill] sm:$0xff] %v4887_v2  ;;  %v1397_v51 = vsel %vm7324_vm12, %v4754_v27, %v4887_v2  ;;  %v683_v19 = vmul.f32 %v675_v31, %v669_v11  ;;  %vm7326_vm12 = vcmp.lt.s32.totalorder %v4260_v12, 99 }
 0x18d   : > { %1778 = vmatpush.msra.mxu0 %v458_v1  ;;  %v1410_v63 = vmul.f32 %v1402_v0, %v1397_v51  ;;  %v4928_v1 = vld [vmem:[#allocation5 + $0x64] ss:$8 sm:$0xf] }
 0x18e   : > { %1850 = vmatpush.msra.mxu3 %v683_v19  ;;  %v1178_v11 = vperm.slane %v4928_v1, 0  ;;  %v4937_v51 = vld [vmem:[%s4164_s14] sm:$0xff]  ;;  %v647_v19 = vperm.slane %v4795_v20, 1 }
 0x18f   : > { %1779 = vmatpush.msra.mxu0 %v430_v33  ;;  %1815 = vmatpush.msra.mxu2 %v1410_v63 }
 0x190   : > { %1672 = vrot.lane.b32.xlu1 %v4900_v45, %s7484_s29  ;;  %718 = vrot.lane.b32.xlu2 %v4905_v39, %s7485_s21  ;;  %s7490_s21 = smov 80  }
 0x191   : > { %1670 = vrot.lane.b32.xlu0 %v4905_v39, %s7484_s29  ;;  %s3996_s29 = smov 14  }
 0x192   : > { %v4914_v56 = vpop.permute.xlu1 %1358  ;;  %v4916_v52 = vpop.permute.xlu2 %1304 }
 0x193   : > { %7486 = vst [vmem:[#allocation73_spill] sm:$0xff] %v4914_v56  ;;  %v4918_v31 = vpop.permute.xlu0 %1192  ;;  %v1369_v8 = vsel %vm7326_vm12, %v4914_v56, %v4807_v30  ;;  %vm1170_vm12 = vcmp.lt.s32.totalorder %v4260_v12, 115 }
 0x194   : > { %7487 = vst [vmem:[#allocation74_spill] sm:$0xff] %v4916_v52  ;;  %v1201_v28 = vsel %vm1198_vm9, %v4783_v40, %v4918_v31  ;;  %v1382_v0 = vmul.f32 %v1374_v17, %v1369_v8  ;;  %v619_v17 = vperm.slane %v4465_v61, 1  ;;  %v591_v40 = vperm.slane %v4422_v29, 1 }
 0x195   : > { %v1214_v25 = vmul.f32 %v1206_v14, %v1201_v28  ;;  %v613_v28 = vsel %vm610_vm7, %v4450_v49, %v4384_v59  ;;  %v585_v61 = vsel %vm582_vm6, %v4436_v37, %v4431_v34  ;;  %v557_v59 = vsel %vm554_vm5, %v4321_v36, %v4413_v23 }
 0x196   : > { %1816 = vmatpush.msra.mxu2 %v1382_v0  ;;  %v627_v56 = vmul.f32 %v619_v17, %v613_v28  ;;  %v599_v29 = vmul.f32 %v591_v40, %v585_v61  ;;  %vm7337_vm6 = vcmp.lt.s32.totalorder %v4260_v12, 109  ;;  %v507_v40 = vperm.slane %v4335_v42, 1  ;;  %v5003_v17 = vld [vmem:[#allocation5 + $0x63] ss:$8 sm:$0xf] }
 0x197   : > { %1786 = vmatpush.msra.mxu1 %v1214_v25  ;;  %v473_v42 = vsel %vm470_vm2, %v4246_v6, %v4326_v38  ;;  %v844_v6 = vperm.slane %v4525_v16, 2  ;;  %vm7335_vm2 = vcmp.lt.s32.totalorder %v4260_v12, 110  ;;  %vm1058_vm5 = vcmp.lt.s32.totalorder %v4260_v12, 1 }
 0x198   : > { %944 = vrot.lane.b32.xlu1 %v4900_v45, %s3996_s29  ;;  %1082 = vrot.lane.b32.xlu2 %v4905_v39, %s3990_s18  ;;  %vm1030_vm7 = vcmp.lt.s32.totalorder %v4260_v12, 2 }
 0x199   : > { %938 = vrot.lane.b32.xlu0 %v4937_v51, %s3996_s29 }
 0x19a   : > { %v4942_v33 = vpop.permute.xlu1 %1162  ;;  %v4944_v63 = vpop.permute.xlu2 %1274 }
 0x19b   : > { %7488 = vst [vmem:[#allocation75_spill] sm:$0xff] %v4942_v33  ;;  %v4946_v15 = vpop.permute.xlu0 %632  ;;  %v1173_v14 = vsel %vm1170_vm12, %v4942_v33, %v4843_v54  ;;  %v1344_v33 = vld [vmem:[#allocation5 + $0x82] ss:$8 sm:$0xf] }
 0x19c   : > { %7489 = vst [vmem:[#allocation76_spill] sm:$0xff] %v4944_v63  ;;  %v641_v8 = vsel %vm638_vm10, %v4809_v24, %v4946_v15  ;;  %v1186_v0 = vmul.f32 %v1178_v11, %v1173_v14  ;;  %v563_v24 = vperm.slane %v4397_v10, 1  ;;  %v1346_v34 = vperm.slane %v1344_v33, 0 }
 0x19d   : > { %v655_v25 = vmul.f32 %v647_v19, %v641_v8  ;;  %v535_v10 = vperm.slane %v4376_v55, 1  ;;  %v529_v11 = vsel %vm526_vm4, %v4363_v50, %v4297_v26  ;;  %v479_v26 = vperm.slane %v4310_v32, 1  ;;  %v1316_v50 = vld [vmem:[#allocation5 + $0x81] ss:$8 sm:$0xf] }
 0x19e   : > { %1787 = vmatpush.msra.mxu1 %v1186_v0  ;;  %v571_v23 = vmul.f32 %v563_v24, %v557_v59  ;;  %v451_v8 = vperm.slane %v4289_v22, 1  ;;  %v445_v32 = vsel %vm442_vm1, %v4230_v4, %v4238_v5  ;;  %v1318_v38 = vperm.slane %v1316_v50, 0 }
 0x19f   : > { %1851 = vmatpush.msra.mxu3 %v655_v25  ;;  %v543_v33 = vmul.f32 %v535_v10, %v529_v11  ;;  %v487_v22 = vmul.f32 %v479_v26, %v473_v42  ;;  %v418_v4 = vsel %vm415_vm0, %v4256_v9, %v4276_v18  ;;  %v5042_v10 = vld [vmem:[#allocation5 + $0x62] ss:$8 sm:$0xf]  ;;  %vm1114_vm0 = vcmp.lt.s32.totalorder %v4260_v12, 126 }
 0x1a0   : > { %1642 = vrot.lane.b32.xlu1 %v4905_v39, %s7490_s21  ;;  %1644 = vrot.lane.b32.xlu2 %v4900_v45, %s7490_s21  ;;  %s7493_s21 = smov 32   ;;  %v459_v16 = vmul.f32 %v451_v8, %v445_v32  ;;  %vm7358_vm1 = vcmp.lt.s32.totalorder %v4260_v12, 127  ;;  %vm7334_vm4 = vcmp.lt.s32.totalorder %v4260_v12, 111 }
 0x1a1   : > { %1196 = vrot.lane.b32.xlu0 %v4900_v45, %s3982_s20  ;;  %1852 = vmatpush.msra.mxu3 %v627_v56  ;;  %v501_v56 = vsel %vm498_vm3, %v4349_v46, %v4344_v44  ;;  %s3997_s20 = smov 15   ;;  %vm1142_vm3 = vcmp.lt.s32.totalorder %v4260_v12, 125  ;;  %v1150_v44 = vperm.slane %v5003_v17, 0  ;;  %v3708_v46 = vld [vmem:[#allocation5] ss:$8 sm:$0xf] }
 0x1a2   : > { %v4979_v37 = vpop.permute.xlu1 %1332  ;;  %v4981_v49 = vpop.permute.xlu2 %1080  ;;  %v515_v14 = vmul.f32 %v507_v40, %v501_v56  ;;  %v423_v28 = vperm.slane %v3708_v46, 1  ;;  %v1263_v46 = vperm.slane %v4770_v41, 1 }
 0x1a3   : > { %7491 = vst [vmem:[#allocation77_spill] sm:$0xff] %v4979_v37  ;;  %1853 = vmatpush.msra.mxu3 %v599_v29  ;;  %v4987_v36 = vpop.permute.xlu0 %1330 }
 0x1a4   : > { %7492 = vst [vmem:[#allocation78_spill] sm:$0xff] %v4987_v36  ;;  %v1341_v55 = vsel %vm7337_vm6, %v4987_v36, %v4979_v37  ;;  %vm7515_vm6 = vcmp.lt.s32.totalorder %v4260_v12, 30 }
 0x1a5   : > { %1854 = vmatpush.msra.mxu3 %v571_v23  ;;  %v1354_v19 = vmul.f32 %v1346_v34, %v1341_v55  ;;  %v431_v34 = vmul.f32 %v423_v28, %v418_v4 }
 0x1a7   : > { %1817 = vmatpush.msra.mxu2 %v1354_v19  ;;  %1855 = vmatpush.msra.mxu3 %v543_v33  ;;  %v5062_v19 = vld [vmem:[#allocation5 + $0x61] ss:$8 sm:$0xf]  ;;  %v1288_v33 = vld [vmem:[#allocation5 + $0x80] ss:$8 sm:$0xf] }
 0x1a8   : > { %910 = vrot.lane.b32.xlu1 %v4937_v51, %s3997_s20  ;;  %916 = vrot.lane.b32.xlu2 %v4900_v45, %s3997_s20  ;;  %v1094_v26 = vperm.slane %v5062_v19, 0  ;;  %v1290_v50 = vperm.slane %v1288_v33, 0 }
 0x1a9   : > { %690 = vrot.lane.b32.xlu0 %v4905_v39, %s7493_s21  ;;  %1856 = vmatpush.msra.mxu3 %v515_v14 }
 0x1aa   : > { %v5020_v0 = vpop.permute.xlu1 %1302  ;;  %v5022_v25 = vpop.permute.xlu2 %830 }
 0x1ab   : > { %7494 = vst [vmem:[#allocation79_spill] sm:$0xff] %v5020_v0  ;;  %1857 = vmatpush.msra.mxu3 %v487_v22  ;;  %v5028_v5 = vpop.permute.xlu0 %1136  ;;  %v836_v61 = vsel %vm834_vm11, %v4537_v62, %v5022_v25  ;;  %v1313_v24 = vsel %vm7335_vm2, %v5020_v0, %v4916_v52  ;;  %v1122_v62 = vperm.slane %v5042_v10, 0  ;;  %vm7338_vm2 = vcmp.lt.s32.totalorder %v4260_v12, 3  ;;  %v7531_v52 = vld [vmem:[#allocation62_spill] sm:$0xff] }
 0x1ac   : > { %v1145_v59 = vsel %vm1142_vm3, %v4881_v57, %v5028_v5  ;;  %v852_v9 = vmul.f32 %v844_v6, %v836_v61  ;;  %v1326_v18 = vmul.f32 %v1318_v38, %v1313_v24  ;;  %v1235_v24 = vperm.slane %v4825_v53, 1 }
 0x1ad   : > { %1858 = vmatpush.msra.mxu3 %v459_v16  ;;  %v1158_v29 = vmul.f32 %v1150_v44, %v1145_v59  ;;  %v5088_v44 = vld [vmem:[%s4164_s14 + $0x8] sm:$0xff] }
 0x1ae   : > { %1818 = vmatpush.msra.mxu2 %v1326_v18  ;;  %v1207_v18 = vperm.slane %v4897_v58, 1 }
 0x1af   : > { %1788 = vmatpush.msra.mxu1 %v1158_v29  ;;  %1859 = vmatpush.msra.mxu3 %v431_v34  ;;  %v5114_v29 = vld [vmem:[#allocation5 + $0x47] ss:$8 sm:$0xf] }
 0x1b0   : > { %1614 = vrot.lane.b32.xlu1 %v4905_v39, %s7495_s19  ;;  %1616 = vrot.lane.b32.xlu2 %v4900_v45, %s7495_s19  ;;  %s7497_s19 = smov 33  }
 0x1b1   : > { %1924 = vmatpush.msrb.mxu3 %v852_v9  ;;  %1168 = vrot.lane.b32.xlu0 %v4900_v45, %s3984_s23  ;;  %s3998_s23 = smov 16  }
 0x1b2   : > { %v5052_v11 = vpop.permute.xlu1 %1108  ;;  %v5054_v23 = vpop.permute.xlu2 %1194 }
 0x1b3   : > { %v5056_v40 = vpop.permute.xlu0 %1106  ;;  %v1200_v34 = vsel %vm1198_vm9, %v4918_v31, %v5054_v23 }
 0x1b4   : > { %7496 = vst [vmem:[#allocation80_spill] sm:$0xff] %v5056_v40  ;;  %v1117_v55 = vsel %vm1114_vm0, %v5056_v40, %v5052_v11  ;;  %v1215_v31 = vmul.f32 %v1207_v18, %v1200_v34 }
 0x1b5   : > { %v1130_v56 = vmul.f32 %v1122_v62, %v1117_v55 }
 0x1b7   : > { %1789 = vmatpush.msra.mxu1 %v1130_v56 }
 0x1b8   : > { %662 = vrot.lane.b32.xlu1 %v4905_v39, %s7497_s19  ;;  %882 = vrot.lane.b32.xlu2 %v4937_v51, %s3998_s23  ;;  %s7502_s19 = smov 34  }
 0x1b9   : > { %1726 = vrot.lane.b32.xlu0 %v4905_v39, %s3993_s25 }
 0x1ba   : > { %v5073_v42 = vpop.permute.xlu1 %1078  ;;  %v5075_v14 = vpop.permute.xlu2 %1028 }
 0x1bb   : > { %7498 = vst [vmem:[#allocation81_spill] sm:$0xff] %v5073_v42  ;;  %v5077_v8 = vpop.permute.xlu0 %1276  ;;  %v1089_v32 = vsel %vm7358_vm1, %v5073_v42, %v4981_v49 }
 0x1bc   : > { %7499 = vst [vmem:[#allocation82_spill] sm:$0xff] %v5075_v14  ;;  %v1285_v6 = vsel %vm7334_vm4, %v4944_v63, %v5077_v8  ;;  %v1102_v38 = vmul.f32 %v1094_v26, %v1089_v32  ;;  %vm1730_vm4 = vcmp.lt.s32.totalorder %v4260_v12, 77 }
 0x1bd   : > { %7500 = vst [vmem:[#allocation83_spill] sm:$0xff] %v5077_v8  ;;  %v1298_v22 = vmul.f32 %v1290_v50, %v1285_v6  ;;  %v5138_v50 = vld [vmem:[#allocation5 + $0x46] ss:$8 sm:$0xf]  ;;  %v816_v6 = vperm.slane %v4568_v47, 2 }
 0x1be   : > { %1790 = vmatpush.msra.mxu1 %v1102_v38  ;;  %v1038_v32 = vperm.slane %v5138_v50, 0 }
 0x1bf   : > { %1819 = vmatpush.msra.mxu2 %v1298_v22 }
 0x1c0   : > { %1052 = vrot.lane.b32.xlu1 %v5088_v44, %s7344_s13  ;;  %1791 = vmatpush.msra.mxu1 %v4937_v51 }
 0x1c1   : > { %1140 = vrot.lane.b32.xlu2 %v4900_v45, %s3986_s7  ;;  %888 = vrot.lane.b32.xlu0 %v4900_v45, %s3998_s23  ;;  %s7501_s7 = smov 82  }
 0x1c2   : > { %v5098_v28 = vpop.permute.xlu1 %1222  ;;  %v5100_v4 = vpop.permute.xlu2 %1724 }
 0x1c3   : > { %v5102_v16 = vpop.permute.xlu0 %1250  ;;  %v1228_v9 = vsel %vm1226_vm13, %v4841_v21, %v5098_v28  ;;  %v1066_v21 = vperm.slane %v5114_v29, 0 }
 0x1c4   : > { %v1256_v61 = vsel %vm1254_vm8, %v4785_v60, %v5102_v16  ;;  %v1243_v60 = vmul.f32 %v1235_v24, %v1228_v9  ;;  %v5163_v9 = vld [vmem:[#allocation5 + $0xc0] ss:$8 sm:$0xf] }
 0x1c5   : > { %v1271_v59 = vmul.f32 %v1263_v46, %v1256_v61  ;;  %v1738_v47 = vperm.slane %v5163_v9, 0 }
 0x1c7   : > { %1864 = vmatpush.msrb.mxu0 %v1271_v59 }
 0x1c8   : > { %1588 = vrot.lane.b32.xlu1 %v4900_v45, %s7501_s7 }
 0x1c9   : > { %634 = vrot.lane.b32.xlu2 %v4905_v39, %s7502_s19  ;;  %1586 = vrot.lane.b32.xlu0 %v4905_v39, %s7501_s7  ;;  %s3999_s7 = smov 17   ;;  %s7505_s19 = smov 2  }
 0x1ca   : > { %1865 = vmatpush.msrb.mxu0 %v1243_v60  ;;  %v5128_v62 = vpop.permute.xlu1 %1056  ;;  %v5130_v55 = vpop.permute.xlu2 %1000 }
 0x1cb   : > { %7503 = vst [vmem:[#allocation84_spill] sm:$0xff] %v5128_v62  ;;  %v5132_v56 = vpop.permute.xlu0 %1050 }
 0x1cc   : > { %7504 = vst [vmem:[#allocation85_spill] sm:$0xff] %v5130_v55  ;;  %1866 = vmatpush.msrb.mxu0 %v1215_v31  ;;  %v1062_v33 = vsel %vm1058_vm5, %v5128_v62, %v5132_v56  ;;  %v5252_v62 = vld [vmem:[#allocation5 + $0x44] ss:$8 sm:$0xf] }
 0x1cd   : > { %v1074_v26 = vmul.f32 %v1066_v21, %v1062_v33 }
 0x1cf   : > { %1792 = vmatpush.msra.mxu1 %v1074_v26 }
 0x1d0   : > { %860 = vrot.lane.b32.xlu1 %v4900_v45, %s3999_s7 }
 0x1d1   : > { %1024 = vrot.lane.b32.xlu2 %v5088_v44, %s7505_s19  ;;  %854 = vrot.lane.b32.xlu0 %v4937_v51, %s3999_s7 }
 0x1d2   : > { %v5149_v38 = vpop.permute.xlu1 %1022  ;;  %v5151_v22 = vpop.permute.xlu2 %1698 }
 0x1d3   : > { %v5153_v46 = vpop.permute.xlu0 %802  ;;  %v1034_v61 = vsel %vm1030_vm7, %v5075_v14, %v5149_v38 }
 0x1d4   : > { %v808_v24 = vsel %vm806_vm15, %v4641_v13, %v5153_v46  ;;  %v1046_v59 = vmul.f32 %v1038_v32, %v1034_v61  ;;  %v1179_v13 = vperm.slane %v4928_v1, 1  ;;  %v5188_v32 = vld [vmem:[#allocation5 + $0x45] ss:$8 sm:$0xf] }
 0x1d5   : > { %v824_v51 = vmul.f32 %v816_v6, %v808_v24  ;;  %v1010_v6 = vperm.slane %v5188_v32, 0 }
 0x1d6   : > { %1793 = vmatpush.msra.mxu1 %v1046_v59 }
 0x1d7   : > { %1925 = vmatpush.msrb.mxu3 %v824_v51 }
 0x1d8   : > { %1558 = vrot.lane.b32.xlu1 %v4905_v39, %s7506_s1 }
 0x1d9   : > { %1560 = vrot.lane.b32.xlu2 %v4900_v45, %s7506_s1  ;;  %1112 = vrot.lane.b32.xlu0 %v4900_v45, %s3988_s24  ;;  %s7508_s1 = smov 93   ;;  %s7509_s24 = smov 94  }
 0x1da   : > { %v5174_v18 = vpop.permute.xlu1 %1722  ;;  %v5176_v34 = vpop.permute.xlu2 %966 }
 0x1db   : > { %7507 = vst [vmem:[#allocation86_spill] sm:$0xff] %v5174_v18  ;;  %v5178_v60 = vpop.permute.xlu0 %1166  ;;  %v1733_v21 = vsel %vm1730_vm4, %v5174_v18, %v5100_v4 }
 0x1dc   : > { %v1172_v31 = vsel %vm1170_vm12, %v4843_v54, %v5178_v60  ;;  %v1746_v33 = vmul.f32 %v1738_v47, %v1733_v21  ;;  %v788_v54 = vperm.slane %v4593_v7, 2  ;;  %v1151_v7 = vperm.slane %v5003_v17, 1 }
 0x1dd   : > { %v1187_v26 = vmul.f32 %v1179_v13, %v1172_v31 }
 0x1de   : > { %1839 = vmatpush.msrb.mxu2 %v1746_v33 }
 0x1df   : > { %1867 = vmatpush.msrb.mxu0 %v1187_v26 }
 0x1e0   : > { %1084 = vrot.lane.b32.xlu1 %v4900_v45, %s3990_s18 }
 0x1e1   : > { %1530 = vrot.lane.b32.xlu2 %v4905_v39, %s7508_s1  ;;  %996 = vrot.lane.b32.xlu0 %v5088_v44, %s3994_s2 }
 0x1e2   : > { %v5199_v61 = vpop.permute.xlu1 %994  ;;  %v5201_v24 = vpop.permute.xlu2 %1224 }
 0x1e3   : > { %v5203_v59 = vpop.permute.xlu0 %774  ;;  %v1006_v51 = vsel %vm7338_vm2, %v5130_v55, %v5199_v61  ;;  %vm7516_vm2 = vcmp.lt.s32.totalorder %v4260_v12, 31 }
 0x1e4   : > { %v780_v47 = vsel %vm778_vm14, %v4692_v35, %v5203_v59  ;;  %v1018_v13 = vmul.f32 %v1010_v6, %v1006_v51 }
 0x1e5   : > { %v796_v21 = vmul.f32 %v788_v54, %v780_v47  ;;  %v7511_v54 = vld [vmem:[#allocation51_spill] sm:$0xff] }
 0x1e6   : > { %1794 = vmatpush.msra.mxu1 %v1018_v13  ;;  %v760_v51 = vperm.slane %v7511_v54, 2 }
 0x1e7   : > { %1926 = vmatpush.msrb.mxu3 %v796_v21  ;;  %v7512_v21 = vld [vmem:[#allocation54_spill] sm:$0xff] }
 0x1e8   : > { %968 = vrot.lane.b32.xlu1 %v5088_v44, %s3995_s17  ;;  %v732_v55 = vperm.slane %v7512_v21, 2  ;;  %v1123_v21 = vperm.slane %v5042_v10, 1 }
 0x1e9   : > { %1502 = vrot.lane.b32.xlu2 %v4905_v39, %s7509_s24  ;;  %1532 = vrot.lane.b32.xlu0 %v4900_v45, %s7508_s1  ;;  %s7517_s1 = smov 95  }
 0x1ea   : > { %v5220_v31 = vpop.permute.xlu1 %1252  ;;  %v5222_v33 = vpop.permute.xlu2 %718 }
 0x1eb   : > { %7510 = vst [vmem:[#allocation87_spill] sm:$0xff] %v5220_v31  ;;  %v5224_v35 = vpop.permute.xlu0 %1138 }
 0x1ec   : > { %v1144_v26 = vsel %vm1142_vm3, %v5028_v5, %v5224_v35 }
 0x1ed   : > { %v1159_v6 = vmul.f32 %v1151_v7, %v1144_v26  ;;  %v7514_v7 = vld [vmem:[#allocation52_spill] sm:$0xff] }
 0x1ef   : > { %1868 = vmatpush.msrb.mxu0 %v1159_v6  ;;  %v724_v6 = vsel %vm7516_vm2, %v4752_v43, %v5222_v33  ;;  %v982_v43 = vperm.slane %v5252_v62, 0  ;;  %vm7349_vm2 = vcmp.lt.s32.totalorder %v4260_v12, 14 }
 0x1f0   : > { %940 = vrot.lane.b32.xlu1 %v5088_v44, %s3996_s29  ;;  %v740_v14 = vmul.f32 %v732_v55, %v724_v6 }
 0x1f1   : > { %1054 = vrot.lane.b32.xlu2 %v4905_v39, %s7344_s13  ;;  %1504 = vrot.lane.b32.xlu0 %v4900_v45, %s7509_s24  ;;  %s7520_s24 = smov 96   ;;  %s7536_s13 = smov 110  }
 0x1f2   : > { %v5237_v47 = vpop.permute.xlu1 %746  ;;  %v5239_v13 = vpop.permute.xlu2 %1082 }
 0x1f3   : > { %v5242_v5 = vpop.permute.xlu0 %1700  ;;  %v752_v26 = vsel %vm7515_vm6, %v7514_v7, %v5237_v47  ;;  %vm7347_vm6 = vcmp.lt.s32.totalorder %v4260_v12, 13  ;;  %v1095_v7 = vperm.slane %v5062_v19, 1  ;;  %v1088_v6 = vsel %vm7358_vm1, %v4981_v49, %v5239_v13 }
 0x1f4   : > { %7513 = vst [vmem:[#allocation51_spill] sm:$0xff] %v5242_v5  ;;  %v768_v54 = vmul.f32 %v760_v51, %v752_v26  ;;  %vm7532_vm1 = vcmp.lt.s32.totalorder %v4260_v12, 32 }
 0x1f5   : > { %v1103_v57 = vmul.f32 %v1095_v7, %v1088_v6 }
 0x1f6   : > { %1927 = vmatpush.msrb.mxu3 %v768_v54 }
 0x1f8   : > { %1476 = vrot.lane.b32.xlu1 %v4900_v45, %s7517_s1  ;;  %1928 = vmatpush.msrb.mxu3 %v740_v14 }
 0x1f9   : > { %912 = vrot.lane.b32.xlu2 %v5088_v44, %s3997_s20  ;;  %1474 = vrot.lane.b32.xlu0 %v4905_v39, %s7517_s1  ;;  %s3504_s1 = sshll.u32 %s4160_s27, 7 }
 0x1fa   : > { %v5263_v51 = vpop.permute.xlu1 %1110  ;;  %v5265_v55 = vpop.permute.xlu2 %1644 }
 0x1fb   : > { %7518 = vst [vmem:[#allocation54_spill] sm:$0xff] %v5265_v55  ;;  %v5268_v26 = vpop.permute.xlu0 %972  ;;  %v1116_v14 = vsel %vm1114_vm0, %v5052_v11, %v5263_v51  ;;  %v648_v55 = vperm.slane %v4795_v20, 2 }
 0x1fc   : > { %7519 = vst [vmem:[#allocation52_spill] sm:$0xff] %v5268_v26  ;;  %v978_v54 = vsel %vm7347_vm6, %v5268_v26, %v5176_v34  ;;  %v1131_v42 = vmul.f32 %v1123_v21, %v1116_v14  ;;  %v5324_v26 = vld [vmem:[%s7229_s3 + $0x18] sm:$0xff]  ;;  %vm7369_vm6 = vcmask 64512  }
 0x1fd   : > { %v990_v40 = vmul.f32 %v982_v43, %v978_v54  ;;  %7527 = vst [vmem:[#allocation93_spill] sm:$0xff] %v5324_v26 }
 0x1fe   : > { %1869 = vmatpush.msrb.mxu0 %v1131_v42 }
 0x1ff   : > { %1795 = vmatpush.msra.mxu1 %v990_v40  ;;  %v5298_v40 = vld [vmem:[%s7229_s3 + $0x10] sm:$0xff] }
 0x200   : > { %1446 = vrot.lane.b32.xlu1 %v4905_v39, %s7520_s24  ;;  %1870 = vmatpush.msrb.mxu0 %v1103_v57  ;;  %7523 = vst [vmem:[#allocation90_spill] sm:$0xff] %v5298_v40  ;;  %v5301_v57 = vld [vmem:[#allocation5 + $0x43] ss:$8 sm:$0xf] }
 0x201   : > { %1448 = vrot.lane.b32.xlu2 %v4900_v45, %s7520_s24  ;;  %1026 = vrot.lane.b32.xlu0 %v4905_v39, %s7505_s19  ;;  %s7524_s19 = smov 97   ;;  %v954_v42 = vperm.slane %v5301_v57, 0  ;;  %s7528_s24 = smov 98  }
 0x202   : > { %v5288_v49 = vpop.permute.xlu1 %1672  ;;  %v5290_v11 = vpop.permute.xlu2 %916  ;;  %1871 = vmatpush.msrb.mxu0 %v5088_v44  ;;  %1820 = vmatmul.f32.vlgmr.msra.gmra.mxu2 %v5298_v40 }
 0x203   : > { %7521 = vst [vmem:[#allocation88_spill] sm:$0xff] %v5288_v49  ;;  %v5293_v21 = vpop.permute.xlu0 %1670  ;;  %v1236_v49 = vperm.slane %v4825_v53, 2 }
 0x204   : > { %7522 = vst [vmem:[#allocation89_spill] sm:$0xff] %v5290_v11 }
 0x208   : > { %998 = vrot.lane.b32.xlu1 %v4905_v39, %s3994_s2  ;;  %s7541_s2 = smov 111  }
 0x209   : > { %1418 = vrot.lane.b32.xlu2 %v4905_v39, %s7524_s19  ;;  %884 = vrot.lane.b32.xlu0 %v5088_v44, %s3998_s23 }
 0x20a   : > { %v5311_v43 = vpop.permute.xlu1 %944  ;;  %v5313_v7 = vpop.permute.xlu2 %1616  ;;  %3505 = vmatmul.msk.f32.vlgmr.msrb.gmra.mxu2 %vm7369_vm6, %v5324_v26 }
 0x20b   : > { %7525 = vst [vmem:[#allocation91_spill] sm:$0xff] %v5311_v43  ;;  %v5315_v14 = vpop.permute.xlu0 %938 }
 0x20c   : > { %7526 = vst [vmem:[#allocation92_spill] sm:$0xff] %v5313_v7  ;;  %v950_v6 = vsel %vm7349_vm2, %v5311_v43, %v5315_v14  ;;  %v5340_v43 = vld [vmem:[#allocation5 + $0x42] ss:$8 sm:$0xf]  ;;  %vm918_vm2 = vcmp.lt.s32.totalorder %v4260_v12, 15 }
 0x20d   : > { %v962_v54 = vmul.f32 %v954_v42, %v950_v6  ;;  %v926_v18 = vperm.slane %v5340_v43, 0 }
 0x20f   : > { %1796 = vmatpush.msra.mxu1 %v962_v54 }
 0x210   : > { %856 = vrot.lane.b32.xlu1 %v5088_v44, %s3999_s7  ;;  %v7529_v44 = vld [vmem:[#allocation58_spill] sm:$0xff] }
 0x211   : > { %970 = vrot.lane.b32.xlu2 %v4905_v39, %s3995_s17  ;;  %1420 = vrot.lane.b32.xlu0 %v4900_v45, %s7524_s19  ;;  %v704_v40 = vperm.slane %v7529_v44, 2  ;;  %s7533_s17 = smov 99   ;;  %s7534_s19 = smov 109  }
 0x212   : > { %v5334_v42 = vpop.permute.xlu1 %1642  ;;  %v5336_v6 = vpop.permute.xlu2 %882 }
 0x213   : > { %v5338_v54 = vpop.permute.xlu0 %1196 }
 0x214   : > { %v1199_v53 = vsel %vm1198_vm9, %v5054_v23, %v5338_v54 }
 0x218   : > { %1392 = vrot.lane.b32.xlu1 %v4900_v45, %s7528_s24 }
 0x219   : > { %942 = vrot.lane.b32.xlu2 %v4905_v39, %s3996_s29  ;;  %1390 = vrot.lane.b32.xlu0 %v4905_v39, %s7528_s24  ;;  %s3539_s24 = sshll.u32 %s4077_s16, 7 }
 0x21a   : > { %v5351_v8 = vpop.permute.xlu1 %910 }
 0x21b   : > { %v5353_v63 = vpop.permute.xlu2 %1140  ;;  %v5355_v0 = vpop.permute.xlu0 %690  ;;  %v922_v36 = vsel %vm918_vm2, %v5290_v11, %v5351_v8 }
 0x21c   : > { %7530 = vst [vmem:[#allocation58_spill] sm:$0xff] %v5353_v63  ;;  %v696_v27 = vsel %vm7532_vm1, %v7531_v52, %v5355_v0  ;;  %v934_v44 = vmul.f32 %v926_v18, %v922_v36  ;;  %v676_v52 = vperm.slane %v4741_v48, 2  ;;  %v1264_v36 = vperm.slane %v4770_v41, 2 }
 0x21d   : > { %v712_v37 = vmul.f32 %v704_v40, %v696_v27  ;;  %v5380_v27 = vld [vmem:[%s7229_s3] sm:$0xff]  ;;  %v1255_v40 = vsel %vm1254_vm8, %v5102_v16, %v5220_v31  ;;  %vm7535_vm1 = vcmp.lt.s32.totalorder %v4260_v12, 33  ;;  %v1227_v16 = vsel %vm1226_vm13, %v5098_v28, %v5201_v24 }
 0x21e   : > { %1797 = vmatpush.msra.mxu1 %v934_v44  ;;  %1860 = vmatmul.f32.vlgmr.msra.gmra.mxu3 %v5380_v27  ;;  %v1272_v5 = vmul.f32 %v1264_v36, %v1255_v40  ;;  %v1244_v28 = vmul.f32 %v1236_v49, %v1227_v16  ;;  %v7538_v36 = vld [vmem:[#allocation33_spill] sm:$0xff] }
 0x21f   : > { %1929 = vmatpush.msrb.mxu3 %v712_v37  ;;  %1780 = vmatmul.f32.vlgmr.msra.gmra.mxu0 %v5380_v27  ;;  %v1739_v37 = vperm.slane %v5163_v9, 1  ;;  %v7539_v16 = vld [vmem:[#allocation29_spill] sm:$0xff] }
 0x220   : > { %1364 = vrot.lane.b32.xlu1 %v4900_v45, %s7533_s17 }
 0x221   : > { %914 = vrot.lane.b32.xlu2 %v4905_v39, %s3997_s20  ;;  %1362 = vrot.lane.b32.xlu0 %v4905_v39, %s7533_s17 }
 0x222   : > { %v5371_v30 = vpop.permute.xlu1 %1614 }
 0x223   : > { %v5373_v11 = vpop.permute.xlu2 %634  ;;  %v5375_v2 = vpop.permute.xlu0 %1168 }
 0x228   : > { %1336 = vrot.lane.b32.xlu1 %v4900_v45, %s7534_s19 }
 0x229   : > { %886 = vrot.lane.b32.xlu2 %v4905_v39, %s3998_s23  ;;  %1334 = vrot.lane.b32.xlu0 %v4905_v39, %s7534_s19  ;;  %s7129_s19 = scalar_lea.vmem [#allocation10], %s3504_s1 }
 0x22a   : > { %v5393_v18 = vpop.permute.xlu1 %662  ;;  %s3385_s16 = sshll.u32 %s7129_s19, 4  ;;  %s3386_s16 = int_to_ptr.vmem [resolvable:$true] %s3385_s16 }
 0x22b   : > { %v5399_v44 = vpop.permute.xlu2 %1024  ;;  %v5401_v48 = vpop.permute.xlu0 %1726  ;;  %v668_v7 = vsel %vm7535_vm1, %v4879_v3, %v5393_v18  ;;  %v640_v3 = vsel %vm638_vm10, %v4946_v15, %v5373_v11  ;;  %v1180_v15 = vperm.slane %v4928_v1, 2  ;;  %vm890_vm1 = vcmp.lt.s32.totalorder %v4260_v12, 16 }
 0x22c   : > { %v1732_v41 = vsel %vm1730_vm4, %v5100_v4, %v5401_v48  ;;  %v684_v9 = vmul.f32 %v676_v52, %v668_v7  ;;  %v1208_v4 = vperm.slane %v4897_v58, 2  ;;  %v5422_v7 = vld [vmem:[#allocation5 + $0x41] ss:$8 sm:$0xf]  ;;  %v656_v20 = vmul.f32 %v648_v55, %v640_v3 }
 0x22d   : > { %v1747_v31 = vmul.f32 %v1739_v37, %v1732_v41  ;;  %v1067_v52 = vperm.slane %v5114_v29, 1  ;;  %v1171_v58 = vsel %vm1170_vm12, %v5178_v60, %v5375_v2  ;;  %v898_v23 = vperm.slane %v5422_v7, 0 }
 0x22e   : > { %1930 = vmatpush.msrb.mxu3 %v684_v9  ;;  %v1143_v60 = vsel %vm1142_vm3, %v5224_v35, %v5353_v63  ;;  %v1039_v41 = vperm.slane %v5138_v50, 1  ;;  %v5581_v63 = vld [vmem:[#allocation5 + $0xa2] ss:$8 sm:$0xf] }
 0x22f   : > { %1919 = vmatpush.msra.mxu2 %v1747_v31  ;;  %v1216_v31 = vmul.f32 %v1208_v4, %v1199_v53  ;;  %v7540_v4 = vld [vmem:[#allocation27_spill] sm:$0xff] }
 0x230   : > { %1308 = vrot.lane.b32.xlu1 %v4900_v45, %s7536_s13  ;;  %1931 = vmatpush.msrb.mxu3 %v656_v20  ;;  %v7542_v20 = vld [vmem:[#allocation23_spill] sm:$0xff] }
 0x231   : > { %1944 = vmatpush.msrb.mxu2 %v1272_v5  ;;  %858 = vrot.lane.b32.xlu2 %v4905_v39, %s3999_s7  ;;  %v1152_v5 = vperm.slane %v5003_v17, 2  ;;  %v1188_v17 = vmul.f32 %v1180_v15, %v1171_v58  ;;  %v3710_v58 = vld [vmem:[#allocation5 + $0x27] ss:$8 sm:$0xf] }
 0x232   : > { %1306 = vrot.lane.b32.xlu0 %v4905_v39, %s7536_s13  ;;  %v5442_v1 = vpop.permute.xlu1 %1052  ;;  %3506 = vmatmul.msk.f32.vlgmr.msra.gmra.mxu2 %vm7369_vm6, %v5324_v26  ;;  %vm862_vm6 = vcmp.lt.s32.totalorder %v4260_v12, 17  ;;  %s7695_s13 = smov 113  }
 0x233   : > { %1945 = vmatpush.msrb.mxu2 %v1244_v28  ;;  %v5449_v55 = vpop.permute.xlu2 %1560  ;;  %v5451_v49 = vpop.permute.xlu0 %888  ;;  %v1061_v37 = vsel %vm1058_vm5, %v5132_v56, %v5442_v1  ;;  %1932 = vmatpush.msrb.mxu3 %v7538_v36  ;;  %v1033_v56 = vsel %vm1030_vm7, %v5149_v38, %v5399_v44  ;;  %v1160_v3 = vmul.f32 %v1152_v5, %v1143_v60  ;;  %v7544_v5 = vld [vmem:[#allocation32_spill] sm:$0xff] }
 0x234   : > { %7537 = vst [vmem:[#allocation62_spill] sm:$0xff] %v5451_v49  ;;  %v894_v35 = vsel %vm890_vm1, %v5451_v49, %v5336_v6  ;;  %v1075_v40 = vmul.f32 %v1067_v52, %v1061_v37  ;;  %v1047_v53 = vmul.f32 %v1039_v41, %v1033_v56  ;;  %v7543_v52 = vld [vmem:[#allocation21_spill] sm:$0xff]  ;;  %v7545_v60 = vld [vmem:[#allocation20_spill] sm:$0xff]  ;;  %v7557_v49 = vld [vmem:[#allocation47_spill] sm:$0xff] }
 0x235   : > { %1946 = vmatpush.msrb.mxu2 %v1216_v31  ;;  %v906_v9 = vmul.f32 %v898_v23, %v894_v35  ;;  %1933 = vmatpush.msrb.mxu3 %v7539_v16  ;;  %v845_v23 = vperm.slane %v3710_v58, 3  ;;  %v5485_v31 = vld [vmem:[#allocation5 + $0x40] ss:$8 sm:$0xf] }
 0x236   : > { %1872 = vmatpush.msrb.mxu0 %v1075_v40  ;;  %v3711_v37 = vld [vmem:[#allocation5 + $0x26] ss:$8 sm:$0xf]  ;;  %v870_v41 = vperm.slane %v5485_v31, 0 }
 0x237   : > { %1947 = vmatpush.msrb.mxu2 %v1188_v17  ;;  %1798 = vmatpush.msra.mxu1 %v906_v9  ;;  %v817_v36 = vperm.slane %v3711_v37, 3  ;;  %v7546_v17 = vld [vmem:[#allocation45_spill] sm:$0xff] }
 0x238   : > { %1934 = vmatpush.msrb.mxu3 %v7540_v4  ;;  %1280 = vrot.lane.b32.xlu1 %v4900_v45, %s7541_s2  ;;  %v807_v35 = vsel %vm806_vm15, %v5153_v46, %v7546_v17  ;;  %v7547_v40 = vld [vmem:[#allocation17_spill] sm:$0xff]  ;;  %vm7556_vm15 = vcmp.lt.s32.totalorder %v4260_v12, 79 }
 0x239   : > { %1948 = vmatpush.msrb.mxu2 %v1160_v3  ;;  %1728 = vrot.lane.b32.xlu2 %v4900_v45, %s3993_s25  ;;  %v835_v45 = vsel %vm834_vm11, %v5022_v25, %v7544_v5  ;;  %v3712_v16 = vld [vmem:[#allocation5 + $0x25] ss:$8 sm:$0xf]  ;;  %v5501_v3 = vld [vmem:[#allocation5 + $0xa7] ss:$8 sm:$0xf] }
 0x23a   : > { %1278 = vrot.lane.b32.xlu0 %v4905_v39, %s7541_s2  ;;  %1873 = vmatpush.msrb.mxu0 %v1047_v53  ;;  %v5477_v38 = vpop.permute.xlu1 %1588  ;;  %v853_v9 = vmul.f32 %v845_v23, %v835_v45  ;;  %v789_v25 = vperm.slane %v3712_v16, 3  ;;  %v1711_v4 = vperm.slane %v5501_v3, 1  ;;  %v7549_v53 = vld [vmem:[#allocation46_spill] sm:$0xff]  ;;  %v7551_v23 = vld [vmem:[#allocation36_spill] sm:$0xff]  ;;  %vm7552_vm11 = vcmp.lt.s32.totalorder %v4260_v12, 78  ;;  %v7553_v16 = vld [vmem:[#allocation53_spill] sm:$0xff] }
 0x23b   : > { %1935 = vmatpush.msrb.mxu3 %v7542_v20  ;;  %v5480_v28 = vpop.permute.xlu2 %1530  ;;  %v5482_v15 = vpop.permute.xlu0 %1586  ;;  %v779_v46 = vsel %vm778_vm14, %v5203_v59, %v7549_v53  ;;  %v7550_v20 = vld [vmem:[#allocation16_spill] sm:$0xff]  ;;  %v1704_v5 = vsel %vm7552_vm11, %v7551_v23, %v5151_v22  ;;  %v825_v45 = vmul.f32 %v817_v36, %v807_v35  ;;  %vm7554_vm14 = vcmp.lt.s32.totalorder %v4260_v12, 30  ;;  %s7696_s25 = smov 1  }
 0x23c   : > { %v3714_v37 = vld [vmem:[#allocation5 + $0x24] ss:$8 sm:$0xf]  ;;  %v5521_v17 = vld [vmem:[#allocation5 + $0xa6] ss:$8 sm:$0xf]  ;;  %v751_v53 = vsel %vm7554_vm14, %v5237_v47, %v7553_v16  ;;  %v797_v35 = vmul.f32 %v789_v25, %v779_v46  ;;  %v1719_v23 = vmul.f32 %v1711_v4, %v1704_v5 }
 0x23d   : > { %1936 = vmatpush.msrb.mxu3 %v7543_v52  ;;  %v761_v59 = vperm.slane %v3714_v37, 3  ;;  %v3716_v37 = vld [vmem:[#allocation5 + $0x23] ss:$8 sm:$0xf]  ;;  %vm7558_vm11 = vcmp.lt.s32.totalorder %v4260_v12, 31  ;;  %vm7560_vm14 = vcmp.lt.s32.totalorder %v4260_v12, 80 }
 0x23e   : > { %v723_v26 = vsel %vm7558_vm11, %v5222_v33, %v7557_v49  ;;  %v5537_v47 = vld [vmem:[#allocation5 + $0xa5] ss:$8 sm:$0xf]  ;;  %v3718_v4 = vld [vmem:[#allocation5 + $0x22] ss:$8 sm:$0xf] }
 0x23f   : > { %1937 = vmatpush.msrb.mxu3 %v7545_v60  ;;  %v705_v46 = vperm.slane %v3718_v4, 3  ;;  %v7561_v5 = vld [vmem:[#allocation59_spill] sm:$0xff]  ;;  %vm7564_vm11 = vcmp.lt.s32.totalorder %v4260_v12, 81 }
 0x240   : > { %v5548_v49 = vld [vmem:[#allocation5 + $0xa4] ss:$8 sm:$0xf] }
 0x241   : > { %1938 = vmatpush.msrb.mxu3 %v7547_v40  ;;  %v1683_v40 = vperm.slane %v5521_v17, 1 }
 0x242   : > { %v5499_v56 = vpop.permute.xlu1 %860 }
 0x243   : > { %7548 = vst [vmem:[#allocation33_spill] sm:$0xff] %v5499_v56  ;;  %1939 = vmatpush.msrb.mxu3 %v7550_v20  ;;  %v5509_v52 = vpop.permute.xlu2 %1502  ;;  %v5511_v58 = vpop.permute.xlu0 %854 }
 0x244   : > { %v866_v60 = vsel %vm862_vm6, %v5499_v56, %v5511_v58  ;;  %1940 = vmatmul.f32.vlgmr.msrb.gmra.mxu3 %v5380_v27  ;;  %v733_v56 = vperm.slane %v3716_v37, 3  ;;  %v7565_v37 = vld [vmem:[#allocation65_spill] sm:$0xff] }
 0x245   : > { %2004 = vmatpush.msra.mxu3 %v853_v9  ;;  %v878_v20 = vmul.f32 %v870_v41, %v866_v60  ;;  %v7555_v9 = vld [vmem:[#allocation28_spill] sm:$0xff]  ;;  %v1655_v41 = vperm.slane %v5537_v47, 1  ;;  %v769_v60 = vmul.f32 %v761_v59, %v751_v53 }
 0x246   : > { %v1676_v36 = vsel %vm7556_vm15, %v7555_v9, %v5293_v21  ;;  %vm7562_vm15 = vcmp.lt.s32.totalorder %v4260_v12, 32  ;;  %v1124_v9 = vperm.slane %v5042_v10, 2  ;;  %v741_v59 = vmul.f32 %v733_v56, %v723_v26  ;;  %v7563_v53 = vld [vmem:[#allocation40_spill] sm:$0xff] }
 0x247   : > { %2005 = vmatpush.msra.mxu3 %v825_v45  ;;  %1799 = vmatpush.msra.mxu1 %v878_v20  ;;  %v1691_v16 = vmul.f32 %v1683_v40, %v1676_v36  ;;  %v7559_v45 = vld [vmem:[#allocation37_spill] sm:$0xff]  ;;  %v695_v33 = vsel %vm7562_vm15, %v5355_v0, %v7561_v5  ;;  %v1627_v20 = vperm.slane %v5548_v49, 1  ;;  %v1620_v36 = vsel %vm7564_vm11, %v7563_v53, %v5371_v30 }
 0x248   : > { %v1648_v25 = vsel %vm7560_vm14, %v7559_v45, %v5334_v42  ;;  %vm7566_vm14 = vcmp.lt.s32.totalorder %v4260_v12, 33  ;;  %v5566_v26 = vld [vmem:[#allocation5 + $0xa3] ss:$8 sm:$0xf]  ;;  %v713_v4 = vmul.f32 %v705_v46, %v695_v33  ;;  %vm7570_vm15 = vcmp.lt.s32.totalorder %v4260_v12, 82 }
 0x249   : > { %2006 = vmatpush.msra.mxu3 %v797_v35  ;;  %1884 = vmatpush.msrb.mxu1 %v1719_v23  ;;  %v3720_v35 = vld [vmem:[#allocation5 + $0x21] ss:$8 sm:$0xf]  ;;  %v667_v0 = vsel %vm7566_vm14, %v5393_v18, %v7565_v37  ;;  %v1599_v56 = vperm.slane %v5566_v26, 1  ;;  %vm7573_vm11 = vcmp.lt.s32.totalorder %v4260_v12, 83  ;;  %vm7578_vm14 = vcmp.lt.s32.totalorder %v4260_v12, 94 }
 0x24a   : > { %v5552_v40 = vpop.permute.xlu1 %1558  ;;  %v677_v23 = vperm.slane %v3720_v35, 3  ;;  %v7569_v5 = vld [vmem:[#allocation41_spill] sm:$0xff]  ;;  %v7571_v37 = vld [vmem:[#allocation68_spill] sm:$0xff]  ;;  %v7572_v33 = vld [vmem:[#allocation38_spill] sm:$0xff] }
 0x24b   : > { %2007 = vmatpush.msra.mxu3 %v769_v60  ;;  %1885 = vmatpush.msrb.mxu1 %v1691_v16  ;;  %v5562_v45 = vpop.permute.xlu2 %1054  ;;  %v5564_v10 = vpop.permute.xlu0 %1112  ;;  %v1663_v60 = vmul.f32 %v1655_v41, %v1648_v25  ;;  %v1592_v18 = vsel %vm7570_vm15, %v7569_v5, %v5482_v15  ;;  %v3722_v53 = vld [vmem:[#allocation5 + $0x20] ss:$8 sm:$0xf]  ;;  %v639_v41 = vsel %vm638_vm10, %v5373_v11, %v7571_v37  ;;  %vm7575_vm10 = vcmp.lt.s32.totalorder %v4260_v12, 93 }
 0x24c   : > { %7567 = vst [vmem:[#allocation29_spill] sm:$0xff] %v5562_v45  ;;  %v1115_v16 = vsel %vm1114_vm0, %v5263_v51, %v5564_v10  ;;  %v649_v35 = vperm.slane %v3722_v53, 3  ;;  %v1635_v25 = vmul.f32 %v1627_v20, %v1620_v36  ;;  %v1571_v51 = vperm.slane %v5581_v63, 1 }
 0x24d   : > { %7568 = vst [vmem:[#allocation27_spill] sm:$0xff] %v5564_v10  ;;  %2008 = vmatpush.msra.mxu3 %v741_v59  ;;  %1886 = vmatpush.msrb.mxu1 %v1663_v60  ;;  %v1132_v59 = vmul.f32 %v1124_v9, %v1115_v16  ;;  %v685_v46 = vmul.f32 %v677_v23, %v667_v0  ;;  %v5588_v10 = vld [vmem:[#allocation5 + $0xa1] ss:$8 sm:$0xf]  ;;  %v1096_v23 = vperm.slane %v5062_v19, 2  ;;  %vm7579_vm15 = vcmp.lt.s32.totalorder %v4260_v12, 127 }
 0x24e   : > { %v1564_v5 = vsel %vm7573_vm11, %v7572_v33, %v5552_v40  ;;  %v1607_v53 = vmul.f32 %v1599_v56, %v1592_v18  ;;  %v1543_v11 = vperm.slane %v5588_v10, 1  ;;  %v657_v20 = vmul.f32 %v649_v35, %v639_v41  ;;  %v7574_v9 = vld [vmem:[#allocation48_spill] sm:$0xff]  ;;  %v7577_v18 = vld [vmem:[#allocation55_spill] sm:$0xff] }
 0x24f   : > { %2009 = vmatpush.msra.mxu3 %v713_v4  ;;  %1887 = vmatpush.msrb.mxu1 %v1635_v25  ;;  %v1536_v36 = vsel %vm7575_vm10, %v7574_v9, %v5480_v28  ;;  %v1579_v0 = vmul.f32 %v1571_v51, %v1564_v5  ;;  %v5596_v60 = vld [vmem:[#allocation5 + $0xa0] ss:$8 sm:$0xf]  ;;  %v1011_v56 = vperm.slane %v5188_v32, 1  ;;  %v1508_v35 = vsel %vm7578_vm14, %v7577_v18, %v5509_v52 }
 0x250   : > { %1949 = vmatpush.msrb.mxu2 %v1132_v59  ;;  %v1515_v16 = vperm.slane %v5596_v60, 1  ;;  %v1551_v25 = vmul.f32 %v1543_v11, %v1536_v36  ;;  %v7580_v59 = vld [vmem:[#allocation34_spill] sm:$0xff]  ;;  %vm7581_vm11 = vcmp.lt.s32.totalorder %v4260_v12, 3  ;;  %v1068_v33 = vperm.slane %v5114_v29, 2  ;;  %v7584_v9 = vld [vmem:[#allocation24_spill] sm:$0xff]  ;;  %v7587_v18 = vld [vmem:[#allocation19_spill] sm:$0xff] }
 0x251   : > { %2010 = vmatpush.msra.mxu3 %v685_v46  ;;  %1888 = vmatpush.msrb.mxu1 %v1607_v53  ;;  %v7583_v11 = vld [vmem:[#allocation26_spill] sm:$0xff]  ;;  %v983_v29 = vperm.slane %v5252_v62, 1  ;;  %vm7585_vm10 = vcmp.lt.s32.totalorder %v4260_v12, 13  ;;  %vm7590_vm14 = vcmp.lt.s32.totalorder %v4260_v12, 14 }
 0x252   : > { %v5600_v4 = vpop.permute.xlu1 %1084  ;;  %v1523_v5 = vmul.f32 %v1515_v16, %v1508_v35  ;;  %v7586_v16 = vld [vmem:[#allocation22_spill] sm:$0xff]  ;;  %v955_v35 = vperm.slane %v5301_v57, 1 }
 0x253   : > { %2011 = vmatpush.msra.mxu3 %v657_v20  ;;  %7576 = vst [vmem:[#allocation23_spill] sm:$0xff] %v5600_v4  ;;  %1889 = vmatpush.msrb.mxu1 %v1579_v0  ;;  %v1087_v19 = vsel %vm7579_vm15, %v5239_v13, %v5600_v4  ;;  %v5610_v37 = vpop.permute.xlu2 %912  ;;  %v5612_v41 = vpop.permute.xlu0 %996  ;;  %v1060_v13 = vsel %vm1058_vm5, %v5442_v1, %v5562_v45  ;;  %v7582_v20 = vld [vmem:[#allocation31_spill] sm:$0xff]  ;;  %vm7592_vm15 = vcmp.lt.s32.totalorder %v4260_v12, 95  ;;  %v1012_v45 = vperm.slane %v5188_v32, 2 }
 0x254   : > { %v1005_v51 = vsel %vm7581_vm11, %v5199_v61, %v5612_v41  ;;  %v1104_v46 = vmul.f32 %v1096_v23, %v1087_v19  ;;  %v1076_v61 = vmul.f32 %v1068_v33, %v1060_v13  ;;  %v7589_v19 = vld [vmem:[#allocation15_spill] sm:$0xff]  ;;  %v921_v33 = vsel %vm918_vm2, %v5351_v8, %v5610_v37 }
 0x255   : > { %2012 = vmatpush.msra.mxu3 %v7580_v59  ;;  %1890 = vmatpush.msrb.mxu1 %v1551_v25  ;;  %v1019_v53 = vmul.f32 %v1011_v56, %v1005_v51  ;;  %v927_v59 = vperm.slane %v5340_v43, 1  ;;  %vm7594_vm11 = vcmp.lt.s32.totalorder %v4260_v12, 96  ;;  %v984_v4 = vperm.slane %v5252_v62, 2 }
 0x256   : > { %1950 = vmatpush.msrb.mxu2 %v1104_v46  ;;  %v956_v32 = vperm.slane %v5301_v57, 2 }
 0x257   : > { %2013 = vmatpush.msra.mxu3 %v7582_v20  ;;  %1891 = vmatpush.msrb.mxu1 %v1523_v5  ;;  %v935_v5 = vmul.f32 %v927_v59, %v921_v33  ;;  %v5659_v20 = vld [vmem:[#allocation5 + $0x87] ss:$8 sm:$0xf] }
 0x258   : > { %1874 = vmatpush.msrb.mxu0 %v1019_v53  ;;  %1951 = vmatpush.msrb.mxu2 %v4905_v39  ;;  %v7588_v39 = vld [vmem:[#allocation18_spill] sm:$0xff]  ;;  %v5657_v53 = vld [vmem:[%s7229_s3 + $0x8] sm:$0xff] }
 0x259   : > { %2014 = vmatpush.msra.mxu3 %v7583_v11  ;;  %1800 = vmatmul.f32.vlgmr.msra.gmra.mxu1 %v5657_v53 }
 0x25a   : > { %v969_v36 = vpop.permute.xlu1 %968  ;;  %1952 = vmatpush.msrb.mxu2 %v1076_v61  ;;  %v7591_v61 = vld [vmem:[#allocation49_spill] sm:$0xff] }
 0x25b   : > { %2015 = vmatpush.msra.mxu3 %v7584_v9  ;;  %v5629_v1 = vpop.permute.xlu2 %1448  ;;  %v5631_v23 = vpop.permute.xlu0 %1532  ;;  %v977_v0 = vsel %vm7585_vm10, %v5176_v34, %v969_v36  ;;  %vm7596_vm10 = vcmp.lt.s32.totalorder %v4260_v12, 97 }
 0x25c   : > { %v991_v56 = vmul.f32 %v983_v29, %v977_v0  ;;  %v5673_v0 = vld [vmem:[#allocation5 + $0x86] ss:$8 sm:$0xf] }
 0x25d   : > { %2016 = vmatpush.msra.mxu3 %v7586_v16  ;;  %v1459_v16 = vperm.slane %v5673_v0, 1 }
 0x25e   : > { %1875 = vmatpush.msrb.mxu0 %v991_v56  ;;  %v1040_v56 = vperm.slane %v5138_v50, 2 }
 0x25f   : > { %2017 = vmatpush.msra.mxu3 %v7587_v18  ;;  %v1754_v18 = vld [vmem:[%s7230_s4] sm:$0xff] }
 0x261   : > { %2018 = vmatpush.msra.mxu3 %v7588_v39 }
 0x262   : > { %v941_v25 = vpop.permute.xlu1 %940 }
 0x263   : > { %2019 = vmatpush.msra.mxu3 %v7589_v19  ;;  %v5642_v51 = vpop.permute.xlu2 %1418  ;;  %v5644_v46 = vpop.permute.xlu0 %1504  ;;  %v949_v34 = vsel %vm7590_vm14, %v5315_v14, %v941_v25  ;;  %v1487_v14 = vperm.slane %v5659_v20, 1  ;;  %vm7597_vm14 = vcmp.lt.s32.totalorder %v4260_v12, 13 }
 0x264   : > { %2020 = vmatmul.f32.vlgmr.msra.gmra.mxu3 %v5380_v27  ;;  %v963_v13 = vmul.f32 %v955_v35, %v949_v34  ;;  %v4000_v35 = vmov 0   ;;  %v7593_v34 = vld [vmem:[#allocation61_spill] sm:$0xff] }
 0x265   : > { %3672 = vset.pattern.permute.xlu0 %v4000_v35  ;;  %3673 = vset.pattern.permute.xlu1 %v4000_v35 }
 0x266   : > { %1876 = vmatpush.msrb.mxu0 %v963_v13  ;;  %v5690_v13 = vld [vmem:[#allocation5 + $0x85] ss:$8 sm:$0xf]  ;;  %1757 = vperm.xlu0 %3672, %v1754_v18   ;;  %v899_v18 = vperm.slane %v5422_v7, 1 }
 0x267   : > { %v1431_v50 = vperm.slane %v5690_v13, 1  ;;  %3674 = vset.pattern.permute.xlu2 %v4000_v35 }
 0x268   : > { %1877 = vmatpush.msrb.mxu0 %v935_v5 }
 0x26a   : > { %v5663_v11 = vpop.permute.xlu1 %1476 }
 0x26b   : > { %v5665_v8 = vpop.permute.xlu2 %970  ;;  %v5667_v27 = vpop.permute.xlu0 %1474 }
 0x26c   : > { %v1480_v29 = vsel %vm7592_vm15, %v7591_v61, %v5667_v27  ;;  %vm7598_vm15 = vcmp.lt.s32.totalorder %v4260_v12, 3 }
 0x26d   : > { %v1495_v9 = vmul.f32 %v1487_v14, %v1480_v29  ;;  %v7595_v14 = vld [vmem:[#allocation60_spill] sm:$0xff] }
 0x26e   : > { %v1424_v61 = vsel %vm7596_vm10, %v7595_v14, %v5642_v51  ;;  %v928_v14 = vperm.slane %v5340_v43, 2  ;;  %vm7601_vm10 = vcmp.lt.s32.totalorder %v4260_v12, 78 }
 0x26f   : > { %1892 = vmatpush.msrb.mxu1 %v1495_v9 }
 0x272   : > { %v5680_v39 = vpop.permute.xlu1 %1446 }
 0x273   : > { %v5682_v19 = vpop.permute.xlu2 %942  ;;  %v5684_v59 = vpop.permute.xlu0 %1026  ;;  %v1452_v33 = vsel %vm7594_vm11, %v7593_v34, %v5680_v39  ;;  %v1439_v34 = vmul.f32 %v1431_v50, %v1424_v61  ;;  %vm7599_vm11 = vcmp.lt.s32.totalorder %v4260_v12, 14 }
 0x274   : > { %v1032_v5 = vsel %vm1030_vm7, %v5399_v44, %v5684_v59  ;;  %v1467_v29 = vmul.f32 %v1459_v16, %v1452_v33  ;;  %v976_v44 = vsel %vm7597_vm14, %v969_v36, %v5665_v8  ;;  %v948_v62 = vsel %vm7599_vm11, %v941_v25, %v5682_v19 }
 0x275   : > { %v1048_v9 = vmul.f32 %v1040_v56, %v1032_v5  ;;  %v992_v61 = vmul.f32 %v984_v4, %v976_v44  ;;  %v964_v57 = vmul.f32 %v956_v32, %v948_v62  ;;  %v1684_v32 = vperm.slane %v5521_v17, 2 }
 0x276   : > { %1893 = vmatpush.msrb.mxu1 %v1467_v29  ;;  %v1712_v29 = vperm.slane %v5501_v3, 2  ;;  %vm7603_vm14 = vcmp.lt.s32.totalorder %v4260_v12, 79  ;;  %vm7607_vm11 = vcmp.lt.s32.totalorder %v4260_v12, 81 }
 0x277   : > { %1953 = vmatpush.msrb.mxu2 %v1048_v9 }
 0x278   : > { %1894 = vmatpush.msrb.mxu1 %v1439_v34  ;;  %v7600_v34 = vld [vmem:[#allocation51_spill] sm:$0xff] }
 0x279   : > { %v1703_v4 = vsel %vm7601_vm10, %v5151_v22, %v7600_v34  ;;  %vm7608_vm10 = vcmp.lt.s32.totalorder %v4260_v12, 82 }
 0x27a   : > { %v5703_v35 = vpop.permute.xlu1 %998 }
 0x27b   : > { %v1004_v16 = vsel %vm7598_vm15, %v5612_v41, %v5703_v35  ;;  %v5713_v56 = vpop.permute.xlu2 %914  ;;  %v885_v33 = vpop.permute.xlu0 %884  ;;  %vm7605_vm15 = vcmp.lt.s32.totalorder %v4260_v12, 80 }
 0x27c   : > { %v893_v50 = vsel %vm890_vm1, %v5336_v6, %v885_v33  ;;  %v1020_v5 = vmul.f32 %v1012_v45, %v1004_v16  ;;  %v920_v41 = vsel %vm918_vm2, %v5610_v37, %v5713_v56  ;;  %v900_v6 = vperm.slane %v5422_v7, 2 }
 0x27d   : > { %v907_v36 = vmul.f32 %v899_v18, %v893_v50  ;;  %v871_v45 = vperm.slane %v5485_v31, 1  ;;  %v936_v25 = vmul.f32 %v928_v14, %v920_v41  ;;  %v7602_v50 = vld [vmem:[#allocation88_spill] sm:$0xff]  ;;  %v7604_v14 = vld [vmem:[#allocation54_spill] sm:$0xff]  ;;  %v1628_v41 = vperm.slane %v5548_v49, 2 }
 0x27e   : > { %1954 = vmatpush.msrb.mxu2 %v1020_v5  ;;  %v1675_v22 = vsel %vm7603_vm14, %v5293_v21, %v7602_v50  ;;  %vm7611_vm14 = vcmp.lt.s32.totalorder %v4260_v12, 78 }
 0x27f   : > { %1878 = vmatpush.msrb.mxu0 %v907_v36  ;;  %v1720_v36 = vmul.f32 %v1712_v29, %v1703_v4  ;;  %v1600_v4 = vperm.slane %v5566_v26, 2 }
 0x280   : > { %1955 = vmatpush.msrb.mxu2 %v992_v61  ;;  %v1647_v61 = vsel %vm7605_vm15, %v5334_v42, %v7604_v14  ;;  %v5763_v42 = vld [vmem:[#allocation5 + $0x84] ss:$8 sm:$0xf]  ;;  %vm7612_vm15 = vcmp.lt.s32.totalorder %v4260_v12, 83 }
 0x282   : > { %v857_v9 = vpop.permute.xlu1 %856  ;;  %1956 = vmatpush.msrb.mxu2 %v964_v57  ;;  %v7606_v57 = vld [vmem:[#allocation92_spill] sm:$0xff] }
 0x283   : > { %v865_v37 = vsel %vm862_vm6, %v5511_v58, %v857_v9  ;;  %v5737_v18 = vpop.permute.xlu2 %886  ;;  %v5739_v44 = vpop.permute.xlu0 %1420  ;;  %v1656_v58 = vperm.slane %v5537_v47, 2  ;;  %v1619_v21 = vsel %vm7607_vm11, %v5371_v30, %v7606_v57  ;;  %v1591_v30 = vsel %vm7608_vm10, %v5482_v15, %v5477_v38 }
 0x284   : > { %v892_v16 = vsel %vm890_vm1, %v885_v33, %v5737_v18  ;;  %1957 = vmatpush.msrb.mxu2 %v936_v25  ;;  %v879_v62 = vmul.f32 %v871_v45, %v865_v37  ;;  %v1692_v33 = vmul.f32 %v1684_v32, %v1675_v22  ;;  %v1403_v25 = vperm.slane %v5763_v42, 1  ;;  %v7610_v22 = vld [vmem:[#allocation25_spill] sm:$0xff] }
 0x285   : > { %v908_v5 = vmul.f32 %v900_v6, %v892_v16  ;;  %v872_v6 = vperm.slane %v5485_v31, 2  ;;  %v1664_v29 = vmul.f32 %v1656_v58, %v1647_v61  ;;  %v1713_v37 = vperm.slane %v5501_v3, 3  ;;  %v7613_v61 = vld [vmem:[#allocation72_spill] sm:$0xff] }
 0x286   : > { %1879 = vmatpush.msrb.mxu0 %v879_v62  ;;  %v1636_v3 = vmul.f32 %v1628_v41, %v1619_v21  ;;  %v1563_v15 = vsel %vm7612_vm15, %v5552_v40, %v5449_v55  ;;  %vm7614_vm11 = vcmp.lt.s32.totalorder %v4260_v12, 98  ;;  %vm7616_vm10 = vcmp.lt.s32.totalorder %v4260_v12, 79 }
 0x287   : > { %1958 = vmatpush.msrb.mxu2 %v908_v5  ;;  %1880 = vmatmul.f32.vlgmr.msrb.gmra.mxu0 %v5657_v53  ;;  %v1706_v5 = vsel %vm7611_vm14, %v7600_v34, %v7610_v22  ;;  %v1685_v34 = vperm.slane %v5521_v17, 3  ;;  %v7615_v22 = vld [vmem:[#allocation35_spill] sm:$0xff]  ;;  %v1608_v21 = vmul.f32 %v1600_v4, %v1591_v30  ;;  %vm7617_vm14 = vcmp.lt.s32.totalorder %v4260_v12, 93 }
 0x288   : > { %1964 = vmatpush.msra.mxu0 %v1720_v36  ;;  %v1572_v36 = vperm.slane %v5581_v63, 2  ;;  %v1535_v40 = vsel %vm7617_vm14, %v5480_v28, %v5631_v23  ;;  %v7618_v17 = vld [vmem:[#allocation39_spill] sm:$0xff]  ;;  %vm7619_vm15 = vcmp.lt.s32.totalorder %v4260_v12, 80  ;;  %vm7623_vm14 = vcmp.lt.s32.totalorder %v4260_v12, 95 }
 0x28a   : > { %1965 = vmatpush.msra.mxu0 %v1692_v33  ;;  %v5761_v45 = vpop.permute.xlu1 %1392 }
 0x28b   : > { %v5772_v16 = vpop.permute.xlu2 %858  ;;  %v5774_v32 = vpop.permute.xlu0 %1390 }
 0x28c   : > { %7609 = vst [vmem:[#allocation21_spill] sm:$0xff] %v5772_v16  ;;  %v864_v62 = vsel %vm862_vm6, %v857_v9, %v5772_v16  ;;  %1966 = vmatpush.msra.mxu0 %v1664_v29  ;;  %v1396_v33 = vsel %vm7614_vm11, %v7613_v61, %v5774_v32  ;;  %v1678_v9 = vsel %vm7616_vm10, %v7602_v50, %v7615_v22  ;;  %v1544_v29 = vperm.slane %v5588_v10, 2 }
 0x28d   : > { %v880_v58 = vmul.f32 %v872_v6, %v864_v62  ;;  %v1411_v41 = vmul.f32 %v1403_v25, %v1396_v33  ;;  %v1721_v16 = vmul.f32 %v1713_v37, %v1706_v5  ;;  %v1657_v6 = vperm.slane %v5537_v47, 3  ;;  %v7621_v47 = vld [vmem:[#allocation30_spill] sm:$0xff] }
 0x28e   : > { %1967 = vmatpush.msra.mxu0 %v1636_v3  ;;  %v1650_v62 = vsel %vm7619_vm15, %v7604_v14, %v7618_v17  ;;  %v1580_v50 = vmul.f32 %v1572_v36, %v1563_v15  ;;  %v1516_v25 = vperm.slane %v5596_v60, 2  ;;  %vm7620_vm11 = vcmp.lt.s32.totalorder %v4260_v12, 94  ;;  %v5819_v3 = vld [vmem:[#allocation5 + $0x83] ss:$8 sm:$0xf] }
 0x28f   : > { %1959 = vmatpush.msrb.mxu2 %v880_v58  ;;  %1895 = vmatpush.msrb.mxu1 %v1411_v41  ;;  %v1507_v4 = vsel %vm7620_vm11, %v5509_v52, %v5644_v46  ;;  %v1693_v28 = vmul.f32 %v1685_v34, %v1678_v9  ;;  %v1629_v37 = vperm.slane %v5548_v49, 3  ;;  %vm7622_vm10 = vcmp.lt.s32.totalorder %v4260_v12, 81  ;;  %v7624_v58 = vld [vmem:[#allocation42_spill] sm:$0xff] }
 0x290   : > { %1968 = vmatpush.msra.mxu0 %v1608_v21  ;;  %v1622_v30 = vsel %vm7622_vm10, %v7606_v57, %v7621_v47  ;;  %v1552_v5 = vmul.f32 %v1544_v29, %v1535_v40  ;;  %v1375_v36 = vperm.slane %v5819_v3, 1  ;;  %v1488_v15 = vperm.slane %v5659_v20, 2  ;;  %1960 = vmatmul.f32.vlgmr.msrb.gmra.mxu2 %v5657_v53  ;;  %v7629_v21 = vld [vmem:[#allocation43_spill] sm:$0xff]  ;;  %v7635_v47 = vld [vmem:[#allocation44_spill] sm:$0xff] }
 0x291   : > { %2044 = vmatpush.msra.mxu2 %v1721_v16  ;;  %v1479_v52 = vsel %vm7623_vm14, %v5667_v27, %v5663_v11  ;;  %v1665_v57 = vmul.f32 %v1657_v6, %v1650_v62  ;;  %v1601_v16 = vperm.slane %v5566_v26, 3  ;;  %vm7625_vm15 = vcmp.lt.s32.totalorder %v4260_v12, 82  ;;  %v7627_v27 = vld [vmem:[#allocation69_spill] sm:$0xff] }
 0x292   : > { %1969 = vmatpush.msra.mxu0 %v1580_v50  ;;  %v5817_v14 = vpop.permute.xlu1 %1364  ;;  %v1594_v61 = vsel %vm7625_vm15, %v5477_v38, %v7624_v58  ;;  %v1524_v33 = vmul.f32 %v1516_v25, %v1507_v4  ;;  %v1460_v34 = vperm.slane %v5673_v0, 2  ;;  %vm7626_vm11 = vcmp.lt.s32.totalorder %v4260_v12, 96 }
 0x293   : > { %2045 = vmatpush.msra.mxu2 %v1693_v28  ;;  %v1363_v49 = vpop.permute.xlu0 %1362  ;;  %v1451_v22 = vsel %vm7626_vm11, %v5680_v39, %v5629_v1  ;;  %vm7628_vm10 = vcmp.lt.s32.totalorder %v4260_v12, 99  ;;  %v1637_v26 = vmul.f32 %v1629_v37, %v1622_v30  ;;  %v1573_v41 = vperm.slane %v5581_v63, 3  ;;  %v7632_v63 = vld [vmem:[#allocation50_spill] sm:$0xff] }
 0x294   : > { %1970 = vmatpush.msra.mxu0 %v1552_v5  ;;  %v1368_v9 = vsel %vm7628_vm10, %v7627_v27, %v1363_v49  ;;  %vm7630_vm14 = vcmp.lt.s32.totalorder %v4260_v12, 83  ;;  %v1496_v40 = vmul.f32 %v1488_v15, %v1479_v52  ;;  %v1432_v6 = vperm.slane %v5690_v13, 2  ;;  %v7643_v27 = vld [vmem:[#allocation63_spill] sm:$0xff] }
 0x295   : > { %2046 = vmatpush.msra.mxu2 %v1665_v57  ;;  %v1566_v38 = vsel %vm7630_vm14, %v5449_v55, %v7629_v21  ;;  %v1383_v29 = vmul.f32 %v1375_v36, %v1368_v9  ;;  %vm7631_vm15 = vcmp.lt.s32.totalorder %v4260_v12, 97  ;;  %v1609_v17 = vmul.f32 %v1601_v16, %v1594_v61  ;;  %v7638_v57 = vld [vmem:[#allocation56_spill] sm:$0xff]  ;;  %v7640_v61 = vld [vmem:[#allocation77_spill] sm:$0xff]  ;;  %v7645_v21 = vld [vmem:[#allocation66_spill] sm:$0xff] }
 0x296   : > { %1971 = vmatpush.msra.mxu0 %v1524_v33  ;;  %v1423_v39 = vsel %vm7631_vm15, %v5642_v51, %v5739_v44  ;;  %v1545_v62 = vperm.slane %v5588_v10, 3  ;;  %vm7633_vm11 = vcmp.lt.s32.totalorder %v4260_v12, 93  ;;  %v1404_v55 = vperm.slane %v5763_v42, 2  ;;  %v3731_v10 = vld [vmem:[#allocation5 + $0x82] ss:$8 sm:$0xf] }
 0x297   : > { %2047 = vmatpush.msra.mxu2 %v1637_v26  ;;  %v1538_v50 = vsel %vm7633_vm11, %v5631_v23, %v7632_v63  ;;  %1896 = vmatpush.msrb.mxu1 %v1383_v29  ;;  %v1468_v25 = vmul.f32 %v1460_v34, %v1451_v22  ;;  %vm7634_vm10 = vcmp.lt.s32.totalorder %v4260_v12, 98  ;;  %v1581_v51 = vmul.f32 %v1573_v41, %v1566_v38 }
 0x298   : > { %1972 = vmatpush.msra.mxu0 %v1496_v40  ;;  %v1395_v4 = vsel %vm7634_vm10, %v5774_v32, %v5761_v45  ;;  %v1517_v28 = vperm.slane %v5596_v60, 3  ;;  %v1347_v37 = vperm.slane %v3731_v10, 1  ;;  %vm7636_vm14 = vcmp.lt.s32.totalorder %v4260_v12, 94 }
 0x299   : > { %2048 = vmatpush.msra.mxu2 %v1609_v17  ;;  %v1510_v23 = vsel %vm7636_vm14, %v5644_v46, %v7635_v47  ;;  %v1376_v30 = vperm.slane %v5819_v3, 2  ;;  %v1440_v36 = vmul.f32 %v1432_v6, %v1423_v39  ;;  %vm7637_vm15 = vcmp.lt.s32.totalorder %v4260_v12, 99  ;;  %v3732_v6 = vld [vmem:[#allocation5 + $0x81] ss:$8 sm:$0xf] }
 0x29a   : > { %1973 = vmatpush.msra.mxu0 %v1468_v25  ;;  %v1337_v5 = vpop.permute.xlu1 %1336  ;;  %v1367_v32 = vsel %vm7637_vm15, %v1363_v49, %v5817_v14  ;;  %v1553_v52 = vmul.f32 %v1545_v62, %v1538_v50  ;;  %v1489_v60 = vperm.slane %v5659_v20, 3  ;;  %vm7639_vm11 = vcmp.lt.s32.totalorder %v4260_v12, 95  ;;  %v7647_v17 = vld [vmem:[#allocation64_spill] sm:$0xff]  ;;  %v7654_v47 = vld [vmem:[#allocation78_spill] sm:$0xff] }
 0x29b   : > { %2049 = vmatpush.msra.mxu2 %v1581_v51  ;;  %v1335_v15 = vpop.permute.xlu0 %1334  ;;  %v1482_v16 = vsel %vm7639_vm11, %v5663_v11, %v7638_v57  ;;  %v1412_v46 = vmul.f32 %v1404_v55, %v1395_v4  ;;  %v1348_v58 = vperm.slane %v3731_v10, 2  ;;  %vm7641_vm10 = vcmp.lt.s32.totalorder %v4260_v12, 109  ;;  %v7649_v55 = vld [vmem:[#allocation73_spill] sm:$0xff]  ;;  %v7652_v4 = vld [vmem:[#allocation74_spill] sm:$0xff] }
 0x29c   : > { %v1340_v33 = vsel %vm7641_vm10, %v7640_v61, %v1335_v15  ;;  %1974 = vmatpush.msra.mxu0 %v1440_v36  ;;  %vm7642_vm14 = vmmov %vm7641_vm10  ;;  %v1525_v34 = vmul.f32 %v1517_v28, %v1510_v23  ;;  %v1461_v20 = vperm.slane %v5673_v0, 3  ;;  %vm7644_vm15 = vcmp.lt.s32.totalorder %v4260_v12, 96 }
 0x29d   : > { %v1339_v49 = vsel %vm7642_vm14, %v1335_v15, %v1337_v5  ;;  %2050 = vmatpush.msra.mxu2 %v1553_v52  ;;  %v1355_v22 = vmul.f32 %v1347_v37, %v1340_v33  ;;  %v1454_v11 = vsel %vm7644_vm15, %v5629_v1, %v7643_v27  ;;  %v1384_v9 = vmul.f32 %v1376_v30, %v1367_v32  ;;  %v1729_v15 = vpop.permute.xlu2 %1728  ;;  %v3735_v33 = vld [vmem:[#allocation5 + $0x67] ss:$8 sm:$0xf] }
 0x29e   : > { %1975 = vmatpush.msra.mxu0 %v1412_v46  ;;  %v1497_v26 = vmul.f32 %v1489_v60, %v1482_v16  ;;  %v1433_v41 = vperm.slane %v5690_v13, 3  ;;  %vm7646_vm11 = vcmp.lt.s32.totalorder %v4260_v12, 97  ;;  %v1356_v29 = vmul.f32 %v1348_v58, %v1339_v49  ;;  %v3734_v46 = vld [vmem:[#allocation5 + $0xc0] ss:$8 sm:$0xf] }
 0x29f   : > { %2051 = vmatpush.msra.mxu2 %v1525_v34  ;;  %1897 = vmatpush.msrb.mxu1 %v1355_v22  ;;  %v1426_v38 = vsel %vm7646_vm11, %v5739_v44, %v7645_v21  ;;  %v1405_v0 = vperm.slane %v5763_v42, 3  ;;  %v1469_v40 = vmul.f32 %v1461_v20, %v1454_v11  ;;  %v1320_v1 = vperm.slane %v3732_v6, 2  ;;  %v7658_v34 = vld [vmem:[#allocation57_spill] sm:$0xff]  ;;  %v7659_v22 = vld [vmem:[#allocation87_spill] sm:$0xff]  ;;  %v7660_v11 = vld [vmem:[#allocation76_spill] sm:$0xff] }
 0x2a0   : > { %1976 = vmatpush.msra.mxu0 %v1384_v9  ;;  %v1319_v39 = vperm.slane %v3732_v6, 1  ;;  %vm7648_vm10 = vcmp.lt.s32.totalorder %v4260_v12, 98  ;;  %v1377_v63 = vperm.slane %v5819_v3, 3  ;;  %v1441_v50 = vmul.f32 %v1433_v41, %v1426_v38 }
 0x2a1   : > { %2052 = vmatpush.msra.mxu2 %v1497_v26  ;;  %v1398_v62 = vsel %vm7648_vm10, %v5761_v45, %v7647_v17  ;;  %vm7650_vm14 = vcmp.lt.s32.totalorder %v4260_v12, 99  ;;  %vm7651_vm15 = vcmp.lt.s32.totalorder %v4260_v12, 110  ;;  %v1349_v28 = vperm.slane %v3731_v10, 3  ;;  %v3733_v10 = vld [vmem:[#allocation5 + $0x80] ss:$8 sm:$0xf] }
 0x2a2   : > { %1977 = vmatpush.msra.mxu0 %v1356_v29  ;;  %v1309_v13 = vpop.permute.xlu1 %1308  ;;  %v1370_v42 = vsel %vm7650_vm14, %v5817_v14, %v7649_v55  ;;  %vm7653_vm11 = vmmov %vm7651_vm15  ;;  %v1413_v45 = vmul.f32 %v1405_v0, %v1398_v62  ;;  %vm7655_vm10 = vcmp.lt.s32.totalorder %v4260_v12, 109  ;;  %v1321_v36 = vperm.slane %v3732_v6, 3  ;;  %v7656_v14 = vld [vmem:[#allocation79_spill] sm:$0xff]  ;;  %v7666_v62 = vld [vmem:[#allocation70_spill] sm:$0xff] }
 0x2a3   : > { %2053 = vmatpush.msra.mxu2 %v1469_v40  ;;  %v1342_v23 = vsel %vm7655_vm10, %v1337_v5, %v7654_v47  ;;  %v1385_v30 = vmul.f32 %v1377_v63, %v1370_v42  ;;  %vm7657_vm14 = vmmov %vm7653_vm11  ;;  %v1293_v60 = vperm.slane %v3733_v10, 3  ;;  %v1292_v57 = vperm.slane %v3733_v10, 2  ;;  %v7663_v29 = vld [vmem:[#allocation83_spill] sm:$0xff]  ;;  %v7665_v40 = vld [vmem:[#allocation86_spill] sm:$0xff] }
 0x2a4   : > { %v1307_v44 = vpop.permute.xlu0 %1306  ;;  %v1314_v32 = vsel %vm7657_vm14, %v1309_v13, %v7656_v14  ;;  %v1357_v52 = vmul.f32 %v1349_v28, %v1342_v23  ;;  %v1291_v16 = vperm.slane %v3733_v10, 1  ;;  %v1740_v58 = vperm.slane %v3734_v46, 2  ;;  %v7667_v42 = vld [vmem:[#allocation67_spill] sm:$0xff]  ;;  %v7672_v10 = vld [vmem:[#allocation80_spill] sm:$0xff] }
 0x2a5   : > { %v1311_v25 = vsel %vm7651_vm15, %v1307_v44, %v1309_v13  ;;  %v1312_v51 = vsel %vm7653_vm11, %v7652_v4, %v1307_v44  ;;  %2054 = vmatpush.msra.mxu2 %v1441_v50  ;;  %v1329_v61 = vmul.f32 %v1321_v36, %v1314_v32  ;;  %v1265_v49 = vperm.slane %v3735_v33, 3  ;;  %v3737_v50 = vld [vmem:[#allocation5 + $0x65] ss:$8 sm:$0xf] }
 0x2a6   : > { %v1328_v37 = vmul.f32 %v1320_v1, %v1311_v25  ;;  %v1327_v3 = vmul.f32 %v1319_v39, %v1312_v51  ;;  %v1258_v20 = vsel %vm1254_vm8, %v7659_v22, %v7658_v34  ;;  %v1731_v27 = vsel %vm1730_vm4, %v5401_v48, %v1729_v15  ;;  %v3736_v39 = vld [vmem:[#allocation5 + $0x66] ss:$8 sm:$0xf]  ;;  %v3739_v47 = vld [vmem:[#allocation5 + $0x63] ss:$8 sm:$0xf] }
 0x2a7   : > { %2055 = vmatpush.msra.mxu2 %v1413_v45  ;;  %vm7661_vm15 = vcmp.lt.s32.totalorder %v4260_v12, 111  ;;  %v1741_v41 = vperm.slane %v3734_v46, 3  ;;  %v1734_v6 = vsel %vm1730_vm4, %v1729_v15, %v7665_v40  ;;  %v1237_v17 = vperm.slane %v3736_v39, 3  ;;  %v7668_v51 = vld [vmem:[#allocation90_spill] sm:$0xff] }
 0x2a8   : > { %1898 = vmatpush.msrb.mxu1 %v1327_v3  ;;  %1978 = vmatpush.msra.mxu0 %v1328_v37  ;;  %vm7662_vm11 = vmmov %vm7661_vm15  ;;  %v1230_v13 = vsel %vm1226_vm13, %v5201_v24, %v7666_v62  ;;  %v1748_v63 = vmul.f32 %v1740_v58, %v1731_v27  ;;  %v1273_v44 = vmul.f32 %v1265_v49, %v1258_v20  ;;  %v1209_v55 = vperm.slane %v3737_v50, 3  ;;  %v3738_v45 = vld [vmem:[#allocation5 + $0x64] ss:$8 sm:$0xf] }
 0x2a9   : > { %2056 = vmatpush.msra.mxu2 %v1385_v30  ;;  %vm7664_vm10 = vmmov %vm7662_vm11  ;;  %v1202_v25 = vsel %vm1198_vm9, %v5338_v54, %v7667_v42  ;;  %v1749_v4 = vmul.f32 %v1741_v41, %v1734_v6  ;;  %v1245_v24 = vmul.f32 %v1237_v17, %v1230_v13  ;;  %v1181_v28 = vperm.slane %v3738_v45, 3  ;;  %v7669_v37 = vld [vmem:[#allocation75_spill] sm:$0xff]  ;;  %v7671_v36 = vld [vmem:[#allocation58_spill] sm:$0xff] }
 0x2aa   : > { %v1281_v5 = vpop.permute.xlu1 %1280  ;;  %v1174_v3 = vsel %vm1170_vm12, %v5375_v2, %v7669_v37  ;;  %v1217_v54 = vmul.f32 %v1209_v55, %v1202_v25  ;;  %v1153_v23 = vperm.slane %v3739_v47, 3  ;;  %v7670_v30 = vld [vmem:[#allocation71_spill] sm:$0xff]  ;;  %v7674_v58 = vld [vmem:[#allocation81_spill] sm:$0xff]  ;;  %vm7676_vm9 = vcmp.lt.s32.totalorder %v4260_v12, 127  ;;  %v7679_v27 = vld [vmem:[#allocation84_spill] sm:$0xff] }
 0x2ab   : > { %2057 = vmatpush.msra.mxu2 %v1357_v52  ;;  %v1286_v9 = vsel %vm7661_vm15, %v1281_v5, %v7660_v11  ;;  %v1146_v14 = vsel %vm1142_vm3, %v7671_v36, %v7670_v30  ;;  %v1189_v32 = vmul.f32 %v1181_v28, %v1174_v3  ;;  %v3740_v15 = vld [vmem:[#allocation5 + $0x62] ss:$8 sm:$0xf]  ;;  %vm7678_vm12 = vcmask 64512   ;;  %v1781_v30 = vpop.f32.mrf.mxu0 }
 0x2ac   : > { %v1279_v26 = vpop.permute.xlu0 %1278  ;;  %v1301_v21 = vmul.f32 %v1293_v60, %v1286_v9  ;;  %v1125_v52 = vperm.slane %v3740_v15, 3  ;;  %v7673_v60 = vld [vmem:[#allocation27_spill] sm:$0xff]  ;;  %v7677_v49 = vld [vmem:[#allocation93_spill] sm:$0xff]  ;;  %vm7683_vm3 = vcmp.lt.s32.totalorder %v4260_v12, 3  ;;  %v3747_v13 = vld [vmem:[%s7229_s3 + $0x18] sm:$0xff]  ;;  %vm7686_vm4 = vcmp.lt.s32.totalorder %v4260_v12, 13 }
 0x2ad   : > { %v1283_v38 = vsel %vm7662_vm11, %v1279_v26, %v1281_v5  ;;  %v1284_v0 = vsel %vm7664_vm10, %v7663_v29, %v1279_v26  ;;  %2058 = vmatpush.msra.mxu2 %v1329_v61  ;;  %v1118_v2 = vsel %vm1114_vm0, %v7673_v60, %v7672_v10  ;;  %v7675_v61 = vld [vmem:[#allocation23_spill] sm:$0xff]  ;;  %v7680_v11 = vld [vmem:[#allocation29_spill] sm:$0xff]  ;;  %v3744_v29 = vld [vmem:[%s4164_s14 + $0x18] sm:$0xff]  ;;  %v929_v25 = vperm.slane %v5340_v43, 3  ;;  %s7694_s14 = smov 112  }
 0x2ae   : > { %v1300_v48 = vmul.f32 %v1292_v57, %v1283_v38  ;;  %v1299_v1 = vmul.f32 %v1291_v16, %v1284_v0  ;;  %v1161_v57 = vmul.f32 %v1153_v23, %v1146_v14  ;;  %v3741_v16 = vld [vmem:[#allocation5 + $0x61] ss:$8 sm:$0xf]  ;;  %v1090_v5 = vsel %vm7676_vm9, %v7675_v61, %v7674_v58  ;;  %v3742_v22 = vld [vmem:[#allocation5 + $0x47] ss:$8 sm:$0xf]  ;;  %vm7684_vm0 = vmmov %vm7678_vm12 }
 0x2af   : > { %2059 = vmatpush.msra.mxu2 %v1301_v21  ;;  %v1097_v46 = vperm.slane %v3741_v16, 3  ;;  %v1133_v33 = vmul.f32 %v1125_v52, %v1118_v2  ;;  %v1069_v20 = vperm.slane %v3742_v22, 3  ;;  %v1059_v9 = vsel %vm1058_vm5, %v7680_v11, %v7679_v27  ;;  %v3743_v26 = vld [vmem:[#allocation5 + $0x46] ss:$8 sm:$0xf] }
 0x2b0   : > { %1899 = vmatpush.msrb.mxu1 %v1299_v1  ;;  %1979 = vmatpush.msra.mxu0 %v1300_v48  ;;  %v1041_v41 = vperm.slane %v3743_v26, 3  ;;  %v7681_v21 = vld [vmem:[#allocation82_spill] sm:$0xff]  ;;  %v7682_v48 = vld [vmem:[#allocation85_spill] sm:$0xff] }
 0x2b1   : > { %1900 = vmatmul.f32.vlgmr.msrb.gmra.mxu1 %v7668_v51  ;;  %1980 = vmatmul.f32.vlgmr.msra.gmra.mxu0 %v7668_v51  ;;  %v1105_v34 = vmul.f32 %v1097_v46, %v1090_v5  ;;  %v1031_v38 = vsel %vm1030_vm7, %v5684_v59, %v7681_v21  ;;  %v1077_v0 = vmul.f32 %v1069_v20, %v1059_v9  ;;  %v3745_v40 = vld [vmem:[#allocation5 + $0x45] ss:$8 sm:$0xf]  ;;  %v3746_v17 = vld [vmem:[#allocation5 + $0x44] ss:$8 sm:$0xf] }
 0x2b2   : > { %1999 = vmatpush.msrb.mxu0 %v1748_v63  ;;  %2024 = vmatpush.msra.mxu1 %v1273_v44  ;;  %v1013_v6 = vperm.slane %v3745_v40, 3  ;;  %v1003_v1 = vsel %vm7683_vm3, %v5703_v35, %v7682_v48  ;;  %v1049_v39 = vmul.f32 %v1041_v41, %v1031_v38  ;;  %v985_v62 = vperm.slane %v3746_v17, 3  ;;  %v7685_v59 = vld [vmem:[#allocation52_spill] sm:$0xff]  ;;  %v7687_v35 = vld [vmem:[#allocation91_spill] sm:$0xff]  ;;  %v7690_v28 = vld [vmem:[#allocation62_spill] sm:$0xff] }
 0x2b3   : > { %2060 = vmatmul.f32.vlgmr.msra.gmra.mxu2 %v7668_v51  ;;  %v975_v63 = vsel %vm7686_vm4, %v5665_v8, %v7685_v59  ;;  %v3748_v44 = vld [vmem:[#allocation5 + $0x43] ss:$8 sm:$0xf]  ;;  %vm7688_vm7 = vcmp.lt.s32.totalorder %v4260_v12, 14  ;;  %v901_v8 = vperm.slane %v5422_v7, 3  ;;  %v891_v37 = vsel %vm890_vm1, %v5737_v18, %v7690_v28  ;;  %v1821_v7 = vpop.f32.mrf.mxu2 }
 0x2b4   : > { %2079 = vmatpush.msra.mxu0 %v1749_v4  ;;  %2025 = vmatpush.msra.mxu1 %v1245_v24  ;;  %v957_v50 = vperm.slane %v3748_v44, 3  ;;  %v1021_v55 = vmul.f32 %v1013_v6, %v1003_v1  ;;  %v947_v42 = vsel %vm7688_vm7, %v5682_v19, %v7687_v35  ;;  %v993_v4 = vmul.f32 %v985_v62, %v975_v63  ;;  %v7689_v51 = vld [vmem:[#allocation89_spill] sm:$0xff] }
 0x2b5   : > { %v919_v24 = vsel %vm918_vm2, %v5713_v56, %v7689_v51  ;;  %v873_v19 = vperm.slane %v5485_v31, 3  ;;  %v7691_v43 = vld [vmem:[#allocation33_spill] sm:$0xff]  ;;  %v909_v23 = vmul.f32 %v901_v8, %v891_v37  ;;  %v4001_v59 = vmov 256.0  }
 0x2b6   : > { %2026 = vmatpush.msra.mxu1 %v1217_v54  ;;  %v965_v45 = vmul.f32 %v957_v50, %v947_v42  ;;  %v937_v3 = vmul.f32 %v929_v25, %v919_v24  ;;  %v7692_v54 = vld [vmem:[#allocation21_spill] sm:$0xff]  ;;  %3675 = vrcp.f32 %v4001_v59  ;;  %vm7700_vm7 = vcmp.lt.s32.totalorder %v4260_v12, 127 }
 0x2b7   : > { %v863_v47 = vsel %vm862_vm6, %v7692_v54, %v7691_v43 }
 0x2b8   : > { %2027 = vmatpush.msra.mxu1 %v1189_v32  ;;  %v881_v56 = vmul.f32 %v873_v19, %v863_v47  ;;  %v1861_v32 = vpop.f32.mrf.mxu3 }
 0x2b9   : > { %3507 = vmatmul.msk.f32.vlgmr.msrb.gmra.mxu0 %vm7678_vm12, %v7677_v49 }
 0x2ba   : > { %2028 = vmatpush.msra.mxu1 %v1161_v57 }
 0x2bb   : > { %v1841_v52 = vpop.f32.mrf.mxu2 }
 0x2bc   : > { %2029 = vmatpush.msra.mxu1 %v1133_v33  ;;  %v3676_v63 = vpop.eup %3675 }
 0x2bd   : > { %v2088_v44 = vmul.f32 256.0, %v3676_v63  ;;  %vm2092_vm14 = vweird.f32 %v3676_v63 }
 0x2be   : > { %2030 = vmatpush.msra.mxu1 %v1105_v34 }
 0x2bf   : > { %v2089_v50 = vsub.f32 1.0, %v2088_v44 }
 0x2c0   : > { %2031 = vmatpush.msra.mxu1 %v3744_v29 }
 0x2c1   : > { %3508 = vmatmul.msk.f32.vlgmr.msra.gmra.mxu0 %vm7684_vm0, %v3747_v13  ;;  %vm7697_vm0 = vcmp.lt.s32.totalorder %v4260_v12, 111 }
 0x2c2   : > { %2032 = vmatpush.msra.mxu1 %v1077_v0  ;;  %vm7699_vm4 = vmmov %vm7697_vm0 }
 0x2c3   : > { %v1921_v58 = vpop.f32.mrf.mxu2 }
 0x2c4   : > { %2033 = vmatpush.msra.mxu1 %v1049_v39 }
 0x2c6   : > { %2034 = vmatpush.msra.mxu1 %v1021_v55  ;;  %v2090_v55 = vmul.f32 %v3676_v63, %v2089_v50 }
 0x2c7   : > { %v1941_v22 = vpop.f32.mrf.mxu3 }
 0x2c8   : > { %2035 = vmatpush.msra.mxu1 %v993_v4  ;;  %v2091_v35 = vadd.f32 %v3676_v63, %v2090_v55 }
 0x2ca   : > { %2036 = vmatpush.msra.mxu1 %v965_v45  ;;  %v6014_v42 = vsel %vm2092_vm14, %v3676_v63, %v2091_v35  ;;  %v2298_v35 = vld [vmem:[#allocation7 + $0x6] ss:$8 sm:$0xf]  ;;  %vm7702_vm14 = vmmov %vm7697_vm0 }
 0x2cb   : > { %7693 = vst [vmem:[#allocation32_spill] sm:$0xff] %v6014_v42 }
 0x2cc   : > { %2037 = vmatpush.msra.mxu1 %v937_v3 }
 0x2ce   : > { %2038 = vmatpush.msra.mxu1 %v909_v23 }
 0x2d0   : > { %2039 = vmatpush.msra.mxu1 %v881_v56 }
 0x2d1   : > { %2040 = vmatmul.f32.vlgmr.msra.gmra.mxu1 %v5657_v53 }
 0x2d6   : > { %v1801_v14 = vpop.f32.mrf.mxu1 }
 0x2d8   : > { %v1758_v36 = vpop.permute.xlu0 %1757 }
 0x2d9   : > { %v1782_v18 = vadd.f32 %v1781_v30, %v1758_v36  ;;  %v1862_v15 = vadd.f32 %v1861_v32, %v1758_v36  ;;  %v1942_v20 = vadd.f32 %v1941_v22, %v1758_v36 }
 0x2db   : > { %v1802_v31 = vadd.f32 %v1801_v14, %v1782_v18 }
 0x2dd   : > { %v1822_v60 = vadd.f32 %v1821_v7, %v1802_v31 }
 0x2df   : > { %v5999_v16 = vadd.f32 %v1841_v52, %v1822_v60 }
 0x2e1   : > { %v2095_v53 = vmul.f32 %v5999_v16, %v5999_v16 }
 0x2e7   : > { %v2021_v26 = vpop.f32.mrf.mxu3 }
 0x2e8   : > { %v2022_v41 = vadd.f32 %v2021_v26, %v1758_v36  ;;  %v2368_v26 = vld [vmem:[%s7232_s6] sm:$0xff] }
 0x304   : > { %v1881_v10 = vpop.f32.mrf.mxu0 }
 0x305   : > { %v1882_v2 = vadd.f32 %v1881_v10, %v1862_v15 }
 0x313   : > { %v1961_v27 = vpop.f32.mrf.mxu2 }
 0x314   : > { %v1962_v9 = vadd.f32 %v1961_v27, %v1942_v20 }
 0x32e   : > { %v1901_v57 = vpop.f32.mrf.mxu1  ;;  %v1981_v34 = vpop.f32.mrf.mxu0 }
 0x32f   : > { %v1902_v46 = vadd.f32 %v1901_v57, %v1882_v2  ;;  %v1982_v21 = vadd.f32 %v1981_v34, %v1962_v9 }
 0x331   : > { %v1922_v61 = vadd.f32 %v1921_v58, %v1902_v46 }
 0x333   : > { %v2084_v5 = vadd.f32 %v1922_v61, %v5999_v16  ;;  %v2096_v33 = vmul.f32 %v1922_v61, %v1922_v61 }
 0x335   : > { %2085 = vadd.xlane.f32.xlu1 %v2084_v5  ;;  %v2097_v49 = vadd.f32 %v2096_v33, %v2095_v53 }
 0x336   : > { %v2001_v11 = vpop.f32.mrf.mxu0  ;;  %v2061_v29 = vpop.f32.mrf.mxu2 }
 0x337   : > { %2098 = vadd.xlane.f32.xlu2 %v2097_v49  ;;  %v6004_v6 = vadd.f32 %v2001_v11, %v1982_v21 }
 0x339   : > { %v2123_v39 = vmul.f32 %v6004_v6, %v6004_v6 }
 0x33e   : > { %v2081_v40 = vpop.f32.mrf.mxu0 }
 0x34e   : > { %v2041_v38 = vpop.f32.mrf.mxu1 }
 0x34f   : > { %v2042_v0 = vadd.f32 %v2041_v38, %v2022_v41  ;;  %v2352_v38 = vld [vmem:[#allocation7 + $0x20] ss:$8 sm:$0xf] }
 0x351   : > { %v2062_v48 = vadd.f32 %v2061_v29, %v2042_v0  ;;  %v6100_v29 = vperm.slane %v2352_v38, 0 }
 0x353   : > { %v6006_v1 = vadd.f32 %v2081_v40, %v2062_v48 }
 0x355   : > { %v2124_v17 = vmul.f32 %v6006_v1, %v6006_v1  ;;  %v2119_v62 = vadd.f32 %v6006_v1, %v6004_v6 }
 0x357   : > { %2120 = vadd.xlane.f32.xlu0 %v2119_v62  ;;  %v2125_v13 = vadd.f32 %v2124_v17, %v2123_v39  ;;  %v6111_v62 = vperm.slane %v2352_v38, 3 }
 0x359   : > { %2126 = vadd.xlane.f32.xlu2 %v2125_v13  ;;  %7698 = vst [vmem:[#allocation20_spill] sm:$0xff] %v6111_v62 }
 0x3a8   : > { %v2086_v25 = vpop.xlane.xlu1 %2085 }
 0x3a9   : > { %v2094_v4 = vmul.f32 %v6014_v42, %v2086_v25  ;;  %v6120_v25 = vld [vmem:[#allocation7 + $0x5] ss:$8 sm:$0xf] }
 0x3aa   : > { %v2099_v51 = vpop.xlane.xlu2 %2098 }
 0x3ab   : > { %v2100_v24 = vmul.f32 %v2099_v51, %v6014_v42  ;;  %v2101_v45 = vmul.f32 %v2094_v4, %v2094_v4  ;;  %v2104_v56 = vsub.f32 %v5999_v16, %v2094_v4  ;;  %v2105_v7 = vsub.f32 %v1922_v61, %v2094_v4 }
 0x3ac   : > { %v6124_v51 = vperm.slane %v2298_v35, 0 }
 0x3ad   : > { %v2102_v8 = vsub.f32 %v2100_v24, %v2101_v45  ;;  %v6127_v24 = vperm.slane %v6120_v25, 0 }
 0x3af   : > { %v2103_v28 = vmax.f32 %v2102_v8, 0.0 }
 0x3b1   : > { %v2106_v37 = vadd.f32 1e-05, %v2103_v28 }
 0x3b3   : > { %3677 = vrsqrt.f32 %v2106_v37  ;;  %vm2113_vm11 = vweird.f32 %v2106_v37 }
 0x3b9   : > { %v3678_v3 = vpop.eup %3677 }
 0x3ba   : > { %v2108_v19 = vmul.f32 %v3678_v3, %v2106_v37  ;;  %vm2114_vm15 = vweird.f32 %v3678_v3 }
 0x3bb   : > { %vm2115_vm10 = vmor %vm2113_vm11, %vm2114_vm15 }
 0x3bc   : > { %v2109_v43 = vmul.f32 %v3678_v3, %v2108_v19  ;;  %vm7703_vm15 = vmmov %vm7697_vm0 }
 0x3bd   : > { %vm7705_vm11 = vmmov %vm7700_vm7 }
 0x3be   : > { %v2110_v54 = vmul.f32 0.5, %v2109_v43  ;;  %v6139_v43 = vperm.slane %v2352_v38, 1 }
 0x3c0   : > { %v2111_v47 = vsub.f32 1.5, %v2110_v54  ;;  %v6141_v54 = vperm.slane %v2352_v38, 2 }
 0x3c2   : > { %v2112_v23 = vmul.f32 %v3678_v3, %v2111_v47  ;;  %7701 = vst [vmem:[#allocation45_spill] sm:$0xff] %v6141_v54 }
 0x3c4   : > { %v2116_v30 = vsel %vm2115_vm10, %v3678_v3, %v2112_v23  ;;  %vm7708_vm10 = vmmov %vm7700_vm7 }
 0x3c5   : > { %v2117_v36 = vmul.f32 %v2116_v30, %v2104_v56  ;;  %v2118_v18 = vmul.f32 %v2116_v30, %v2105_v7 }
 0x3c7   : > { %v6019_v14 = vmax.f32 %v2117_v36, 0.0  ;;  %v6021_v32 = vmax.f32 %v2118_v18, 0.0  ;;  %v6151_v18 = vperm.slane %v2298_v35, 1 }
 0x3c9   : > { %2341 = vrot.lane.b32.xlu2 %v6021_v32, %s7541_s2  ;;  %2312 = vrot.lane.b32.xlu0 %v6019_v14, %s7694_s14 }
 0x3ca   : > { %v2121_v31 = vpop.xlane.xlu0 %2120  ;;  %2339 = vrot.lane.b32.xlu1 %v6019_v14, %s7541_s2 }
 0x3cb   : > { %v2122_v15 = vmul.f32 %v2121_v31, %v6014_v42 }
 0x3cc   : > { %v2127_v52 = vpop.xlane.xlu2 %2126 }
 0x3cd   : > { %v2129_v10 = vmul.f32 %v2122_v15, %v2122_v15  ;;  %v2128_v60 = vmul.f32 %v2127_v52, %v6014_v42  ;;  %v2132_v49 = vsub.f32 %v6004_v6, %v2122_v15  ;;  %v2133_v34 = vsub.f32 %v6006_v1, %v2122_v15  ;;  %v2325_v1 = vld [vmem:[#allocation7 + $0x7] ss:$8 sm:$0xf]  ;;  %v6157_v52 = vld [vmem:[#allocation7 + $0x3] ss:$8 sm:$0xf] }
 0x3ce   : > { %v6109_v17 = vperm.slane %v2325_v1, 0  ;;  %v6143_v23 = vperm.slane %v2325_v1, 1 }
 0x3cf   : > { %v2130_v2 = vsub.f32 %v2128_v60, %v2129_v10 }
 0x3d1   : > { %v2131_v57 = vmax.f32 %v2130_v2, 0.0  ;;  %2285 = vrot.lane.b32.xlu2 %v6019_v14, %s7695_s13  ;;  %2258 = vrot.lane.b32.xlu0 %v6019_v14, %s3990_s18 }
 0x3d2   : > { %2314 = vrot.lane.b32.xlu1 %v6021_v32, %s7694_s14 }
 0x3d3   : > { %v2134_v16 = vadd.f32 1e-05, %v2131_v57  ;;  %v6164_v57 = vperm.slane %v6157_v52, 0 }
 0x3d5   : > { %3679 = vrsqrt.f32 %v2134_v16  ;;  %vm2141_vm12 = vweird.f32 %v2134_v16 }
 0x3d9   : > { %2260 = vrot.lane.b32.xlu2 %v6021_v32, %s3990_s18 }
 0x3da   : > { %2287 = vrot.lane.b32.xlu1 %v6021_v32, %s7695_s13 }
 0x3db   : > { %v3680_v46 = vpop.eup %3679 }
 0x3dc   : > { %v2136_v58 = vmul.f32 %v3680_v46, %v2134_v16  ;;  %vm2142_vm9 = vweird.f32 %v3680_v46 }
 0x3dd   : > { %vm2143_vm3 = vmor %vm2141_vm12, %vm2142_vm9  ;;  %vm2380_vm12 = vcmask 588800  }
 0x3de   : > { %v2137_v61 = vmul.f32 %v3680_v46, %v2136_v58  ;;  %vm7709_vm9 = vmmov %vm7700_vm7 }
 0x3e0   : > { %v2138_v53 = vmul.f32 0.5, %v2137_v61 }
 0x3e2   : > { %v2139_v5 = vsub.f32 1.5, %v2138_v53  ;;  %v6172_v53 = vld [vmem:[#allocation7 + $0x2] ss:$8 sm:$0xf] }
 0x3e4   : > { %v2140_v33 = vmul.f32 %v3680_v46, %v2139_v5  ;;  %v6175_v5 = vperm.slane %v6172_v53, 0 }
 0x3e6   : > { %v2144_v22 = vsel %vm2143_vm3, %v3680_v46, %v2140_v33  ;;  %v6177_v33 = vperm.slane %v2325_v1, 2 }
 0x3e7   : > { %v2145_v20 = vmul.f32 %v2144_v22, %v2132_v49  ;;  %v2146_v27 = vmul.f32 %v2144_v22, %v2133_v34  ;;  %v6179_v49 = vperm.slane %v2325_v1, 3  ;;  %v6196_v1 = vperm.slane %v2298_v35, 3 }
 0x3e9   : > { %v6043_v11 = vmax.f32 %v2145_v20, 0.0  ;;  %v6045_v9 = vmax.f32 %v2146_v27, 0.0  ;;  %7704 = vst [vmem:[#allocation17_spill] sm:$0xff] %v6196_v1 }
 0x3eb   : > { %2345 = vrot.lane.b32.xlu2 %v6045_v9, %s7541_s2  ;;  %2316 = vrot.lane.b32.xlu0 %v6043_v11, %s7694_s14 }
 0x3ec   : > { %2343 = vrot.lane.b32.xlu1 %v6043_v11, %s7541_s2 }
 0x3f3   : > { %2289 = vrot.lane.b32.xlu2 %v6043_v11, %s7695_s13  ;;  %2237 = vrot.lane.b32.xlu0 %v6045_v9, %s7696_s25 }
 0x3f4   : > { %2231 = vrot.lane.b32.xlu1 %v6019_v14, %s7696_s25 }
 0x3fb   : > { %2210 = vrot.lane.b32.xlu2 %v6045_v9, %s3997_s20  ;;  %2204 = vrot.lane.b32.xlu0 %v6019_v14, %s3997_s20 }
 0x3fc   : > { %2318 = vrot.lane.b32.xlu1 %v6045_v9, %s7694_s14 }
 0x403   : > { %2177 = vrot.lane.b32.xlu2 %v6019_v14, %s3998_s23  ;;  %2291 = vrot.lane.b32.xlu0 %v6045_v9, %s7695_s13 }
 0x404   : > { %2262 = vrot.lane.b32.xlu1 %v6043_v11, %s3990_s18 }
 0x40b   : > { %2151 = vrot.lane.b32.xlu2 %v6019_v14, %s3999_s7  ;;  %2264 = vrot.lane.b32.xlu0 %v6045_v9, %s3990_s18 }
 0x40c   : > { %2183 = vrot.lane.b32.xlu1 %v6045_v9, %s3998_s23 }
 0x413   : > { %2206 = vrot.lane.b32.xlu2 %v6021_v32, %s3997_s20  ;;  %2233 = vrot.lane.b32.xlu0 %v6021_v32, %s7696_s25 }
 0x414   : > { %2157 = vrot.lane.b32.xlu1 %v6045_v9, %s3999_s7 }
 0x41b   : > { %2208 = vrot.lane.b32.xlu2 %v6043_v11, %s3997_s20  ;;  %2179 = vrot.lane.b32.xlu0 %v6021_v32, %s3998_s23 }
 0x41c   : > { %2235 = vrot.lane.b32.xlu1 %v6043_v11, %s7696_s25 }
 0x423   : > { %2155 = vrot.lane.b32.xlu2 %v6043_v11, %s3999_s7  ;;  %2181 = vrot.lane.b32.xlu0 %v6043_v11, %s3998_s23  ;;  %v2342_v41 = vpop.permute.xlu2 %2341 }
 0x424   : > { %2153 = vrot.lane.b32.xlu1 %v6021_v32, %s3999_s7 }
 0x42b   : > { %2372 = vperm.xlu0 %3672, %v2368_v26   ;;  %v6098_v21 = vpop.permute.xlu2 %2285 }
 0x433   : > { %v6102_v40 = vpop.permute.xlu2 %2260 }
 0x43b   : > { %v6107_v39 = vpop.permute.xlu0 %2312 }
 0x43c   : > { %v2340_v0 = vpop.permute.xlu1 %2339 }
 0x43d   : > { %v2349_v6 = vsel %vm7697_vm0, %v2340_v0, %v2342_v41 }
 0x43e   : > { %v2362_v48 = vmul.f32 %v6100_v29, %v2349_v6 }
 0x440   : > { %2394 = vmatpush.msrb.mxu3 %v2362_v48  ;;  %v6194_v48 = vperm.slane %v2298_v35, 2 }
 0x443   : > { %v6122_v4 = vpop.permute.xlu0 %2258 }
 0x444   : > { %v2315_v13 = vpop.permute.xlu1 %2314  ;;  %v2268_v8 = vsel %vm7700_vm7, %v6122_v4, %v6102_v40 }
 0x445   : > { %v2322_v59 = vsel %vm1254_vm8, %v6107_v39, %v2315_v13  ;;  %v2346_v63 = vpop.permute.xlu2 %2345  ;;  %v2281_v3 = vmul.f32 %v6127_v24, %v2268_v8 }
 0x446   : > { %v2335_v44 = vmul.f32 %v6109_v17, %v2322_v59  ;;  %v2350_v50 = vsel %vm7699_vm4, %v2346_v63, %v2340_v0  ;;  %v6199_v59 = vperm.slane %v6120_v25, 1 }
 0x447   : > { %v2365_v55 = vmul.f32 %v6111_v62, %v2350_v50 }
 0x448   : > { %2395 = vmatpush.msrb.mxu3 %v2335_v44 }
 0x449   : > { %2463 = vmatpush.msrb.mxu2 %v2365_v55 }
 0x44c   : > { %v2288_v45 = vpop.permute.xlu1 %2287 }
 0x44d   : > { %v2295_v28 = vsel %vm1226_vm13, %v6098_v21, %v2288_v45  ;;  %v2290_v19 = vpop.permute.xlu2 %2289 }
 0x44e   : > { %v2308_v37 = vmul.f32 %v6124_v51, %v2295_v28  ;;  %v2294_v15 = vsel %vm1226_vm13, %v2288_v45, %v2290_v19  ;;  %v2190_v28 = vld [vmem:[#allocation7 + $0x1] ss:$8 sm:$0xf] }
 0x44f   : > { %v2309_v2 = vmul.f32 %v6151_v18, %v2294_v15  ;;  %v6245_v15 = vperm.slane %v6172_v53, 1 }
 0x450   : > { %2396 = vmatpush.msrb.mxu3 %v2308_v37  ;;  %v6215_v37 = vperm.slane %v6120_v25, 2 }
 0x452   : > { %2397 = vmatpush.msrb.mxu3 %v2281_v3  ;;  %7706 = vst [vmem:[#allocation46_spill] sm:$0xff] %v6215_v37  ;;  %v6220_v3 = vperm.slane %v2190_v28, 0 }
 0x454   : > { %2398 = vmatpush.msrb.mxu3 %v6019_v14 }
 0x455   : > { %v6160_v60 = vpop.permute.xlu2 %2210 }
 0x45d   : > { %v2317_v47 = vpop.permute.xlu0 %2316  ;;  %v6181_v34 = vpop.permute.xlu2 %2177 }
 0x45e   : > { %v2344_v56 = vpop.permute.xlu1 %2343  ;;  %v2321_v7 = vsel %vm1254_vm8, %v2315_v13, %v2317_v47 }
 0x45f   : > { %v2347_v30 = vsel %vm7702_vm14, %v2344_v56, %v2346_v63  ;;  %v2348_v36 = vsel %vm7703_vm15, %v2342_v41, %v2344_v56  ;;  %v2336_v10 = vmul.f32 %v6143_v23, %v2321_v7 }
 0x460   : > { %v2363_v14 = vmul.f32 %v6139_v43, %v2348_v36  ;;  %v2364_v31 = vmul.f32 %v6141_v54, %v2347_v30 }
 0x462   : > { %2417 = vmatpush.msrb.mxu0 %v2363_v14  ;;  %2440 = vmatpush.msrb.mxu1 %v2364_v31  ;;  %v2163_v14 = vld [vmem:[#allocation7] ss:$8 sm:$0xf] }
 0x463   : > { %v6242_v31 = vperm.slane %v2163_v14, 0 }
 0x464   : > { %2418 = vmatpush.msrb.mxu0 %v2336_v10 }
 0x465   : > { %v6166_v16 = vpop.permute.xlu0 %2237  ;;  %v6206_v50 = vpop.permute.xlu2 %2151 }
 0x466   : > { %2419 = vmatpush.msrb.mxu0 %v2309_v2  ;;  %v2232_v46 = vpop.permute.xlu1 %2231  ;;  %v2369_v2 = vld [vmem:[%s7232_s6 + $0x8] sm:$0xff] }
 0x467   : > { %v2242_v58 = vsel %vm1058_vm5, %v6166_v16, %v2232_v46  ;;  %2377 = vperm.xlu1 %3673, %v2369_v2  }
 0x468   : > { %v2254_v61 = vmul.f32 %v6164_v57, %v2242_v58 }
 0x46a   : > { %2399 = vmatpush.msrb.mxu3 %v2254_v61 }
 0x46d   : > { %v2205_v22 = vpop.permute.xlu0 %2204  ;;  %v2207_v36 = vpop.permute.xlu2 %2206 }
 0x46e   : > { %v2215_v20 = vsel %vm918_vm2, %v6160_v60, %v2205_v22  ;;  %v2319_v27 = vpop.permute.xlu1 %2318  ;;  %v2214_v58 = vsel %vm918_vm2, %v2205_v22, %v2207_v36 }
 0x46f   : > { %v2227_v26 = vmul.f32 %v6175_v5, %v2215_v20  ;;  %v2320_v41 = vsel %vm1254_vm8, %v2317_v47, %v2319_v27  ;;  %v2323_v38 = vsel %vm1254_vm8, %v2319_v27, %v6107_v39  ;;  %v2228_v22 = vmul.f32 %v6245_v15, %v2214_v58 }
 0x470   : > { %v2337_v0 = vmul.f32 %v6177_v33, %v2320_v41  ;;  %v2338_v6 = vmul.f32 %v6179_v49, %v2323_v38  ;;  %v6264_v41 = vperm.slane %v2190_v28, 1  ;;  %v6267_v38 = vperm.slane %v6157_v52, 2 }
 0x471   : > { %2400 = vmatpush.msrb.mxu3 %v2227_v26  ;;  %v2366_v26 = vld [vmem:[%s7231_s5] sm:$0xff] }
 0x472   : > { %2441 = vmatpush.msrb.mxu1 %v2337_v0  ;;  %2464 = vmatpush.msrb.mxu2 %v2338_v6  ;;  %7710 = vst [vmem:[#allocation36_spill] sm:$0xff] %v6267_v38  ;;  %v6270_v0 = vperm.slane %v6157_v52, 3 }
 0x474   : > { %7711 = vst [vmem:[#allocation53_spill] sm:$0xff] %v6270_v0 }
 0x475   : > { %v2292_v13 = vpop.permute.xlu0 %2291 }
 0x476   : > { %v2293_v63 = vsel %vm1226_vm13, %v2290_v19, %v2292_v13  ;;  %v2296_v39 = vsel %vm1226_vm13, %v2292_v13, %v6098_v21  ;;  %v2263_v44 = vpop.permute.xlu1 %2262  ;;  %v6218_v21 = vperm.slane %v6120_v25, 3  ;;  %v6273_v13 = vperm.slane %v6172_v53, 2 }
 0x477   : > { %v2310_v55 = vmul.f32 %v6194_v48, %v2293_v63  ;;  %v2311_v45 = vmul.f32 %v6196_v1, %v2296_v39  ;;  %v2267_v35 = vsel %vm7705_vm11, %v6102_v40, %v2263_v44  ;;  %v6276_v63 = vperm.slane %v6172_v53, 3 }
 0x478   : > { %v2282_v8 = vmul.f32 %v6199_v59, %v2267_v35  ;;  %7707 = vst [vmem:[#allocation16_spill] sm:$0xff] %v6218_v21 }
 0x479   : > { %2442 = vmatpush.msrb.mxu1 %v2310_v55  ;;  %2465 = vmatpush.msrb.mxu2 %v2311_v45  ;;  %7712 = vst [vmem:[#allocation28_spill] sm:$0xff] %v6273_v13 }
 0x47a   : > { %2420 = vmatpush.msrb.mxu0 %v2282_v8  ;;  %7713 = vst [vmem:[#allocation47_spill] sm:$0xff] %v6276_v63 }
 0x47c   : > { %2421 = vmatpush.msrb.mxu0 %v6021_v32 }
 0x47d   : > { %v2265_v19 = vpop.permute.xlu0 %2264 }
 0x47e   : > { %v2266_v40 = vsel %vm7708_vm10, %v2263_v44, %v2265_v19  ;;  %v2269_v47 = vsel %vm7709_vm9, %v2265_v19, %v6122_v4  ;;  %v6228_v56 = vpop.permute.xlu1 %2183  ;;  %v6240_v4 = vperm.slane %v6157_v52, 1 }
 0x47f   : > { %v2283_v7 = vmul.f32 %v6215_v37, %v2266_v40  ;;  %v2284_v30 = vmul.f32 %v6218_v21, %v2269_v47  ;;  %v2188_v25 = vsel %vm890_vm1, %v6228_v56, %v6181_v34  ;;  %v6299_v47 = vperm.slane %v2190_v28, 2 }
 0x480   : > { %v2200_v32 = vmul.f32 %v6220_v3, %v2188_v25 }
 0x481   : > { %2443 = vmatpush.msrb.mxu1 %v2283_v7  ;;  %2466 = vmatpush.msrb.mxu2 %v2284_v30  ;;  %7714 = vst [vmem:[#allocation37_spill] sm:$0xff] %v6299_v47  ;;  %v6304_v7 = vperm.slane %v2163_v14, 1 }
 0x482   : > { %2401 = vmatpush.msrb.mxu3 %v2200_v32  ;;  %v6306_v32 = vperm.slane %v2163_v14, 2 }
 0x483   : > { %2444 = vmatpush.msrb.mxu1 %v6043_v11  ;;  %2467 = vmatpush.msrb.mxu2 %v6045_v9 }
 0x484   : > { %7716 = vst [vmem:[#allocation40_spill] sm:$0xff] %v6306_v32 }
 0x485   : > { %v2234_v10 = vpop.permute.xlu0 %2233 }
 0x486   : > { %v2241_v11 = vsel %vm1058_vm5, %v2232_v46, %v2234_v10  ;;  %v2158_v9 = vpop.permute.xlu1 %2157  ;;  %v2209_v46 = vpop.permute.xlu2 %2208 }
 0x487   : > { %v2255_v61 = vmul.f32 %v6240_v4, %v2241_v11  ;;  %v2162_v20 = vsel %vm862_vm6, %v2158_v9, %v6206_v50  ;;  %v2212_v39 = vsel %vm918_vm2, %v2209_v46, %v6160_v60  ;;  %v2213_v52 = vsel %vm918_vm2, %v2207_v36, %v2209_v46 }
 0x488   : > { %v2173_v27 = vmul.f32 %v6242_v31, %v2162_v20  ;;  %v2229_v19 = vmul.f32 %v6273_v13, %v2213_v52  ;;  %v2230_v40 = vmul.f32 %v6276_v63, %v2212_v39  ;;  %v6308_v36 = vperm.slane %v2163_v14, 3 }
 0x489   : > { %2422 = vmatpush.msrb.mxu0 %v2255_v61 }
 0x48a   : > { %2402 = vmatpush.msrb.mxu3 %v2173_v27  ;;  %7717 = vst [vmem:[#allocation65_spill] sm:$0xff] %v6308_v36 }
 0x48b   : > { %3509 = vmatmul.msk.f32.vlgmr.msrb.gmra.mxu3 %vm2380_vm12, %v2366_v26  ;;  %2423 = vmatpush.msrb.mxu0 %v2228_v22 }
 0x48d   : > { %v2180_v6 = vpop.permute.xlu0 %2179 }
 0x48e   : > { %v2187_v44 = vsel %vm890_vm1, %v6181_v34, %v2180_v6  ;;  %v2236_v55 = vpop.permute.xlu1 %2235  ;;  %v2367_v34 = vld [vmem:[%s7231_s5 + $0x8] sm:$0xff]  ;;  %v2156_v30 = vpop.permute.xlu2 %2155 }
 0x48f   : > { %v2201_v45 = vmul.f32 %v6264_v41, %v2187_v44  ;;  %v2239_v35 = vsel %vm1058_vm5, %v2236_v55, %v6166_v16  ;;  %v2240_v53 = vsel %vm1058_vm5, %v2234_v10, %v2236_v55  ;;  %v6301_v16 = vperm.slane %v2190_v28, 3 }
 0x490   : > { %v2256_v8 = vmul.f32 %v6267_v38, %v2240_v53  ;;  %v2257_v60 = vmul.f32 %v6270_v0, %v2239_v35  ;;  %v2159_v10 = vsel %vm862_vm6, %v2156_v30, %v2158_v9 }
 0x491   : > { %2424 = vmatpush.msrb.mxu0 %v2201_v45  ;;  %7715 = vst [vmem:[#allocation59_spill] sm:$0xff] %v6301_v16 }
 0x492   : > { %2445 = vmatpush.msrb.mxu1 %v2256_v8  ;;  %2468 = vmatpush.msrb.mxu2 %v2257_v60 }
 0x493   : > { %3510 = vmatmul.msk.f32.gmra.mxu3 %vm2380_vm12, %v2367_v34 }
 0x494   : > { %2446 = vmatpush.msrb.mxu1 %v2229_v19  ;;  %2469 = vmatpush.msrb.mxu2 %v2230_v40 }
 0x495   : > { %v2182_v25 = vpop.permute.xlu0 %2181 }
 0x496   : > { %v2185_v28 = vsel %vm890_vm1, %v2182_v25, %v6228_v56  ;;  %v2186_v2 = vsel %vm890_vm1, %v2180_v6, %v2182_v25  ;;  %v2154_v58 = vpop.permute.xlu1 %2153  ;;  %v2176_v56 = vmul.f32 %v6308_v36, %v2159_v10 }
 0x497   : > { %v2202_v11 = vmul.f32 %v6299_v47, %v2186_v2  ;;  %v2203_v61 = vmul.f32 %v6301_v16, %v2185_v28  ;;  %v2160_v20 = vsel %vm862_vm6, %v2154_v58, %v2156_v30  ;;  %v2161_v14 = vsel %vm862_vm6, %v6206_v50, %v2154_v58 }
 0x498   : > { %v2174_v9 = vmul.f32 %v6304_v7, %v2161_v14  ;;  %v2175_v27 = vmul.f32 %v6306_v32, %v2160_v20 }
 0x499   : > { %2447 = vmatpush.msrb.mxu1 %v2202_v11  ;;  %2470 = vmatpush.msrb.mxu2 %v2203_v61 }
 0x49a   : > { %2425 = vmatpush.msrb.mxu0 %v2174_v9 }
 0x49b   : > { %3511 = vmatmul.msk.f32.vlgmr.msrb.gmra.mxu0 %vm2380_vm12, %v2366_v26  ;;  %2448 = vmatpush.msrb.mxu1 %v2175_v27 }
 0x49c   : > { %2471 = vmatpush.msrb.mxu2 %v2176_v56  ;;  %3513 = vmatmul.msk.f32.vlgmr.msrb.gmra.mxu1 %vm2380_vm12, %v2366_v26 }
 0x49d   : > { %3515 = vmatmul.msk.f32.vlgmr.msrb.gmra.mxu2 %vm2380_vm12, %v2366_v26  ;;  %v2373_v22 = vpop.permute.xlu0 %2372 }
 0x4a3   : > { %3512 = vmatmul.msk.f32.gmra.mxu0 %vm2380_vm12, %v2367_v34 }
 0x4a4   : > { %3514 = vmatmul.msk.f32.gmra.mxu1 %vm2380_vm12, %v2367_v34 }
 0x4a5   : > { %3516 = vmatmul.msk.f32.gmra.mxu2 %vm2380_vm12, %v2367_v34 }
 0x4d9   : > { %v2378_v35 = vpop.permute.xlu1 %2377 }
 0x50e   : > { %v2404_v50 = vpop.f32.mrf.mxu3 }
 0x50f   : > { %v6333_v46 = vadd.f32 %v2404_v50, %v2373_v22 }
 0x511   : > { %v2487_v55 = vmul.f32 %v6333_v46, %v6333_v46 }
 0x516   : > { %v2407_v45 = vpop.f32.mrf.mxu3 }
 0x517   : > { %v6345_v60 = vadd.f32 %v2407_v45, %v2378_v35 }
 0x518   : > { %v2427_v6 = vpop.f32.mrf.mxu0 }
 0x519   : > { %v6335_v39 = vadd.f32 %v2427_v6, %v2373_v22  ;;  %v2450_v44 = vpop.f32.mrf.mxu1  ;;  %v2489_v20 = vmul.f32 %v6345_v60, %v6345_v60 }
 0x51a   : > { %v6343_v8 = vadd.f32 %v2450_v44, %v2373_v22 }
 0x51b   : > { %v2488_v26 = vmul.f32 %v6335_v39, %v6335_v39  ;;  %v2479_v52 = vadd.f32 %v6335_v39, %v6333_v46 }
 0x51c   : > { %v2543_v10 = vmul.f32 %v6343_v8, %v6343_v8 }
 0x51d   : > { %2480 = vadd.xlane.f32.xlu1 %v2479_v52  ;;  %v2491_v53 = vadd.f32 %v2488_v26, %v2487_v55 }
 0x51f   : > { %2492 = vadd.xlane.f32.xlu2 %v2491_v53 }
 0x520   : > { %v2473_v34 = vpop.f32.mrf.mxu2  ;;  %v2430_v19 = vpop.f32.mrf.mxu0 }
 0x521   : > { %v6347_v40 = vadd.f32 %v2473_v34, %v2373_v22  ;;  %v6349_v30 = vadd.f32 %v2430_v19, %v2378_v35  ;;  %v2453_v25 = vpop.f32.mrf.mxu1 }
 0x522   : > { %v6359_v61 = vadd.f32 %v2453_v25, %v2378_v35 }
 0x523   : > { %v2544_v28 = vmul.f32 %v6347_v40, %v6347_v40  ;;  %v2535_v2 = vadd.f32 %v6347_v40, %v6343_v8  ;;  %v2482_v58 = vadd.f32 %v6349_v30, %v6345_v60  ;;  %v2490_v14 = vmul.f32 %v6349_v30, %v6349_v30 }
 0x524   : > { %v2545_v27 = vmul.f32 %v6359_v61, %v6359_v61 }
 0x525   : > { %2536 = vadd.xlane.f32.xlu0 %v2535_v2  ;;  %v2547_v11 = vadd.f32 %v2544_v28, %v2543_v10  ;;  %v2494_v50 = vadd.f32 %v2490_v14, %v2489_v20 }
 0x527   : > { %2548 = vadd.xlane.f32.xlu1 %v2547_v11  ;;  %2483 = vadd.xlane.f32.xlu2 %v2482_v58 }
 0x528   : > { %v2476_v9 = vpop.f32.mrf.mxu2 }
 0x529   : > { %v6367_v56 = vadd.f32 %v2476_v9, %v2378_v35 }
 0x52b   : > { %v2546_v22 = vmul.f32 %v6367_v56, %v6367_v56  ;;  %v2538_v6 = vadd.f32 %v6367_v56, %v6359_v61 }
 0x52d   : > { %2495 = vadd.xlane.f32.xlu0 %v2494_v50  ;;  %v2550_v44 = vadd.f32 %v2546_v22, %v2545_v27 }
 0x52f   : > { %2539 = vadd.xlane.f32.xlu1 %v2538_v6  ;;  %2551 = vadd.xlane.f32.xlu2 %v2550_v44 }
 0x590   : > { %v2481_v55 = vpop.xlane.xlu1 %2480 }
 0x591   : > { %v2485_v26 = vmul.f32 %v2481_v55, %v6014_v42 }
 0x592   : > { %v2493_v52 = vpop.xlane.xlu2 %2492 }
 0x593   : > { %v2497_v45 = vmul.f32 %v2493_v52, %v6014_v42  ;;  %v2499_v53 = vmul.f32 %v2485_v26, %v2485_v26 }
 0x595   : > { %v2501_v35 = vsub.f32 %v2497_v45, %v2499_v53 }
 0x597   : > { %v2503_v34 = vmax.f32 %v2501_v35, 0.0 }
 0x598   : > { %v2537_v19 = vpop.xlane.xlu0 %2536 }
 0x599   : > { %v2509_v25 = vadd.f32 1e-05, %v2503_v34  ;;  %v6376_v10 = vmul.f32 %v2537_v19, %v6014_v42  ;;  %v2505_v19 = vsub.f32 %v6333_v46, %v2485_v26 }
 0x59a   : > { %v2549_v28 = vpop.xlane.xlu1 %2548  ;;  %v2484_v11 = vpop.xlane.xlu2 %2483 }
 0x59b   : > { %3681 = vrsqrt.f32 %v2509_v25  ;;  %v2555_v2 = vmul.f32 %v6376_v10, %v6376_v10  ;;  %v2553_v58 = vmul.f32 %v2549_v28, %v6014_v42  ;;  %v6382_v27 = vmul.f32 %v2484_v11, %v6014_v42 }
 0x59c   : > { %vm2517_vm0 = vweird.f32 %v2509_v25  ;;  %v2506_v28 = vsub.f32 %v6335_v39, %v2485_v26 }
 0x59d   : > { %v2557_v20 = vsub.f32 %v2553_v58, %v2555_v2  ;;  %v2500_v44 = vmul.f32 %v6382_v27, %v6382_v27 }
 0x59f   : > { %v2559_v22 = vmax.f32 %v2557_v20, 0.0 }
 0x5a0   : > { %v2496_v14 = vpop.xlane.xlu0 %2495 }
 0x5a1   : > { %v3682_v9 = vpop.eup %3681  ;;  %v2498_v6 = vmul.f32 %v2496_v14, %v6014_v42  ;;  %v2565_v45 = vadd.f32 1e-05, %v2559_v22 }
 0x5a2   : > { %v2512_v50 = vmul.f32 %v3682_v9, %v2509_v25  ;;  %vm2518_vm3 = vweird.f32 %v3682_v9 }
 0x5a3   : > { %v2502_v53 = vsub.f32 %v2498_v6, %v2500_v44  ;;  %vm2519_vm4 = vmor %vm2517_vm0, %vm2518_vm3  ;;  %3683 = vrsqrt.f32 %v2565_v45  ;;  %vm2573_vm14 = vweird.f32 %v2565_v45 }
 0x5a4   : > { %v2513_v55 = vmul.f32 %v3682_v9, %v2512_v50 }
 0x5a5   : > { %v2504_v2 = vmax.f32 %v2502_v53, 0.0 }
 0x5a6   : > { %v2514_v52 = vmul.f32 0.5, %v2513_v55 }
 0x5a7   : > { %v2510_v22 = vadd.f32 1e-05, %v2504_v2 }
 0x5a8   : > { %v2515_v35 = vsub.f32 1.5, %v2514_v52 }
 0x5a9   : > { %v3684_v6 = vpop.eup %3683  ;;  %3685 = vrsqrt.f32 %v2510_v22  ;;  %vm2527_vm11 = vweird.f32 %v2510_v22 }
 0x5aa   : > { %v2516_v34 = vmul.f32 %v3682_v9, %v2515_v35  ;;  %v2568_v46 = vmul.f32 %v3684_v6, %v2565_v45  ;;  %vm2574_vm7 = vweird.f32 %v3684_v6 }
 0x5ab   : > { %vm2575_vm15 = vmor %vm2573_vm14, %vm2574_vm7  ;;  %vm7727_vm14 = vcmp.lt.s32.totalorder %v4260_v12, 111 }
 0x5ac   : > { %v2520_v58 = vsel %vm2519_vm4, %v3682_v9, %v2516_v34  ;;  %v2569_v39 = vmul.f32 %v3684_v6, %v2568_v46  ;;  %vm7724_vm4 = vcmp.lt.s32.totalorder %v4260_v12, 127 }
 0x5ad   : > { %v2531_v11 = vmul.f32 %v2520_v58, %v2505_v19  ;;  %v2532_v20 = vmul.f32 %v2520_v58, %v2506_v28  ;;  %v2561_v19 = vsub.f32 %v6343_v8, %v6376_v10  ;;  %v2562_v28 = vsub.f32 %v6347_v40, %v6376_v10  ;;  %vm7725_vm7 = vmmov %vm7724_vm4 }
 0x5ae   : > { %v2570_v25 = vmul.f32 0.5, %v2569_v39 }
 0x5af   : > { %v6389_v14 = vmax.f32 %v2531_v11, 0.0  ;;  %v6391_v50 = vmax.f32 %v2532_v20, 0.0  ;;  %v3686_v26 = vpop.eup %3685  ;;  %v2540_v11 = vpop.xlane.xlu1 %2539 }
 0x5b0   : > { %v2522_v9 = vmul.f32 %v3686_v26, %v2510_v22  ;;  %v2571_v44 = vsub.f32 1.5, %v2570_v25  ;;  %vm2528_vm10 = vweird.f32 %v3686_v26  ;;  %v2542_v10 = vmul.f32 %v2540_v11, %v6014_v42  ;;  %v2552_v22 = vpop.xlane.xlu2 %2551 }
 0x5b1   : > { %2763 = vrot.lane.b32.xlu2 %v6391_v50, %s7695_s13  ;;  %2795 = vrot.lane.b32.xlu0 %v6391_v50, %s7694_s14  ;;  %vm2529_vm9 = vmor %vm2527_vm11, %vm2528_vm10  ;;  %v2554_v39 = vmul.f32 %v2552_v22, %v6014_v42  ;;  %vm2887_vm10 = vcmask 130048  }
 0x5b2   : > { %2791 = vrot.lane.b32.xlu1 %v6389_v14, %s7694_s14  ;;  %v2523_v55 = vmul.f32 %v3686_v26, %v2522_v9  ;;  %v2572_v52 = vmul.f32 %v3684_v6, %v2571_v44  ;;  %v2556_v25 = vmul.f32 %v2542_v10, %v2542_v10  ;;  %vm7730_vm11 = vmmov %vm7724_vm4 }
 0x5b4   : > { %v2524_v53 = vmul.f32 0.5, %v2523_v55  ;;  %v2576_v35 = vsel %vm2575_vm15, %v3684_v6, %v2572_v52  ;;  %v2507_v6 = vsub.f32 %v6345_v60, %v6382_v27  ;;  %v2558_v9 = vsub.f32 %v2554_v39, %v2556_v25  ;;  %vm7729_vm15 = vmmov %vm7727_vm14 }
 0x5b5   : > { %v2587_v45 = vmul.f32 %v2576_v35, %v2561_v19  ;;  %v2588_v2 = vmul.f32 %v2576_v35, %v2562_v28  ;;  %v2508_v60 = vsub.f32 %v6349_v30, %v6382_v27 }
 0x5b6   : > { %v2525_v34 = vsub.f32 1.5, %v2524_v53  ;;  %v2560_v55 = vmax.f32 %v2558_v9, 0.0 }
 0x5b7   : > { %v6421_v8 = vmax.f32 %v2587_v45, 0.0  ;;  %v6423_v20 = vmax.f32 %v2588_v2, 0.0  ;;  %v2563_v2 = vsub.f32 %v6359_v61, %v2542_v10  ;;  %v2564_v61 = vsub.f32 %v6367_v56, %v2542_v10 }
 0x5b8   : > { %v2526_v58 = vmul.f32 %v3686_v26, %v2525_v34  ;;  %v2566_v53 = vadd.f32 1e-05, %v2560_v55 }
 0x5b9   : > { %2695 = vrot.lane.b32.xlu2 %v6389_v14, %s7696_s25  ;;  %2727 = vrot.lane.b32.xlu0 %v6389_v14, %s3990_s18  ;;  %7718 = vst [vmem:[#allocation41_spill] sm:$0xff] %v6421_v8 }
 0x5ba   : > { %2759 = vrot.lane.b32.xlu1 %v6389_v14, %s7695_s13  ;;  %7719 = vst [vmem:[#allocation68_spill] sm:$0xff] %v6423_v20  ;;  %v2530_v40 = vsel %vm2529_vm9, %v3686_v26, %v2526_v58  ;;  %3687 = vrsqrt.f32 %v2566_v53  ;;  %vm2583_vm12 = vweird.f32 %v2566_v53  ;;  %vm7731_vm9 = vmmov %vm7724_vm4 }
 0x5bb   : > { %v2533_v46 = vmul.f32 %v2530_v40, %v2507_v6  ;;  %v2534_v44 = vmul.f32 %v2530_v40, %v2508_v60 }
 0x5bd   : > { %v6435_v26 = vmax.f32 %v2533_v46, 0.0  ;;  %v6445_v52 = vmax.f32 %v2534_v44, 0.0 }
 0x5c0   : > { %v3688_v30 = vpop.eup %3687 }
 0x5c1   : > { %2699 = vrot.lane.b32.xlu2 %v6391_v50, %s7696_s25  ;;  %2631 = vrot.lane.b32.xlu0 %v6389_v14, %s3998_s23  ;;  %v2578_v27 = vmul.f32 %v3688_v30, %v2566_v53  ;;  %vm2584_vm3 = vweird.f32 %v3688_v30 }
 0x5c2   : > { %2731 = vrot.lane.b32.xlu1 %v6391_v50, %s3990_s18  ;;  %vm2585_vm0 = vmor %vm2583_vm12, %vm2584_vm3 }
 0x5c3   : > { %v2579_v35 = vmul.f32 %v3688_v30, %v2578_v27  ;;  %vm7732_vm12 = vmmov %vm7727_vm14 }
 0x5c4   : > { %vm7733_vm3 = vmmov %vm7732_vm12 }
 0x5c5   : > { %v2580_v34 = vmul.f32 0.5, %v2579_v35 }
 0x5c7   : > { %v2581_v19 = vsub.f32 1.5, %v2580_v34 }
 0x5c9   : > { %2667 = vrot.lane.b32.xlu2 %v6391_v50, %s3997_s20  ;;  %2599 = vrot.lane.b32.xlu0 %v6389_v14, %s3999_s7  ;;  %v2582_v28 = vmul.f32 %v3688_v30, %v2581_v19 }
 0x5ca   : > { %2663 = vrot.lane.b32.xlu1 %v6389_v14, %s3997_s20 }
 0x5cb   : > { %v2586_v45 = vsel %vm2585_vm0, %v3688_v30, %v2582_v28  ;;  %vm7737_vm0 = vmmov %vm7724_vm4 }
 0x5cc   : > { %v2589_v58 = vmul.f32 %v2586_v45, %v2563_v2  ;;  %v2590_v22 = vmul.f32 %v2586_v45, %v2564_v61 }
 0x5ce   : > { %v6478_v11 = vmax.f32 %v2589_v58, 0.0  ;;  %v6495_v46 = vmax.f32 %v2590_v22, 0.0 }
 0x5d0   : > { %7720 = vst [vmem:[#allocation38_spill] sm:$0xff] %v6478_v11 }
 0x5d1   : > { %2707 = vrot.lane.b32.xlu0 %v6423_v20, %s7696_s25  ;;  %2799 = vrot.lane.b32.xlu2 %v6421_v8, %s7694_s14  ;;  %7721 = vst [vmem:[#allocation48_spill] sm:$0xff] %v6495_v46 }
 0x5d2   : > { %2827 = vrot.lane.b32.xlu1 %v6391_v50, %s7541_s2 }
 0x5d9   : > { %2793 = vrot.lane.b32.xlu0 %v6435_v26, %s7694_s14  ;;  %2675 = vrot.lane.b32.xlu2 %v6423_v20, %s3997_s20 }
 0x5da   : > { %2767 = vrot.lane.b32.xlu1 %v6421_v8, %s7695_s13 }
 0x5e1   : > { %2765 = vrot.lane.b32.xlu0 %v6445_v52, %s7695_s13  ;;  %2797 = vrot.lane.b32.xlu2 %v6445_v52, %s7694_s14 }
 0x5e2   : > { %2735 = vrot.lane.b32.xlu1 %v6421_v8, %s3990_s18 }
 0x5e9   : > { %2729 = vrot.lane.b32.xlu0 %v6435_v26, %s3990_s18  ;;  %2761 = vrot.lane.b32.xlu2 %v6435_v26, %s7695_s13 }
 0x5ea   : > { %2643 = vrot.lane.b32.xlu1 %v6423_v20, %s3998_s23 }
 0x5f1   : > { %2633 = vrot.lane.b32.xlu0 %v6435_v26, %s3998_s23  ;;  %2697 = vrot.lane.b32.xlu2 %v6435_v26, %s7696_s25 }
 0x5f2   : > { %2611 = vrot.lane.b32.xlu1 %v6423_v20, %s3999_s7 }
 0x5f9   : > { %2601 = vrot.lane.b32.xlu0 %v6435_v26, %s3999_s7  ;;  %2665 = vrot.lane.b32.xlu2 %v6435_v26, %s3997_s20 }
 0x5fa   : > { %2733 = vrot.lane.b32.xlu1 %v6445_v52, %s3990_s18 }
 0x601   : > { %2829 = vrot.lane.b32.xlu0 %v6445_v52, %s7541_s2  ;;  %2701 = vrot.lane.b32.xlu2 %v6445_v52, %s7696_s25 }
 0x602   : > { %2803 = vrot.lane.b32.xlu1 %v6423_v20, %s7694_s14 }
 0x609   : > { %2635 = vrot.lane.b32.xlu0 %v6391_v50, %s3998_s23  ;;  %2669 = vrot.lane.b32.xlu2 %v6445_v52, %s3997_s20 }
 0x60a   : > { %2737 = vrot.lane.b32.xlu1 %v6478_v11, %s3990_s18 }
 0x60b   : > { %v2764_v40 = vpop.permute.xlu2 %2763 }
 0x611   : > { %2605 = vrot.lane.b32.xlu0 %v6445_v52, %s3999_s7  ;;  %2637 = vrot.lane.b32.xlu2 %v6445_v52, %s3998_s23 }
 0x612   : > { %2771 = vrot.lane.b32.xlu1 %v6423_v20, %s7695_s13 }
 0x613   : > { %v6493_v6 = vpop.permute.xlu2 %2695 }
 0x619   : > { %2769 = vrot.lane.b32.xlu0 %v6478_v11, %s7695_s13  ;;  %2801 = vrot.lane.b32.xlu2 %v6478_v11, %s7694_s14 }
 0x61a   : > { %2645 = vrot.lane.b32.xlu1 %v6495_v46, %s3998_s23 }
 0x61b   : > { %v6503_v39 = vpop.permute.xlu2 %2699 }
 0x621   : > { %2709 = vrot.lane.b32.xlu0 %v6495_v46, %s7696_s25  ;;  %2831 = vrot.lane.b32.xlu2 %v6421_v8, %s7541_s2 }
 0x622   : > { %2613 = vrot.lane.b32.xlu1 %v6495_v46, %s3999_s7 }
 0x623   : > { %v6511_v56 = vpop.permute.xlu0 %2795  ;;  %v6513_v10 = vpop.permute.xlu2 %2667 }
 0x624   : > { %v6515_v25 = vpop.permute.xlu1 %2791 }
 0x625   : > { %v2811_v42 = vsel %vm1254_vm8, %v6515_v25, %v6511_v56 }
 0x626   : > { %v2815_v36 = vmul.f32 %v2811_v42, %v6109_v17 }
 0x629   : > { %2677 = vrot.lane.b32.xlu0 %v6495_v46, %s3997_s20  ;;  %2825 = vrot.lane.b32.xlu2 %v6435_v26, %s7541_s2 }
 0x62a   : > { %2833 = vrot.lane.b32.xlu1 %v6478_v11, %s7541_s2 }
 0x62b   : > { %v6523_v9 = vpop.permute.xlu0 %2727  ;;  %v6525_v60 = vpop.permute.xlu2 %2799 }
 0x62c   : > { %7722 = vst [vmem:[#allocation55_spill] sm:$0xff] %v6523_v9  ;;  %v6527_v44 = vpop.permute.xlu1 %2759  ;;  %v2809_v21 = vsel %vm1254_vm8, %v6511_v56, %v6525_v60 }
 0x62d   : > { %v2779_v16 = vsel %vm1226_vm13, %v6527_v44, %v2764_v40 }
 0x62e   : > { %v2783_v47 = vmul.f32 %v2779_v16, %v6124_v51 }
 0x631   : > { %2603 = vrot.lane.b32.xlu0 %v6391_v50, %s3999_s7  ;;  %2823 = vrot.lane.b32.xlu2 %v6389_v14, %s7541_s2 }
 0x632   : > { %2773 = vrot.lane.b32.xlu1 %v6495_v46, %s7695_s13 }
 0x633   : > { %v6535_v55 = vpop.permute.xlu0 %2631  ;;  %v6537_v53 = vpop.permute.xlu2 %2675 }
 0x634   : > { %v6539_v30 = vpop.permute.xlu1 %2731 }
 0x639   : > { %2805 = vrot.lane.b32.xlu0 %v6495_v46, %s7694_s14  ;;  %2741 = vrot.lane.b32.xlu2 %v6495_v46, %s3990_s18 }
 0x63a   : > { %2671 = vrot.lane.b32.xlu1 %v6421_v8, %s3997_s20 }
 0x63b   : > { %v6547_v27 = vpop.permute.xlu0 %2599  ;;  %v2798_v35 = vpop.permute.xlu2 %2797 }
 0x63c   : > { %v6549_v34 = vpop.permute.xlu1 %2663 }
 0x641   : > { %2739 = vrot.lane.b32.xlu0 %v6423_v20, %s3990_s18  ;;  %2703 = vrot.lane.b32.xlu2 %v6421_v8, %s7696_s25  ;;  %s3384_s18 = scalar_lea.hbm %s7235_s9, %s3539_s24 }
 0x642   : > { %2705 = vrot.lane.b32.xlu1 %v6478_v11, %s7696_s25  ;;  %s3889_s25 = scalar_lea.hbm %s7235_s9, 256 }
 0x643   : > { %v6557_v19 = vpop.permute.xlu0 %2707  ;;  %v6559_v28 = vpop.permute.xlu2 %2761 }
 0x644   : > { %v6561_v45 = vpop.permute.xlu1 %2827 }
 0x649   : > { %2673 = vrot.lane.b32.xlu0 %v6478_v11, %s3997_s20  ;;  %2641 = vrot.lane.b32.xlu2 %v6478_v11, %s3998_s23  ;;  %s3387_s20 = sshll.u32 %s3384_s18, 4  ;;  %s3388_s20 = int_to_ptr.hbm [resolvable:$true] %s3387_s20 }
 0x64a   : > { %2609 = vrot.lane.b32.xlu1 %v6478_v11, %s3999_s7 }
 0x64b   : > { %v6569_v2 = vpop.permute.xlu0 %2793  ;;  %v6571_v58 = vpop.permute.xlu2 %2697 }
 0x64c   : > { %v2812_v61 = vsel %vm1254_vm8, %v6569_v2, %v2798_v35  ;;  %v6576_v22 = vpop.permute.xlu1 %2767 }
 0x64d   : > { %v2819_v62 = vmul.f32 %v2812_v61, %v6109_v17  ;;  %v6586_v54 = vsel %vm1226_vm13, %v2764_v40, %v6576_v22 }
 0x64e   : > { %v2784_v1 = vmul.f32 %v6586_v54, %v6151_v18  ;;  %v2717_v54 = vsel %vm1058_vm5, %v6557_v19, %v6493_v6 }
 0x64f   : > { %2900 = vmatpush.msra.mxu3 %v2819_v62 }
 0x651   : > { %2639 = vrot.lane.b32.xlu0 %v6421_v8, %s3998_s23  ;;  %2607 = vrot.lane.b32.xlu2 %v6421_v8, %s3999_s7  ;;  %v2747_v8 = vsel %vm7724_vm4, %v6523_v9, %v6539_v30  ;;  %s3373_s23 = scalar_lea.sflag [#allocation4], %s4160_s27  ;;  %s3883_s7 = sshra.s32 %s3388_s20, 4  ;;  %s3884_s7 = int_to_ptr.hbm [resolvable:$true] %s3883_s7 }
 0x652   : > { %2835 = vrot.lane.b32.xlu1 %v6423_v20, %s7541_s2  ;;  %2901 = vmatpush.msra.mxu3 %v2815_v36  ;;  %v2865_v36 = vld [vmem:[%s7234_s8 + $0x10] sm:$0xff]  ;;  %v2751_v38 = vmul.f32 %v2747_v8, %v6127_v24  ;;  %p3890_p12 = scmp.lt.s32.totalorder %s3884_s7, %s7235_s9 }
 0x653   : > { %v2766_v32 = vpop.permute.xlu0 %2765  ;;  %v6595_v61 = vpop.permute.xlu2 %2665 }
 0x654   : > { %v2780_v42 = vsel %vm1226_vm13, %v6559_v28, %v2766_v32  ;;  %v6603_v17 = vpop.permute.xlu1 %2735 }
 0x655   : > { %v2787_v62 = vmul.f32 %v2780_v42, %v6124_v51  ;;  %v2864_v51 = vld [vmem:[%s7234_s8 + $0x8] sm:$0xff] }
 0x657   : > { %2902 = vmatpush.msra.mxu3 %v2787_v62 }
 0x659   : > { %2837 = vrot.lane.b32.xlu0 %v6495_v46, %s7541_s2  ;;  %2903 = vmatpush.msra.mxu3 %v2783_v47  ;;  %s3885_s2 = scalar_lea.hbm %s3884_s7, 128 }
 0x65a   : > { %2879 = vperm.xlu1 %3673, %v2865_v36   ;;  %p3886_p1 = scmp.ne.s32.totalorder %s3884_s7, %s3885_s2  ;;  %p3891_p8 = scmp.lt.s32.totalorder %s3889_s25, %s3885_s2 }
 0x65b   : > { %v6612_v40 = vpop.permute.xlu0 %2729  ;;  %v6614_v63 = vpop.permute.xlu2 %2701 }
 0x65c   : > { %7723 = vst [vmem:[#allocation34_spill] sm:$0xff] %v6612_v40  ;;  %v6616_v13 = vpop.permute.xlu1 %2643  ;;  %p3887_p3 = pnand %p3886_p1, %p4129_p13  ;;  %p3892_p7 = por %p3891_p8, %p3890_p12 }
 0x65e   : > { %p3888_p5 = pneg %p3887_p3 }
 0x660   : > { %p3893_p9 = pnand %p3892_p7, %p3888_p5 }
 0x661   : > { %2874 = vperm.xlu0 %3672, %v2864_v51  }
 0x663   : > { %v6621_v16 = vpop.permute.xlu0 %2633  ;;  %v6623_v42 = vpop.permute.xlu2 %2669 }
 0x664   : > { %v6625_v62 = vpop.permute.xlu1 %2611 }
 0x66b   : > { %v6627_v20 = vpop.permute.xlu0 %2601  ;;  %v6629_v47 = vpop.permute.xlu2 %2637 }
 0x66c   : > { %v2734_v36 = vpop.permute.xlu1 %2733 }
 0x66d   : > { %v2748_v51 = vsel %vm7725_vm7, %v6612_v40, %v2734_v36 }
 0x66e   : > { %v2755_v0 = vmul.f32 %v2748_v51, %v6127_v24 }
 0x670   : > { %2904 = vmatpush.msra.mxu3 %v2755_v0 }
 0x672   : > { %2905 = vmatpush.msra.mxu3 %v2751_v38  ;;  %v2816_v38 = vmul.f32 %v2809_v21, %v6143_v23 }
 0x673   : > { %v6640_v46 = vpop.permute.xlu0 %2829  ;;  %v6642_v11 = vpop.permute.xlu2 %2801 }
 0x674   : > { %v2810_v9 = vsel %vm1254_vm8, %v2798_v35, %v6642_v11  ;;  %2906 = vmatpush.msra.mxu3 %v6435_v26  ;;  %v6652_v51 = vpop.permute.xlu1 %2803 }
 0x675   : > { %v2820_v24 = vmul.f32 %v2810_v9, %v6143_v23 }
 0x676   : > { %2907 = vmatpush.msra.mxu3 %v6389_v14 }
 0x677   : > { %2958 = vmatpush.msra.mxu1 %v2820_v24 }
 0x679   : > { %2959 = vmatpush.msra.mxu1 %v2816_v38 }
 0x67b   : > { %v6657_v0 = vpop.permute.xlu0 %2635  ;;  %v6659_v8 = vpop.permute.xlu2 %2831 }
 0x67c   : > { %v6661_v56 = vpop.permute.xlu1 %2737 }
 0x683   : > { %v6663_v37 = vpop.permute.xlu0 %2605  ;;  %v6665_v35 = vpop.permute.xlu2 %2825 }
 0x684   : > { %7726 = vst [vmem:[#allocation31_spill] sm:$0xff] %v6665_v35  ;;  %v2844_v26 = vsel %vm7727_vm14, %v6665_v35, %v6640_v46  ;;  %v6671_v14 = vpop.permute.xlu1 %2771 }
 0x685   : > { %v2851_v23 = vmul.f32 %v2844_v26, %v6100_v29 }
 0x687   : > { %2943 = vmatpush.msra.mxu0 %v2851_v23  ;;  %v2746_v23 = vsel %vm7730_vm11, %v2734_v36, %v6661_v56 }
 0x68b   : > { %v6674_v21 = vpop.permute.xlu0 %2769  ;;  %v6676_v9 = vpop.permute.xlu2 %2823 }
 0x68c   : > { %7728 = vst [vmem:[#allocation26_spill] sm:$0xff] %v6676_v9  ;;  %v2778_v24 = vsel %vm1226_vm13, %v2766_v32, %v6674_v21  ;;  %v2843_v38 = vsel %vm7729_vm15, %v6676_v9, %v6561_v45  ;;  %v6685_v40 = vpop.permute.xlu1 %2645  ;;  %v6694_v32 = vld [vmem:[#allocation8 + $0x8] sm:$0xff]  ;;  %v2745_v9 = vsel %vm7731_vm9, %v6539_v30, %v6603_v17 }
 0x68d   : > { %v2788_v35 = vmul.f32 %v2778_v24, %v6151_v18  ;;  %v2847_v26 = vmul.f32 %v2843_v38, %v6100_v29  ;;  %v2756_v29 = vmul.f32 %v2746_v23, %v6199_v59  ;;  %v2752_v36 = vmul.f32 %v2745_v9, %v6199_v59  ;;  %v6723_v9 = vld [vmem:[#allocation8 + $0x18] sm:$0xff] }
 0x68e   : > { %v2719_v59 = vmul.f32 %v2717_v54, %v6164_v57  ;;  %v2715_v38 = vsel %vm1058_vm5, %v6493_v6, %v6503_v39  ;;  %v2683_v6 = vsel %vm918_vm2, %v6549_v34, %v6513_v10 }
 0x68f   : > { %2944 = vmatpush.msra.mxu0 %v2847_v26  ;;  %2960 = vmatpush.msra.mxu1 %v2788_v35 }
 0x690   : > { %3517 = vmatmul.msk.f32.vlgmr.msra.gmra.mxu0 %vm2887_vm10, %v6694_v32 }
 0x691   : > { %2961 = vmatpush.msra.mxu1 %v2784_v1  ;;  %v2716_v1 = vsel %vm1058_vm5, %v6571_v58, %v6614_v63 }
 0x692   : > { %v2724_v26 = vmul.f32 %v2716_v1, %v6240_v4  ;;  %v2688_v1 = vmul.f32 %v2683_v6, %v6245_v15 }
 0x693   : > { %v6704_v24 = vpop.permute.xlu0 %2709  ;;  %2962 = vmatpush.msra.mxu1 %v2756_v29 }
 0x694   : > { %v2718_v18 = vsel %vm1058_vm5, %v6704_v24, %v6571_v58  ;;  %v6714_v30 = vpop.permute.xlu1 %2613 }
 0x695   : > { %v2723_v35 = vmul.f32 %v2718_v18, %v6164_v57  ;;  %2963 = vmatpush.msra.mxu1 %v2752_v36  ;;  %v2684_v57 = vsel %vm918_vm2, %v6595_v61, %v6623_v42  ;;  %v2841_v36 = vsel %vm7732_vm12, %v6561_v45, %v6659_v8  ;;  %v2654_v18 = vsel %vm890_vm1, %v6685_v40, %v6621_v16 }
 0x697   : > { %2908 = vmatpush.msra.mxu3 %v2723_v35  ;;  %2964 = vmatpush.msra.mxu1 %v6445_v52  ;;  %v2720_v52 = vmul.f32 %v2715_v38, %v6240_v4  ;;  %v2692_v4 = vmul.f32 %v2684_v57, %v6245_v15  ;;  %v2848_v38 = vmul.f32 %v2841_v36, %v6139_v43  ;;  %v2742_v36 = vpop.permute.xlu2 %2741 }
 0x698   : > { %3518 = vmatmul.msk.f32.gmra.mxu0 %vm2887_vm10, %v6723_v9  ;;  %v2659_v15 = vmul.f32 %v2654_v18, %v6220_v3  ;;  %v2620_v57 = vsel %vm862_vm6, %v6627_v20, %v6663_v37 }
 0x699   : > { %2909 = vmatpush.msra.mxu3 %v2719_v59  ;;  %2965 = vmatpush.msra.mxu1 %v6391_v50  ;;  %v2685_v50 = vsel %vm918_vm2, %v6537_v53, %v6549_v34  ;;  %v2653_v59 = vsel %vm890_vm1, %v6616_v13, %v6535_v55 }
 0x69a   : > { %v2687_v35 = vmul.f32 %v2685_v50, %v6175_v5 }
 0x69b   : > { %v6738_v58 = vpop.permute.xlu0 %2677  ;;  %2966 = vmatpush.msra.mxu1 %v2724_v26  ;;  %v2655_v26 = vmul.f32 %v2653_v59, %v6220_v3  ;;  %v2775_v59 = vsel %vm1226_vm13, %v6576_v22, %v6671_v14 }
 0x69c   : > { %v2686_v23 = vsel %vm918_vm2, %v6738_v58, %v6595_v61  ;;  %v6752_v29 = vpop.permute.xlu1 %2833  ;;  %v2652_v61 = vsel %vm890_vm1, %v6621_v16, %v6629_v47  ;;  %v2785_v22 = vmul.f32 %v2775_v59, %v6194_v48 }
 0x69d   : > { %v2691_v54 = vmul.f32 %v2686_v23, %v6175_v5  ;;  %v2842_v34 = vsel %vm7733_vm3, %v6640_v46, %v6752_v29  ;;  %2967 = vmatpush.msra.mxu1 %v2720_v52  ;;  %v6775_v46 = vld [vmem:[#allocation8 + $0x28] sm:$0xff]  ;;  %v2660_v16 = vmul.f32 %v2652_v61, %v6264_v41  ;;  %v2651_v5 = vsel %vm890_vm1, %v6535_v55, %v6657_v0 }
 0x69e   : > { %v2852_v45 = vmul.f32 %v2842_v34, %v6139_v43  ;;  %v2622_v43 = vsel %vm862_vm6, %v6714_v30, %v6627_v20  ;;  %v2621_v55 = vsel %vm862_vm6, %v6625_v62, %v6547_v27  ;;  %v2656_v6 = vmul.f32 %v2651_v5, %v6264_v41  ;;  %v6815_v41 = vld [vmem:[#allocation8] sm:$0xff]  ;;  %v7736_v5 = vld [vmem:[#allocation34_spill] sm:$0xff] }
 0x69f   : > { %2910 = vmatpush.msra.mxu3 %v2691_v54  ;;  %2968 = vmatpush.msra.mxu1 %v2692_v4  ;;  %v2627_v3 = vmul.f32 %v2622_v43, %v6242_v31  ;;  %v2628_v23 = vmul.f32 %v2620_v57, %v6304_v7  ;;  %v2623_v4 = vmul.f32 %v2621_v55, %v6242_v31  ;;  %v6817_v54 = vld [vmem:[#allocation8 + $0x38] sm:$0xff]  ;;  %v7740_v57 = vld [vmem:[#allocation55_spill] sm:$0xff] }
 0x6a0   : > { %3001 = vmatpush.msra.mxu2 %v2852_v45  ;;  %3519 = vmatmul.msk.f32.gmra.mxu0 %vm2887_vm10, %v6775_v46  ;;  %v2807_v31 = vsel %vm1254_vm8, %v6525_v60, %v6652_v51 }
 0x6a1   : > { %2911 = vmatpush.msra.mxu3 %v2687_v35  ;;  %2969 = vmatpush.msra.mxu1 %v2688_v1  ;;  %v6852_v1 = vld [vmem:[#allocation8 + $0x10] sm:$0xff] }
 0x6a2   : > { %3002 = vmatpush.msra.mxu2 %v2848_v38  ;;  %v7735_v38 = vld [vmem:[#allocation17_spill] sm:$0xff] }
 0x6a3   : > { %v6799_v52 = vpop.permute.xlu0 %2603  ;;  %2912 = vmatpush.msra.mxu3 %v2659_v15  ;;  %2970 = vmatpush.msra.mxu1 %v2660_v16  ;;  %v2750_v15 = vsel %vm7737_vm0, %v2742_v36, %v7736_v5 }
 0x6a4   : > { %v2774_v50 = vpop.permute.xlu1 %2773  ;;  %3521 = vmatmul.msk.f32.vlgmr.msra.gmra.mxu2 %vm2887_vm10, %v6694_v32  ;;  %v2619_v20 = vsel %vm862_vm6, %v6547_v27, %v6799_v52 }
 0x6a5   : > { %2913 = vmatpush.msra.mxu3 %v2655_v26  ;;  %2971 = vmatpush.msra.mxu1 %v2656_v6  ;;  %v2624_v34 = vmul.f32 %v2619_v20, %v6304_v7  ;;  %v2813_v7 = vsel %vm1254_vm8, %v6652_v51, %v6515_v25  ;;  %v2776_v25 = vsel %vm1226_vm13, %v6674_v21, %v2774_v50  ;;  %v2704_v21 = vpop.permute.xlu2 %2703  ;;  %v7742_v6 = vld [vmem:[#allocation16_spill] sm:$0xff] }
 0x6a6   : > { %v2817_v51 = vmul.f32 %v2807_v31, %v6177_v33  ;;  %v7743_v31 = vld [vmem:[#allocation38_spill] sm:$0xff] }
 0x6a7   : > { %2914 = vmatpush.msra.mxu3 %v2627_v3  ;;  %2972 = vmatpush.msra.mxu1 %v2628_v23  ;;  %v6889_v23 = vld [vmem:[#allocation8 + $0x20] sm:$0xff] }
 0x6a8   : > { %3520 = vmatmul.msk.f32.gmra.mxu0 %vm2887_vm10, %v6817_v54 }
 0x6a9   : > { %2915 = vmatpush.msra.mxu3 %v2623_v4  ;;  %2973 = vmatpush.msra.mxu1 %v2624_v34 }
 0x6aa   : > { %2916 = vmatmul.f32.vlgmr.msra.gmra.mxu3 %v6815_v41  ;;  %2974 = vmatmul.f32.vlgmr.msra.gmra.mxu1 %v6815_v41 }
 0x6ab   : > { %v2806_v27 = vpop.permute.xlu0 %2805 }
 0x6ac   : > { %v2808_v61 = vsel %vm1254_vm8, %v6642_v11, %v2806_v27  ;;  %v2814_v18 = vsel %vm1254_vm8, %v2806_v27, %v6569_v2  ;;  %v6838_v45 = vpop.permute.xlu1 %2671  ;;  %3522 = vmatmul.msk.f32.gmra.mxu2 %vm2887_vm10, %v6723_v9  ;;  %v2818_v11 = vmul.f32 %v2813_v7, %v6179_v49  ;;  %v2782_v2 = vsel %vm1226_vm13, %v2774_v50, %v6559_v28  ;;  %vm7734_vm8 = vmmov %vm7724_vm4  ;;  %v7744_v7 = vld [vmem:[#allocation48_spill] sm:$0xff] }
 0x6ad   : > { %v2821_v60 = vmul.f32 %v2808_v61, %v6177_v33  ;;  %v2822_v35 = vmul.f32 %v2814_v18, %v6179_v49  ;;  %v2781_v33 = vsel %vm1226_vm13, %v6671_v14, %v6527_v44  ;;  %v2789_v49 = vmul.f32 %v2776_v25, %v6194_v48  ;;  %v2863_v14 = vld [vmem:[%s7234_s8] sm:$0xff]  ;;  %vm7738_vm13 = vmmov %vm7737_vm0  ;;  %v7739_v48 = vld [vmem:[#allocation46_spill] sm:$0xff]  ;;  %v2642_v4 = vpop.permute.xlu2 %2641 }
 0x6ae   : > { %v2744_v28 = vsel %vm7734_vm8, %v6661_v56, %v2742_v36  ;;  %v2790_v16 = vmul.f32 %v2782_v2, %v7735_v38  ;;  %v2786_v56 = vmul.f32 %v2781_v33, %v7735_v38  ;;  %vm7741_vm4 = vmmov %vm7737_vm0  ;;  %v2758_v50 = vmul.f32 %v2750_v15, %v7742_v6  ;;  %2869 = vperm.xlu2 %3674, %v2863_v14   ;;  %v7747_v25 = vld [vmem:[#allocation41_spill] sm:$0xff]  ;;  %v7752_v14 = vld [vmem:[#allocation59_spill] sm:$0xff] }
 0x6af   : > { %3016 = vmatpush.msrb.mxu0 %v2821_v60  ;;  %3074 = vmatpush.msrb.mxu3 %v2822_v35  ;;  %v2757_v26 = vmul.f32 %v2744_v28, %v7739_v48  ;;  %v2711_v61 = vsel %vm1058_vm5, %v2704_v21, %v6557_v19  ;;  %v7746_v60 = vld [vmem:[#allocation53_spill] sm:$0xff]  ;;  %v7750_v28 = vld [vmem:[#allocation47_spill] sm:$0xff] }
 0x6b0   : > { %v2722_v2 = vmul.f32 %v2711_v61, %v7746_v60  ;;  %v6921_v33 = vld [vmem:[#allocation8 + $0x30] sm:$0xff] }
 0x6b1   : > { %3017 = vmatpush.msrb.mxu0 %v2817_v51  ;;  %3075 = vmatpush.msrb.mxu3 %v2818_v11  ;;  %v7748_v51 = vld [vmem:[#allocation68_spill] sm:$0xff]  ;;  %v7751_v15 = vld [vmem:[#allocation37_spill] sm:$0xff] }
 0x6b2   : > { %2919 = vmatmul.f32.gmra.mxu3 %v6852_v1  ;;  %2977 = vmatmul.f32.gmra.mxu1 %v6852_v1 }
 0x6b3   : > { %v2740_v44 = vpop.permute.xlu0 %2739  ;;  %3018 = vmatpush.msrb.mxu0 %v2789_v49  ;;  %3076 = vmatpush.msrb.mxu3 %v2790_v16  ;;  %v2648_v16 = vsel %vm890_vm1, %v2642_v4, %v6685_v40 }
 0x6b4   : > { %v2743_v43 = vsel %vm7738_vm13, %v6603_v17, %v2740_v44  ;;  %3523 = vmatmul.msk.f32.gmra.mxu2 %vm2887_vm10, %v6775_v46  ;;  %v2749_v55 = vsel %vm7741_vm4, %v2740_v44, %v7740_v57  ;;  %v2706_v3 = vpop.permute.xlu1 %2705 }
 0x6b5   : > { %3019 = vmatpush.msrb.mxu0 %v2785_v22  ;;  %3077 = vmatpush.msrb.mxu3 %v2786_v56  ;;  %v2753_v20 = vmul.f32 %v2743_v43, %v7739_v48  ;;  %v2754_v17 = vmul.f32 %v2749_v55, %v7742_v6  ;;  %v2712_v36 = vsel %vm1058_vm5, %v2706_v3, %v6704_v24  ;;  %v2608_v5 = vpop.permute.xlu2 %2607  ;;  %v7753_v55 = vld [vmem:[#allocation40_spill] sm:$0xff]  ;;  %v7754_v6 = vld [vmem:[#allocation65_spill] sm:$0xff] }
 0x6b6   : > { %v2714_v34 = vsel %vm1058_vm5, %v6614_v63, %v2706_v3  ;;  %v2713_v24 = vsel %vm1058_vm5, %v6503_v39, %v2704_v21  ;;  %v7745_v63 = vld [vmem:[#allocation36_spill] sm:$0xff]  ;;  %v2726_v35 = vmul.f32 %v2712_v36, %v7746_v60  ;;  %v2679_v21 = vsel %vm918_vm2, %v6838_v45, %v6537_v53  ;;  %vm7755_vm5 = vmmov %vm7733_vm3 }
 0x6b7   : > { %3020 = vmatpush.msrb.mxu0 %v2757_v26  ;;  %3078 = vmatpush.msrb.mxu3 %v2758_v50  ;;  %v2725_v18 = vmul.f32 %v2714_v34, %v7745_v63  ;;  %v2721_v39 = vmul.f32 %v2713_v24, %v7745_v63  ;;  %v2650_v22 = vsel %vm890_vm1, %v6629_v47, %v2642_v4  ;;  %v7756_v4 = vld [vmem:[#allocation31_spill] sm:$0xff]  ;;  %v7762_v24 = vld [vmem:[#allocation20_spill] sm:$0xff] }
 0x6b8   : > { %v2661_v44 = vmul.f32 %v2650_v22, %v7751_v15  ;;  %v2662_v56 = vmul.f32 %v2648_v16, %v7752_v14  ;;  %v2615_v57 = vsel %vm862_vm6, %v2608_v5, %v6625_v62 }
 0x6b9   : > { %3021 = vmatpush.msrb.mxu0 %v2753_v20  ;;  %3079 = vmatpush.msrb.mxu3 %v2754_v17  ;;  %v2866_v20 = vld [vmem:[%s7234_s8 + $0x18] sm:$0xff]  ;;  %v2626_v17 = vmul.f32 %v2615_v57, %v7754_v6 }
 0x6ba   : > { %2922 = vmatmul.f32.gmra.mxu3 %v6889_v23  ;;  %2980 = vmatmul.f32.gmra.mxu1 %v6889_v23 }
 0x6bb   : > { %v2674_v27 = vpop.permute.xlu0 %2673  ;;  %3022 = vmatpush.msrb.mxu0 %v7743_v31  ;;  %3080 = vmatpush.msrb.mxu3 %v7744_v7  ;;  %v7761_v7 = vld [vmem:[#allocation45_spill] sm:$0xff] }
 0x6bc   : > { %3524 = vmatmul.msk.f32.gmra.mxu2 %vm2887_vm10, %v6817_v54  ;;  %v2680_v11 = vsel %vm918_vm2, %v2674_v27, %v6738_v58  ;;  %v2682_v19 = vsel %vm918_vm2, %v6623_v42, %v2674_v27  ;;  %v2610_v59 = vpop.permute.xlu1 %2609  ;;  %v2681_v58 = vsel %vm918_vm2, %v6513_v10, %v6838_v45  ;;  %v7749_v42 = vld [vmem:[#allocation28_spill] sm:$0xff]  ;;  %v2690_v45 = vmul.f32 %v2679_v21, %v7750_v28  ;;  %vm7758_vm2 = vmmov %vm7733_vm3  ;;  %v7759_v27 = vld [vmem:[#allocation26_spill] sm:$0xff] }
 0x6bd   : > { %3023 = vmatpush.msrb.mxu0 %v7747_v25  ;;  %3081 = vmatpush.msrb.mxu3 %v7748_v51  ;;  %v2693_v49 = vmul.f32 %v2682_v19, %v7749_v42  ;;  %v2694_v38 = vmul.f32 %v2680_v11, %v7750_v28  ;;  %v2689_v10 = vmul.f32 %v2681_v58, %v7749_v42 }
 0x6be   : > { %v2616_v43 = vsel %vm862_vm6, %v2610_v59, %v6714_v30  ;;  %v2618_v48 = vsel %vm862_vm6, %v6663_v37, %v2610_v59  ;;  %2884 = vperm.xlu2 %3674, %v2866_v20  }
 0x6bf   : > { %3024 = vmatpush.msrb.mxu0 %v2725_v18  ;;  %3082 = vmatpush.msrb.mxu3 %v2726_v35  ;;  %v2629_v30 = vmul.f32 %v2618_v48, %v7753_v55  ;;  %v2630_v50 = vmul.f32 %v2616_v43, %v7754_v6 }
 0x6c1   : > { %3025 = vmatpush.msrb.mxu0 %v2721_v39  ;;  %3083 = vmatpush.msrb.mxu3 %v2722_v2 }
 0x6c2   : > { %2925 = vmatmul.f32.gmra.mxu3 %v6921_v33  ;;  %2983 = vmatmul.f32.gmra.mxu1 %v6921_v33 }
 0x6c3   : > { %v2640_v53 = vpop.permute.xlu0 %2639  ;;  %3026 = vmatpush.msrb.mxu0 %v2693_v49  ;;  %3084 = vmatpush.msrb.mxu3 %v2694_v38 }
 0x6c4   : > { %v2647_v40 = vsel %vm890_vm1, %v2640_v53, %v6616_v13  ;;  %v2649_v47 = vsel %vm890_vm1, %v6657_v0, %v2640_v53  ;;  %v2617_v13 = vsel %vm862_vm6, %v6799_v52, %v2608_v5  ;;  %v2836_v3 = vpop.permute.xlu1 %2835  ;;  %vm7757_vm6 = vmmov %vm7733_vm3 }
 0x6c5   : > { %3027 = vmatpush.msrb.mxu0 %v2689_v10  ;;  %3085 = vmatpush.msrb.mxu3 %v2690_v45  ;;  %v2657_v0 = vmul.f32 %v2649_v47, %v7751_v15  ;;  %v2658_v26 = vmul.f32 %v2647_v40, %v7752_v14  ;;  %v2625_v37 = vmul.f32 %v2617_v13, %v7753_v55  ;;  %vm7760_vm1 = vmmov %vm7758_vm2 }
 0x6c6   : > { %v2839_v34 = vsel %vm7758_vm2, %v6659_v8, %v2836_v3  ;;  %v2845_v31 = vsel %vm7760_vm1, %v2836_v3, %v7759_v27 }
 0x6c7   : > { %3028 = vmatpush.msrb.mxu0 %v2661_v44  ;;  %3086 = vmatpush.msrb.mxu3 %v2662_v56  ;;  %v2850_v18 = vmul.f32 %v2845_v31, %v7762_v24 }
 0x6c9   : > { %3029 = vmatpush.msrb.mxu0 %v2657_v0  ;;  %3087 = vmatpush.msrb.mxu3 %v2658_v26 }
 0x6cb   : > { %v2838_v52 = vpop.permute.xlu0 %2837  ;;  %3030 = vmatpush.msrb.mxu0 %v2629_v30  ;;  %3088 = vmatpush.msrb.mxu3 %v2630_v50 }
 0x6cc   : > { %v2840_v62 = vsel %vm7755_vm5, %v6752_v29, %v2838_v52  ;;  %v2846_v36 = vsel %vm7757_vm6, %v2838_v52, %v7756_v4  ;;  %v2849_v29 = vmul.f32 %v2839_v34, %v7761_v7  ;;  %v2880_v38 = vpop.permute.xlu1 %2879 }
 0x6cd   : > { %v2853_v61 = vmul.f32 %v2840_v62, %v7761_v7  ;;  %v2854_v63 = vmul.f32 %v2846_v36, %v7762_v24  ;;  %3031 = vmatpush.msrb.mxu0 %v2625_v37  ;;  %3089 = vmatpush.msrb.mxu3 %v2626_v17 }
 0x6ce   : > { %3032 = vmatmul.f32.vlgmr.msrb.gmra.mxu0 %v6815_v41  ;;  %3090 = vmatmul.f32.vlgmr.msrb.gmra.mxu3 %v6815_v41 }
 0x6cf   : > { %3059 = vmatpush.msrb.mxu2 %v2853_v61  ;;  %3117 = vmatpush.msrb.mxu1 %v2854_v63 }
 0x6d1   : > { %3060 = vmatpush.msrb.mxu2 %v2849_v29  ;;  %3118 = vmatpush.msrb.mxu1 %v2850_v18 }
 0x6d2   : > { %3525 = vmatmul.msk.f32.vlgmr.msrb.gmra.mxu2 %vm2887_vm10, %v6694_v32  ;;  %3529 = vmatmul.msk.f32.vlgmr.msrb.gmra.mxu1 %vm2887_vm10, %v6694_v32 }
 0x6d3   : > { %v7022_v11 = vpop.permute.xlu0 %2874 }
 0x6d6   : > { %3035 = vmatmul.f32.gmra.mxu0 %v6852_v1  ;;  %3093 = vmatmul.f32.gmra.mxu3 %v6852_v1 }
 0x6da   : > { %3526 = vmatmul.msk.f32.gmra.mxu2 %vm2887_vm10, %v6723_v9  ;;  %3530 = vmatmul.msk.f32.gmra.mxu1 %vm2887_vm10, %v6723_v9 }
 0x6de   : > { %3038 = vmatmul.f32.gmra.mxu0 %v6889_v23  ;;  %3096 = vmatmul.f32.gmra.mxu3 %v6889_v23 }
 0x6e2   : > { %3527 = vmatmul.msk.f32.gmra.mxu2 %vm2887_vm10, %v6775_v46  ;;  %3531 = vmatmul.msk.f32.gmra.mxu1 %vm2887_vm10, %v6775_v46 }
 0x6e6   : > { %3099 = vmatmul.f32.gmra.mxu3 %v6921_v33  ;;  %3041 = vmatmul.f32.gmra.mxu0 %v6921_v33 }
 0x6ea   : > { %3528 = vmatmul.msk.f32.gmra.mxu2 %vm2887_vm10, %v6817_v54  ;;  %3532 = vmatmul.msk.f32.gmra.mxu1 %vm2887_vm10, %v6817_v54 }
 0x708   : > { %v7012_v8 = vpop.permute.xlu2 %2869 }
 0x70d   : > { %v2946_v12 = vpop.f32.mrf.mxu0 }
 0x715   : > { %v2949_v60 = vpop.f32.mrf.mxu0 }
 0x718   : > { %v7040_v47 = vpop.permute.xlu2 %2884 }
 0x71d   : > { %v2952_v28 = vpop.f32.mrf.mxu0 }
 0x725   : > { %v2955_v48 = vpop.f32.mrf.mxu0 }
 0x727   : > { %v3004_v32 = vpop.f32.mrf.mxu2  ;;  %v2975_v9 = vpop.f32.mrf.mxu1 }
 0x728   : > { %v2976_v41 = vadd.f32 %v2975_v9, %v7012_v8 }
 0x72a   : > { %v7015_v1 = vadd.f32 %v3004_v32, %v2976_v41 }
 0x72c   : > { %v3149_v54 = vmul.f32 %v7015_v1, %v7015_v1 }
 0x72d   : > { %v2917_v46 = vpop.f32.mrf.mxu3 }
 0x72e   : > { %v2918_v23 = vadd.f32 %v2917_v46, %v7012_v8 }
 0x72f   : > { %v2978_v25 = vpop.f32.mrf.mxu1  ;;  %v3007_v51 = vpop.f32.mrf.mxu2 }
 0x730   : > { %v7018_v35 = vadd.f32 %v2946_v12, %v2918_v23  ;;  %v2979_v19 = vadd.f32 %v2978_v25, %v7022_v11 }
 0x732   : > { %v3132_v39 = vadd.f32 %v7015_v1, %v7018_v35  ;;  %v3148_v2 = vmul.f32 %v7018_v35, %v7018_v35  ;;  %v7029_v21 = vadd.f32 %v3007_v51, %v2979_v19 }
 0x734   : > { %3133 = vadd.xlane.f32.xlu0 %v3132_v39  ;;  %v3156_v59 = vadd.f32 %v3149_v54, %v3148_v2  ;;  %v3151_v16 = vmul.f32 %v7029_v21, %v7029_v21 }
 0x735   : > { %v2920_v33 = vpop.f32.mrf.mxu3 }
 0x736   : > { %v2921_v58 = vadd.f32 %v2920_v33, %v7022_v11  ;;  %3157 = vadd.xlane.f32.xlu2 %v3156_v59 }
 0x737   : > { %v2981_v49 = vpop.f32.mrf.mxu1  ;;  %v3010_v22 = vpop.f32.mrf.mxu2 }
 0x738   : > { %v7032_v42 = vadd.f32 %v2949_v60, %v2921_v58  ;;  %v2982_v45 = vadd.f32 %v2981_v49, %v2880_v38 }
 0x73a   : > { %v3135_v53 = vadd.f32 %v7029_v21, %v7032_v42  ;;  %v3150_v10 = vmul.f32 %v7032_v42, %v7032_v42  ;;  %v7042_v15 = vadd.f32 %v3010_v22, %v2982_v45 }
 0x73c   : > { %3136 = vadd.xlane.f32.xlu1 %v3135_v53  ;;  %v3159_v5 = vadd.f32 %v3151_v16, %v3150_v10  ;;  %v3153_v0 = vmul.f32 %v7042_v15, %v7042_v15 }
 0x73d   : > { %v2923_v40 = vpop.f32.mrf.mxu3 }
 0x73e   : > { %3160 = vadd.xlane.f32.xlu0 %v3159_v5  ;;  %v2924_v44 = vadd.f32 %v2923_v40, %v2880_v38 }
 0x73f   : > { %v2984_v14 = vpop.f32.mrf.mxu1  ;;  %v3013_v13 = vpop.f32.mrf.mxu2 }
 0x740   : > { %v7044_v56 = vadd.f32 %v2952_v28, %v2924_v44  ;;  %v2985_v43 = vadd.f32 %v2984_v14, %v7040_v47 }
 0x742   : > { %v3138_v26 = vadd.f32 %v7042_v15, %v7044_v56  ;;  %v3152_v57 = vmul.f32 %v7044_v56, %v7044_v56  ;;  %v7053_v30 = vadd.f32 %v3013_v13, %v2985_v43 }
 0x744   : > { %3139 = vadd.xlane.f32.xlu2 %v3138_v26  ;;  %v3162_v55 = vadd.f32 %v3153_v0, %v3152_v57  ;;  %v3155_v37 = vmul.f32 %v7053_v30, %v7053_v30 }
 0x745   : > { %v2926_v6 = vpop.f32.mrf.mxu3 }
 0x746   : > { %v2927_v50 = vadd.f32 %v2926_v6, %v7040_v47  ;;  %3163 = vadd.xlane.f32.xlu1 %v3162_v55  ;;  %v7763_v55 = vld [vmem:[#allocation32_spill] sm:$0xff] }
 0x748   : > { %v7056_v3 = vadd.f32 %v2955_v48, %v2927_v50 }
 0x74a   : > { %v3141_v52 = vadd.f32 %v7053_v30, %v7056_v3  ;;  %v3154_v20 = vmul.f32 %v7056_v3, %v7056_v3 }
 0x74b   : > { %v3033_v17 = vpop.f32.mrf.mxu0 }
 0x74c   : > { %3142 = vadd.xlane.f32.xlu0 %v3141_v52  ;;  %v3165_v62 = vadd.f32 %v3155_v37, %v3154_v20  ;;  %v3034_v27 = vadd.f32 %v3033_v17, %v7012_v8 }
 0x74e   : > { %3166 = vadd.xlane.f32.xlu2 %v3165_v62 }
 0x74f   : > { %v3120_v4 = vpop.f32.mrf.mxu1 }
 0x751   : > { %v3091_v36 = vpop.f32.mrf.mxu3 }
 0x752   : > { %v3092_v34 = vadd.f32 %v3091_v36, %v7012_v8 }
 0x753   : > { %v3036_v31 = vpop.f32.mrf.mxu0 }
 0x754   : > { %v7066_v7 = vadd.f32 %v3120_v4, %v3092_v34  ;;  %v3037_v41 = vadd.f32 %v3036_v31, %v7022_v11 }
 0x755   : > { %v3062_v61 = vpop.f32.mrf.mxu2 }
 0x756   : > { %v7068_v24 = vadd.f32 %v3062_v61, %v3034_v27  ;;  %v3261_v29 = vmul.f32 %v7066_v7, %v7066_v7 }
 0x757   : > { %v3123_v63 = vpop.f32.mrf.mxu1 }
 0x758   : > { %v3260_v18 = vmul.f32 %v7068_v24, %v7068_v24  ;;  %v3244_v12 = vadd.f32 %v7066_v7, %v7068_v24 }
 0x759   : > { %v3094_v32 = vpop.f32.mrf.mxu3 }
 0x75a   : > { %v3095_v9 = vadd.f32 %v3094_v32, %v7022_v11  ;;  %3245 = vadd.xlane.f32.xlu1 %v3244_v12  ;;  %v3268_v8 = vadd.f32 %v3261_v29, %v3260_v18 }
 0x75b   : > { %v3039_v23 = vpop.f32.mrf.mxu0 }
 0x75c   : > { %3269 = vadd.xlane.f32.xlu0 %v3268_v8  ;;  %v7078_v60 = vadd.f32 %v3123_v63, %v3095_v9  ;;  %v3040_v2 = vadd.f32 %v3039_v23, %v2880_v38 }
 0x75d   : > { %v3065_v46 = vpop.f32.mrf.mxu2 }
 0x75e   : > { %v7080_v25 = vadd.f32 %v3065_v46, %v3037_v41  ;;  %v3263_v0 = vmul.f32 %v7078_v60, %v7078_v60 }
 0x75f   : > { %v3126_v51 = vpop.f32.mrf.mxu1 }
 0x760   : > { %v3247_v54 = vadd.f32 %v7078_v60, %v7080_v25 }
 0x761   : > { %v3097_v19 = vpop.f32.mrf.mxu3 }
 0x762   : > { %v3098_v39 = vadd.f32 %v3097_v19, %v2880_v38  ;;  %3248 = vadd.xlane.f32.xlu2 %v3247_v54 }
 0x763   : > { %v3042_v28 = vpop.f32.mrf.mxu0 }
 0x764   : > { %v7084_v59 = vadd.f32 %v3126_v51, %v3098_v39  ;;  %v3043_v45 = vadd.f32 %v3042_v28, %v7040_v47 }
 0x765   : > { %v3068_v33 = vpop.f32.mrf.mxu2 }
 0x766   : > { %v7086_v58 = vadd.f32 %v3068_v33, %v3040_v2  ;;  %v3265_v11 = vmul.f32 %v7084_v59, %v7084_v59 }
 0x767   : > { %v3129_v53 = vpop.f32.mrf.mxu1 }
 0x768   : > { %v3264_v49 = vmul.f32 %v7086_v58, %v7086_v58  ;;  %v3250_v16 = vadd.f32 %v7084_v59, %v7086_v58 }
 0x769   : > { %v3100_v22 = vpop.f32.mrf.mxu3 }
 0x76a   : > { %v3101_v10 = vadd.f32 %v3100_v22, %v7040_v47  ;;  %3251 = vadd.xlane.f32.xlu0 %v3250_v16  ;;  %v3274_v38 = vadd.f32 %v3265_v11, %v3264_v49  ;;  %v3262_v47 = vmul.f32 %v7080_v25, %v7080_v25 }
 0x76c   : > { %v7096_v5 = vadd.f32 %v3129_v53, %v3101_v10  ;;  %3275 = vadd.xlane.f32.xlu2 %v3274_v38  ;;  %v3271_v26 = vadd.f32 %v3263_v0, %v3262_v47 }
 0x76d   : > { %v3071_v40 = vpop.f32.mrf.mxu2 }
 0x76e   : > { %v7098_v44 = vadd.f32 %v3071_v40, %v3043_v45  ;;  %v3267_v14 = vmul.f32 %v7096_v5, %v7096_v5 }
 0x770   : > { %v3266_v43 = vmul.f32 %v7098_v44, %v7098_v44  ;;  %v3253_v48 = vadd.f32 %v7096_v5, %v7098_v44 }
 0x772   : > { %3254 = vadd.xlane.f32.xlu1 %v3253_v48  ;;  %v3277_v13 = vadd.f32 %v3267_v14, %v3266_v43 }
 0x774   : > { %3278 = vadd.xlane.f32.xlu0 %v3277_v13 }
 0x77a   : > { %3272 = vadd.xlane.f32.xlu1 %v3271_v26 }
 0x7a7   : > { %v3134_v57 = vpop.xlane.xlu0 %3133 }
 0x7a8   : > { %v3144_v6 = vmul.f32 %v3134_v57, %v7763_v55 }
 0x7a9   : > { %v3158_v50 = vpop.xlane.xlu2 %3157 }
 0x7aa   : > { %v3168_v37 = vmul.f32 %v3158_v50, %v7763_v55  ;;  %v3172_v52 = vmul.f32 %v3144_v6, %v3144_v6  ;;  %v3184_v28 = vsub.f32 %v7018_v35, %v3144_v6  ;;  %v3185_v16 = vsub.f32 %v7015_v1, %v3144_v6 }
 0x7ac   : > { %v3176_v20 = vsub.f32 %v3168_v37, %v3172_v52 }
 0x7ae   : > { %v3180_v17 = vmax.f32 %v3176_v20, 0.0 }
 0x7af   : > { %v3137_v62 = vpop.xlane.xlu1 %3136 }
 0x7b0   : > { %v3192_v4 = vadd.f32 1e-05, %v3180_v17  ;;  %v3145_v36 = vmul.f32 %v3137_v62, %v7763_v55 }
 0x7b1   : > { %v3161_v34 = vpop.xlane.xlu0 %3160 }
 0x7b2   : > { %3689 = vrsqrt.f32 %v3192_v4  ;;  %v3169_v27 = vmul.f32 %v3161_v34, %v7763_v55  ;;  %v3173_v31 = vmul.f32 %v3145_v36, %v3145_v36  ;;  %vm3202_vm14 = vweird.f32 %v3192_v4 }
 0x7b3   : > { %v3186_v57 = vsub.f32 %v7032_v42, %v3145_v36  ;;  %v3187_v6 = vsub.f32 %v7029_v21, %v3145_v36 }
 0x7b4   : > { %v3177_v61 = vsub.f32 %v3169_v27, %v3173_v31 }
 0x7b6   : > { %v3181_v63 = vmax.f32 %v3177_v61, 0.0 }
 0x7b7   : > { %v3140_v18 = vpop.xlane.xlu2 %3139 }
 0x7b8   : > { %v3690_v29 = vpop.eup %3689  ;;  %v3193_v32 = vadd.f32 1e-05, %v3181_v63  ;;  %v7115_v9 = vmul.f32 %v3140_v18, %v7763_v55 }
 0x7b9   : > { %v3197_v12 = vmul.f32 %v3690_v29, %v3192_v4  ;;  %v3164_v8 = vpop.xlane.xlu1 %3163  ;;  %vm3203_vm7 = vweird.f32 %v3690_v29 }
 0x7ba   : > { %3691 = vrsqrt.f32 %v3193_v32  ;;  %v3174_v46 = vmul.f32 %v7115_v9, %v7115_v9  ;;  %v3170_v23 = vmul.f32 %v3164_v8, %v7763_v55  ;;  %vm3204_vm15 = vmor %vm3202_vm14, %vm3203_vm7  ;;  %vm3212_vm10 = vweird.f32 %v3193_v32 }
 0x7bb   : > { %v3198_v41 = vmul.f32 %v3690_v29, %v3197_v12  ;;  %v3189_v18 = vsub.f32 %v7042_v15, %v7115_v9 }
 0x7bc   : > { %v3178_v54 = vsub.f32 %v3170_v23, %v3174_v46 }
 0x7bd   : > { %v3199_v51 = vmul.f32 0.5, %v3198_v41 }
 0x7be   : > { %v3182_v39 = vmax.f32 %v3178_v54, 0.0 }
 0x7bf   : > { %v3200_v19 = vsub.f32 1.5, %v3199_v51  ;;  %v3143_v2 = vpop.xlane.xlu0 %3142 }
 0x7c0   : > { %v3692_v33 = vpop.eup %3691  ;;  %v7122_v49 = vmul.f32 %v3143_v2, %v7763_v55  ;;  %v3194_v53 = vadd.f32 1e-05, %v3182_v39 }
 0x7c1   : > { %v3201_v11 = vmul.f32 %v3690_v29, %v3200_v19  ;;  %v3207_v22 = vmul.f32 %v3692_v33, %v3193_v32  ;;  %v3167_v10 = vpop.xlane.xlu2 %3166  ;;  %vm3213_vm11 = vweird.f32 %v3692_v33 }
 0x7c2   : > { %v3175_v45 = vmul.f32 %v7122_v49, %v7122_v49  ;;  %3693 = vrsqrt.f32 %v3194_v53  ;;  %v3171_v48 = vmul.f32 %v3167_v10, %v7763_v55  ;;  %vm3214_vm9 = vmor %vm3212_vm10, %vm3213_vm11  ;;  %vm3222_vm3 = vweird.f32 %v3194_v53 }
 0x7c3   : > { %v3205_v38 = vsel %vm3204_vm15, %v3690_v29, %v3201_v11  ;;  %v3208_v43 = vmul.f32 %v3692_v33, %v3207_v22  ;;  %v3188_v29 = vsub.f32 %v7044_v56, %v7115_v9  ;;  %v3190_v15 = vsub.f32 %v7056_v3, %v7122_v49 }
 0x7c4   : > { %v3236_v40 = vmul.f32 %v3205_v38, %v3184_v28  ;;  %v3237_v14 = vmul.f32 %v3205_v38, %v3185_v16  ;;  %v3179_v35 = vsub.f32 %v3171_v48, %v3175_v45  ;;  %v3191_v9 = vsub.f32 %v7053_v30, %v7122_v49 }
 0x7c5   : > { %v3209_v1 = vmul.f32 0.5, %v3208_v43 }
 0x7c6   : > { %3356 = vst [vmem:[%s7129_s19] sm:$0xff] %v3236_v40  ;;  %v3183_v47 = vmax.f32 %v3179_v35, 0.0 }
 0x7c7   : > { %3357 = vst [vmem:[%s7129_s19 + $0x8] sm:$0xff] %v3237_v14  ;;  %v3210_v13 = vsub.f32 1.5, %v3209_v1 }
 0x7c8   : > { %v3694_v0 = vpop.eup %3693  ;;  %v3195_v37 = vadd.f32 1e-05, %v3183_v47 }
 0x7c9   : > { %v3211_v26 = vmul.f32 %v3692_v33, %v3210_v13  ;;  %v3217_v50 = vmul.f32 %v3694_v0, %v3194_v53  ;;  %vm3223_vm12 = vweird.f32 %v3694_v0 }
 0x7ca   : > { %3695 = vrsqrt.f32 %v3195_v37  ;;  %vm3224_vm8 = vmor %vm3222_vm3, %vm3223_vm12  ;;  %vm3232_vm13 = vweird.f32 %v3195_v37 }
 0x7cb   : > { %v3215_v52 = vsel %vm3214_vm9, %v3692_v33, %v3211_v26  ;;  %v3218_v62 = vmul.f32 %v3694_v0, %v3217_v50 }
 0x7cc   : > { %v3238_v20 = vmul.f32 %v3215_v52, %v3186_v57  ;;  %v3239_v17 = vmul.f32 %v3215_v52, %v3187_v6 }
 0x7cd   : > { %v3246_v4 = vpop.xlane.xlu1 %3245  ;;  %v3219_v34 = vmul.f32 0.5, %v3218_v62 }
 0x7ce   : > { %3360 = vst [vmem:[%s7129_s19 + $0x20] sm:$0xff] %v3238_v20  ;;  %v7137_v27 = vmul.f32 %v3246_v4, %v7763_v55 }
 0x7cf   : > { %3361 = vst [vmem:[%s7129_s19 + $0x28] sm:$0xff] %v3239_v17  ;;  %v3270_v31 = vpop.xlane.xlu0 %3269  ;;  %v3220_v61 = vsub.f32 1.5, %v3219_v34 }
 0x7d0   : > { %v3280_v21 = vmul.f32 %v3270_v31, %v7763_v55  ;;  %v3284_v42 = vmul.f32 %v7137_v27, %v7137_v27  ;;  %v3696_v36 = vpop.eup %3695  ;;  %v3296_v26 = vsub.f32 %v7068_v24, %v7137_v27  ;;  %v3297_v57 = vsub.f32 %v7066_v7, %v7137_v27 }
 0x7d1   : > { %v3221_v63 = vmul.f32 %v3694_v0, %v3220_v61  ;;  %v3227_v12 = vmul.f32 %v3696_v36, %v3195_v37  ;;  %vm3233_vm0 = vweird.f32 %v3696_v36 }
 0x7d2   : > { %v3288_v32 = vsub.f32 %v3280_v21, %v3284_v42  ;;  %vm3234_vm4 = vmor %vm3232_vm13, %vm3233_vm0 }
 0x7d3   : > { %v3225_v8 = vsel %vm3224_vm8, %v3694_v0, %v3221_v63  ;;  %v3228_v23 = vmul.f32 %v3696_v36, %v3227_v12 }
 0x7d4   : > { %v3240_v41 = vmul.f32 %v3225_v8, %v3188_v29  ;;  %v3241_v46 = vmul.f32 %v3225_v8, %v3189_v18  ;;  %v3292_v51 = vmax.f32 %v3288_v32, 0.0 }
 0x7d5   : > { %v3229_v54 = vmul.f32 0.5, %v3228_v23  ;;  %v3249_v39 = vpop.xlane.xlu2 %3248 }
 0x7d6   : > { %3364 = vst [vmem:[%s7129_s19 + $0x40] sm:$0xff] %v3240_v41  ;;  %v3304_v19 = vadd.f32 1e-05, %v3292_v51  ;;  %v7168_v37 = vmul.f32 %v3249_v39, %v7763_v55 }
 0x7d7   : > { %3365 = vst [vmem:[%s7129_s19 + $0x48] sm:$0xff] %v3241_v46  ;;  %v3230_v2 = vsub.f32 1.5, %v3229_v54 }
 0x7d8   : > { %3697 = vrsqrt.f32 %v3304_v19  ;;  %vm3314_vm6 = vweird.f32 %v3304_v19  ;;  %v3285_v24 = vmul.f32 %v7168_v37, %v7168_v37 }
 0x7d9   : > { %v3231_v56 = vmul.f32 %v3696_v36, %v3230_v2 }
 0x7db   : > { %v3235_v33 = vsel %vm3234_vm4, %v3696_v36, %v3231_v56 }
 0x7dc   : > { %v3242_v28 = vmul.f32 %v3235_v33, %v3190_v15  ;;  %v3243_v16 = vmul.f32 %v3235_v33, %v3191_v9 }
 0x7dd   : > { %v3252_v11 = vpop.xlane.xlu0 %3251 }
 0x7de   : > { %v3258_v22 = vmul.f32 %v3252_v11, %v7763_v55  ;;  %v3698_v53 = vpop.eup %3697  ;;  %3368 = vst [vmem:[%s7129_s19 + $0x60] sm:$0xff] %v3242_v28 }
 0x7df   : > { %v3276_v10 = vpop.xlane.xlu2 %3275  ;;  %v3309_v38 = vmul.f32 %v3698_v53, %v3304_v19  ;;  %3369 = vst [vmem:[%s7129_s19 + $0x68] sm:$0xff] %v3243_v16  ;;  %vm3315_vm5 = vweird.f32 %v3698_v53 }
 0x7e0   : > { %v3286_v45 = vmul.f32 %v3258_v22, %v3258_v22  ;;  %v3282_v40 = vmul.f32 %v3276_v10, %v7763_v55  ;;  %vm3316_vm2 = vmor %vm3314_vm6, %vm3315_vm5  ;;  %v3301_v8 = vsub.f32 %v7084_v59, %v3258_v22 }
 0x7e1   : > { %v3310_v14 = vmul.f32 %v3698_v53, %v3309_v38 }
 0x7e2   : > { %v3290_v3 = vsub.f32 %v3282_v40, %v3286_v45 }
 0x7e3   : > { %v3311_v43 = vmul.f32 0.5, %v3310_v14 }
 0x7e4   : > { %v3294_v48 = vmax.f32 %v3290_v3, 0.0 }
 0x7e5   : > { %v3255_v30 = vpop.xlane.xlu1 %3254  ;;  %v3312_v49 = vsub.f32 1.5, %v3311_v43 }
 0x7e6   : > { %v7158_v1 = vmul.f32 %v3255_v30, %v7763_v55  ;;  %v3306_v35 = vadd.f32 1e-05, %v3294_v48 }
 0x7e7   : > { %v3279_v13 = vpop.xlane.xlu0 %3278  ;;  %v3313_v47 = vmul.f32 %v3698_v53, %v3312_v49 }
 0x7e8   : > { %v3283_v0 = vmul.f32 %v3279_v13, %v7763_v55  ;;  %3699 = vrsqrt.f32 %v3306_v35  ;;  %v3287_v6 = vmul.f32 %v7158_v1, %v7158_v1  ;;  %vm3334_vm7 = vweird.f32 %v3306_v35 }
 0x7e9   : > { %v3317_v50 = vsel %vm3316_vm2, %v3698_v53, %v3313_v47  ;;  %v3302_v59 = vsub.f32 %v7098_v44, %v7158_v1 }
 0x7ea   : > { %v3348_v52 = vmul.f32 %v3317_v50, %v3296_v26  ;;  %v3349_v20 = vmul.f32 %v3317_v50, %v3297_v57  ;;  %v3291_v17 = vsub.f32 %v3283_v0, %v3287_v6 }
 0x7ec   : > { %3358 = vst [vmem:[%s7129_s19 + $0x10] sm:$0xff] %v3348_v52  ;;  %v3295_v62 = vmax.f32 %v3291_v17, 0.0 }
 0x7ed   : > { %v3273_v4 = vpop.xlane.xlu1 %3272  ;;  %3359 = vst [vmem:[%s7129_s19 + $0x18] sm:$0xff] %v3349_v20 }
 0x7ee   : > { %v3281_v7 = vmul.f32 %v3273_v4, %v7763_v55  ;;  %v3700_v34 = vpop.eup %3699  ;;  %v3307_v27 = vadd.f32 1e-05, %v3295_v62  ;;  %v3300_v55 = vsub.f32 %v7086_v58, %v3258_v22  ;;  %v3303_v58 = vsub.f32 %v7096_v5, %v7158_v1 }
 0x7ef   : > { %v3329_v31 = vmul.f32 %v3700_v34, %v3306_v35  ;;  %vm3335_vm1 = vweird.f32 %v3700_v34  ;;  %v3298_v5 = vsub.f32 %v7080_v25, %v7168_v37  ;;  %v3299_v22 = vsub.f32 %v7078_v60, %v7168_v37 }
 0x7f0   : > { %v3289_v61 = vsub.f32 %v3281_v7, %v3285_v24  ;;  %3701 = vrsqrt.f32 %v3307_v27  ;;  %vm3336_vm14 = vmor %vm3334_vm7, %vm3335_vm1  ;;  %vm3344_vm11 = vweird.f32 %v3307_v27 }
 0x7f1   : > { %v3330_v21 = vmul.f32 %v3700_v34, %v3329_v31 }
 0x7f2   : > { %v3293_v42 = vmax.f32 %v3289_v61, 0.0 }
 0x7f3   : > { %v3331_v36 = vmul.f32 0.5, %v3330_v21 }
 0x7f4   : > { %v3305_v63 = vadd.f32 1e-05, %v3293_v42 }
 0x7f5   : > { %v3332_v29 = vsub.f32 1.5, %v3331_v36 }
 0x7f6   : > { %3703 = vrsqrt.f32 %v3305_v63  ;;  %v3702_v18 = vpop.eup %3701  ;;  %vm3324_vm12 = vweird.f32 %v3305_v63 }
 0x7f7   : > { %v3333_v12 = vmul.f32 %v3700_v34, %v3332_v29  ;;  %v3339_v32 = vmul.f32 %v3702_v18, %v3307_v27  ;;  %vm3345_vm15 = vweird.f32 %v3702_v18 }
 0x7f8   : > { %vm3346_vm10 = vmor %vm3344_vm11, %vm3345_vm15 }
 0x7f9   : > { %v3337_v41 = vsel %vm3336_vm14, %v3700_v34, %v3333_v12  ;;  %v3340_v46 = vmul.f32 %v3702_v18, %v3339_v32 }
 0x7fa   : > { %v3352_v23 = vmul.f32 %v3337_v41, %v3300_v55  ;;  %v3353_v51 = vmul.f32 %v3337_v41, %v3301_v8 }
 0x7fb   : > { %v3341_v19 = vmul.f32 0.5, %v3340_v46 }
 0x7fc   : > { %v3704_v54 = vpop.eup %3703  ;;  %3366 = vst [vmem:[%s7129_s19 + $0x50] sm:$0xff] %v3352_v23 }
 0x7fd   : > { %v3319_v39 = vmul.f32 %v3704_v54, %v3305_v63  ;;  %3367 = vst [vmem:[%s7129_s19 + $0x58] sm:$0xff] %v3353_v51  ;;  %v3342_v2 = vsub.f32 1.5, %v3341_v19  ;;  %vm3325_vm9 = vweird.f32 %v3704_v54 }
 0x7fe   : > { %vm3326_vm3 = vmor %vm3324_vm12, %vm3325_vm9 }
 0x7ff   : > { %v3320_v56 = vmul.f32 %v3704_v54, %v3319_v39  ;;  %v3343_v15 = vmul.f32 %v3702_v18, %v3342_v2 }
 0x801   : > { %v3321_v9 = vmul.f32 0.5, %v3320_v56  ;;  %v3347_v33 = vsel %vm3346_vm10, %v3702_v18, %v3343_v15 }
 0x802   : > { %v3354_v11 = vmul.f32 %v3347_v33, %v3302_v59  ;;  %v3355_v28 = vmul.f32 %v3347_v33, %v3303_v58 }
 0x803   : > { %v3322_v16 = vsub.f32 1.5, %v3321_v9 }
 0x804   : > { %3370 = vst [vmem:[%s7129_s19 + $0x70] sm:$0xff] %v3354_v11 }
 0x805   : > { %v3323_v44 = vmul.f32 %v3704_v54, %v3322_v16  ;;  %3371 = vst [vmem:[%s7129_s19 + $0x78] sm:$0xff] %v3355_v28 }
 0x807   : > { %v3327_v53 = vsel %vm3326_vm3, %v3704_v54, %v3323_v44 }
 0x808   : > { %v3350_v10 = vmul.f32 %v3327_v53, %v3298_v5  ;;  %v3351_v38 = vmul.f32 %v3327_v53, %v3299_v22 }
 0x80a   : > { %3362 = vst [vmem:[%s7129_s19 + $0x30] sm:$0xff] %v3350_v10 }
 0x80b   : > { %3363 = vst [vmem:[%s7129_s19 + $0x38] sm:$0xff] %v3351_v38 }
 0x80c   : > { %3896 = shalt.err (!%p3893_p9)
}
 0x80d   : > { %s4002_s27 = smov 512  }
 0x80e   : > { %3554 = dma.vmem_to_hbm [thread:$0]  (%p4129_p13), %s3386_s16, 2048, %s3388_s20, %s3373_s23, %s4002_s27, %s4002_s27, %s7493_s21  }
 0x80f PF: > { %s3402_s19 = sand.u32 1, %s3931_s30   ;;  %p7764_p10 = scmp.ge.s32.totalorder %s3943_s12, 2 }
 0x810   : > { %s3403_s17 = scalar_lea.sflag [#allocation4], %s3402_s19 }
 0x811   : > { %p3571_p11 = pnand %p7764_p10, %p4134_p4 }
 0x813   : > { %p3572_p0 = pneg %p3571_p11 }
 0x815   : > { %3926 = dma.done.wait (%p3572_p0), %s3403_s17, 2048  }
 0x816   : > { %3928 = vsyncadd (%p3572_p0), %s3403_s17, 4294965248  ;;  %p24_p2 = scmp.ge.s32.totalorder %s4109_s15, 4   ;;  %s7765_s30 = smov %s3935_s10 }
 0x817   : > { %s7766_s10 = smov %s3939_s11  ;;  %s7767_s11 = smov %s4121_s22 }
 0x818   : > { %s7768_s12 = smov %s4109_s15  ;;  %26 = sbr.rel (!%p24_p2) target bundleno = 11 (0xb), region = 167 }
 0x81d   :  { %3409 = vsyncpa [#allocation3], 1 }
 0x81e   :  { %3411 = vsyncpa [#allocation3 + $0x1], 1 }
 0x81f   :  { %3412 = vsyncpa [#allocation6], 1 }
 0x820   :  { %3413 = vsyncpa [#allocation9], 1 }
 0x821   :  { %3414 = vsyncpa [#allocation4], 1 }
 0x822   :  { %3416 = vsyncpa [#allocation4 + $0x1], 1 }

</bundles_post_ra>
